<compile_context>
chip_gen: v5e
topology: v5e:2x2
jax: 0.10.0
libtpu: 0.0.40
codegen_flags: <defaults>
</compile_context>

<pallas_src>
import math

import jax
import jax.numpy as jnp
from jax.experimental import pallas as pl
from jax.experimental.pallas import tpu as pltpu


IN_DIM = 768
OUT_PAD = 128          # lane-dense packed output width
NS, NA = 5, 3          # speech / accent logit counts

# MACs per row through the padded layer stack (x2 for FLOPs).
_FLOPS_PER_ROW = 2 * (768 * 384 + 384 * 256 + 256 * 256 + 256 * 128
                      + 128 * 128 + 128 * 128 + 128 * 128)


def _round_up(x, m):
    return (x + m - 1) // m * m


# ----------------------------- kernel -------------------------------------
def _mlp_kernel(
    x_ref,
    w1, b1, w2, b2, w3, b3, w4, b4, w5, b5, w67, b67, w89, b89,
    out_ref,
):
    """Fused 9-layer MLP (heads 6/7 fused column-wise, 8/9 block-diagonal)."""

    def lin_relu(h, w_ref, b_ref):
        # bf16 MXU matmul, f32 accumulate; bias-add + ReLU stay in f32 (VPU),
        # then cast back to bf16 for the next MXU push.
        y = jnp.dot(h, w_ref[...], preferred_element_type=jnp.float32)
        y = jnp.maximum(y + b_ref[...], 0.0)
        return y.astype(jnp.bfloat16)

    h = x_ref[...]               # already bf16 (wrapper casts before the call)
    h = lin_relu(h, w1, b1)      # 768 -> 384
    h = lin_relu(h, w2, b2)      # 384 -> 256
    h = lin_relu(h, w3, b3)      # 256 -> 256 (192 real + 64 zero lanes)
    h = lin_relu(h, w4, b4)      # 256 -> 128
    h = lin_relu(h, w5, b5)      # 128 -> 128 (64 real)
    h = lin_relu(h, w67, b67)    # 128 -> 128 (hs in lanes 0:32, ha in 32:64)
    out_ref[...] = (
        jnp.dot(h, w89[...], preferred_element_type=jnp.float32) + b89[...]
    ).astype(out_ref.dtype)      # logits packed in lanes 0:8, rest zero


# ----------------------------- tiling helpers ------------------------------
def _vmem_capacity_bytes():
    """Per-core VMEM capacity; conservative (v7x) fallback if query fails."""
    try:
        info = pltpu.get_tpu_info()
        cap = getattr(info, "vmem_capacity_bytes", None)
        if cap:
            return int(cap)
    except Exception:
        pass
    return 64 << 20


def _choose_tile(B, tm_max, weight_bytes):
    """Pick (tm, Bp): bounded padding, >=2 grid steps when possible, and a
    tile that fits this generation's VMEM."""
    cap = _vmem_capacity_bytes()
    # per-row VMEM: double-buffered bf16 x/out tiles + inter-layer headroom.
    per_row = 2 * (IN_DIM + OUT_PAD) * 2 + 8 * 1024
    budget = int(cap * 0.75) - 2 * weight_bytes - (4 << 20)
    tm_cap = max(16, (budget // per_row) // 16 * 16)
    tm_max = max(16, min(tm_max, tm_cap))
    # >= 2 grid steps whenever the batch allows it (v7x megacore sharding).
    min_tiles = 2 if B >= 32 else 1
    n_tiles = max(pl.cdiv(B, tm_max), min_tiles)
    tm = _round_up(pl.cdiv(B, n_tiles), 16)   # bf16 min tile is (16, 128)
    return tm, n_tiles * tm


# ----------------------------- wrapper -------------------------------------
def network_forward(x, packed_params, *, tm_max=1024):
    """Full MLP forward in one Pallas call.

    x:             [B, 768] float (cast to bf16 here, before the input DMA)
    packed_params: output of pack_params()
    returns        (xs [B, 5], xa [B, 3]) float32
    """
    B = x.shape[0]
    weight_bytes = sum(int(p.size) * p.dtype.itemsize for p in packed_params)
    tm, Bp = _choose_tile(B, tm_max, weight_bytes)

    x = x.astype(jnp.bfloat16)               # halve the dominant HBM stream
    if Bp != B:
        x = jnp.pad(x, ((0, Bp - B), (0, 0)))

    grid = (Bp // tm,)

    # Explicit scoped-VMEM limit: double-buffered x/out tiles + weights
    # (x2 for safety) + per-row intermediates + slack, clamped per-generation.
    vmem_limit = max(
        2 * weight_bytes + 2 * tm * (IN_DIM + OUT_PAD) * 2
        + tm * 8 * 1024 + (4 << 20),
        32 << 20,
    )
    vmem_limit = int(min(vmem_limit, int(_vmem_capacity_bytes() * 0.75)))

    cost = pl.CostEstimate(
        flops=Bp * _FLOPS_PER_ROW,
        transcendentals=0,
        bytes_accessed=Bp * IN_DIM * 2 + weight_bytes + Bp * OUT_PAD * 2,
    )

    def build_and_run(single_buffer_weights):
        x_spec = pl.BlockSpec((tm, IN_DIM), lambda i: (i, 0))
        out_spec = pl.BlockSpec((tm, OUT_PAD), lambda i: (i, 0))
        # Weights/biases: full-array blocks with a constant index_map -> DMA'd
        # once and kept resident in VMEM across all batch tiles.
        if single_buffer_weights:
            w_specs = [
                pl.BlockSpec(p.shape, lambda i: (0, 0),
                             pipeline_mode=pl.Buffered(1))
                for p in packed_params
            ]
        else:
            w_specs = [pl.BlockSpec(p.shape, lambda i: (0, 0))
                       for p in packed_params]
        return pl.pallas_call(
            _mlp_kernel,
            out_shape=jax.ShapeDtypeStruct((Bp, OUT_PAD), jnp.bfloat16),
            grid=grid,
            in_specs=[x_spec] + w_specs,
            out_specs=out_spec,
            compiler_params=pltpu.CompilerParams(
                dimension_semantics=("parallel",),
                vmem_limit_bytes=vmem_limit),
            cost_estimate=cost,
        )(x, *packed_params)

    try:
        # Preferred: single-buffered resident weights (reclaims ~1 MiB VMEM).
        out = build_and_run(True)
    except Exception:
        # Fallback: default double-buffered specs (always supported).
        out = build_and_run(False)

    xs = out[:B, :NS].astype(jnp.float32)
    xa = out[:B, NS:NS + NA].astype(jnp.float32)
    return xs, xa


# ----------------------------- param packing -------------------------------
def pack_params(params):
    """Convert logical params (w_i [in,out], b_i [1,out], f32) into the
    fused / zero-padded bf16 kernel layout."""
    (w1, b1, w2, b2, w3, b3, w4, b4, w5, b5,
     w6, b6, w7, b7, w8, b8, w9, b9) = params

    def as_row(b):
        return jnp.reshape(b, (1, -1)).astype(jnp.float32)

    def pad_w(w, in_pad, out_pad):
        fi, fo = w.shape
        return jnp.pad(w, ((0, in_pad - fi), (0, out_pad - fo)))

    def pad_b(b, out_pad):
        b = as_row(b)
        return jnp.pad(b, ((0, 0), (0, out_pad - b.shape[1])))

    # layer3: 192 output lanes padded to 256; layer4 input padded to match.
    w3p, b3p = pad_w(w3, 256, 256), pad_b(b3, 256)
    w4p, b4p = pad_w(w4, 256, 128), as_row(b4)
    # layer5: 64 output lanes padded to 128.
    w5p, b5p = pad_w(w5, 128, 128), pad_b(b5, 128)
    # fuse heads 6 & 7 column-wise: [64,32] || [64,32] inside [128,128].
    w67 = jnp.zeros((128, 128), jnp.float32)
    w67 = w67.at[:64, :32].set(w6).at[:64, 32:64].set(w7)
    b67 = jnp.zeros((1, 128), jnp.float32)
    b67 = b67.at[:, :32].set(as_row(b6)).at[:, 32:64].set(as_row(b7))
    # fuse output layers 8 & 9 block-diagonally: logits -> lanes 0:5 and 5:8.
    w89 = jnp.zeros((128, 128), jnp.float32)
    w89 = w89.at[:32, :NS].set(w8).at[32:64, NS:NS + NA].set(w9)
    b89 = jnp.zeros((1, 128), jnp.float32)
    b89 = b89.at[:, :NS].set(as_row(b8)).at[:, NS:NS + NA].set(as_row(b9))

    bf16 = lambda w: w.astype(jnp.bfloat16)
    return (
        bf16(w1), as_row(b1),
        bf16(w2), as_row(b2),
        bf16(w3p), b3p,
        bf16(w4p), b4p,
        bf16(w5p), b5p,
        bf16(w67), b67,
        bf16(w89), b89,
    )


# ----------------------------- param init ----------------------------------
def init_params(key):
    """PyTorch-style uniform(+-1/sqrt(fan_in)) init; logical (unpadded) layout.

    Weights are [in_features, out_features] = PyTorch weight.T; biases [1, out].
    """
    dims = [
        (768, 384), (384, 256), (256, 192), (192, 128), (128, 64),
        (64, 32), (64, 32), (32, 5), (32, 3),
    ]
    params = []
    for fan_in, fan_out in dims:
        kw, kb, key = jax.random.split(key, 3)
        bound = 1.0 / math.sqrt(fan_in)
        w = jax.random.uniform(kw, (fan_in, fan_out), jnp.float32,
                               minval=-bound, maxval=bound)
        b = jax.random.uniform(kb, (1, fan_out), jnp.float32,
                               minval=-bound, maxval=bound)
        params += [w, b]
    return tuple(params)


# ----------------------------- reference -----------------------------------
def network_forward_ref(x, params):
    (w1, b1, w2, b2, w3, b3, w4, b4, w5, b5,
     w6, b6, w7, b7, w8, b8, w9, b9) = params
    relu = jax.nn.relu
    h = relu(x @ w1 + b1)
    h = relu(h @ w2 + b2)
    h = relu(h @ w3 + b3)
    h = relu(h @ w4 + b4)
    h = relu(h @ w5 + b5)
    hs = relu(h @ w6 + b6)
    ha = relu(h @ w7 + b7)
    return hs @ w8 + b8, ha @ w9 + b9


# ----------------------------- main -----------------------------------------
if __name__ == "__main__":
    key = jax.random.PRNGKey(0)
    kx, kp = jax.random.split(key)

    B = 8  # small demo batch; real workloads should batch many rows per call
    x = jax.random.normal(kx, (B, 768), dtype=jnp.float32)
    params = init_params(kp)
    packed = pack_params(params)

    xs, xa = network_forward(x, packed)
    jax.block_until_ready((xs, xa))

    # sanity check against pure-JAX f32 reference (bf16 matmul tolerance)
    xs_ref, xa_ref = network_forward_ref(x, params)
    assert xs.shape == (B, 5) and xa.shape == (B, 3)
    assert jnp.allclose(xs, xs_ref, atol=5e-2, rtol=5e-2)
    assert jnp.allclose(xa, xa_ref, atol=5e-2, rtol=5e-2)

    print("KERNEL_OK")
</pallas_src>

<mosaic_0001>
module attributes {stable_mosaic.version = 11 : i64} {
  func.func @_mlp_kernel(%arg0: i32, %arg1: memref<16x768xbf16, #tpu.memory_space<vmem>>, %arg2: memref<768x384xbf16, #tpu.memory_space<vmem>>, %arg3: memref<1x384xf32, #tpu.memory_space<vmem>>, %arg4: memref<384x256xbf16, #tpu.memory_space<vmem>>, %arg5: memref<1x256xf32, #tpu.memory_space<vmem>>, %arg6: memref<256x256xbf16, #tpu.memory_space<vmem>>, %arg7: memref<1x256xf32, #tpu.memory_space<vmem>>, %arg8: memref<256x128xbf16, #tpu.memory_space<vmem>>, %arg9: memref<1x128xf32, #tpu.memory_space<vmem>>, %arg10: memref<128x128xbf16, #tpu.memory_space<vmem>>, %arg11: memref<1x128xf32, #tpu.memory_space<vmem>>, %arg12: memref<128x128xbf16, #tpu.memory_space<vmem>>, %arg13: memref<1x128xf32, #tpu.memory_space<vmem>>, %arg14: memref<128x128xbf16, #tpu.memory_space<vmem>>, %arg15: memref<1x128xf32, #tpu.memory_space<vmem>>, %arg16: memref<16x128xbf16, #tpu.memory_space<vmem>>) attributes {dimension_semantics = [#tpu.dimension_semantics<parallel>], iteration_bounds = array<i64: 1>, scalar_prefetch = 0 : i64, scratch_operands = 0 : i64, tpu.core_type = #tpu.core_type<tc>, window_params = [{transform_indices = @transform_0, window_bounds = array<i64: 16, 768>}, {pipeline_mode = #tpu.pipeline_mode<synchronous>, transform_indices = @transform_1, window_bounds = array<i64: 768, 384>}, {pipeline_mode = #tpu.pipeline_mode<synchronous>, transform_indices = @transform_2, window_bounds = array<i64: 1, 384>}, {pipeline_mode = #tpu.pipeline_mode<synchronous>, transform_indices = @transform_3, window_bounds = array<i64: 384, 256>}, {pipeline_mode = #tpu.pipeline_mode<synchronous>, transform_indices = @transform_4, window_bounds = array<i64: 1, 256>}, {pipeline_mode = #tpu.pipeline_mode<synchronous>, transform_indices = @transform_5, window_bounds = array<i64: 256, 256>}, {pipeline_mode = #tpu.pipeline_mode<synchronous>, transform_indices = @transform_6, window_bounds = array<i64: 1, 256>}, {pipeline_mode = #tpu.pipeline_mode<synchronous>, transform_indices = @transform_7, window_bounds = array<i64: 256, 128>}, {pipeline_mode = #tpu.pipeline_mode<synchronous>, transform_indices = @transform_8, window_bounds = array<i64: 1, 128>}, {pipeline_mode = #tpu.pipeline_mode<synchronous>, transform_indices = @transform_9, window_bounds = array<i64: 128, 128>}, {pipeline_mode = #tpu.pipeline_mode<synchronous>, transform_indices = @transform_10, window_bounds = array<i64: 1, 128>}, {pipeline_mode = #tpu.pipeline_mode<synchronous>, transform_indices = @transform_11, window_bounds = array<i64: 128, 128>}, {pipeline_mode = #tpu.pipeline_mode<synchronous>, transform_indices = @transform_12, window_bounds = array<i64: 1, 128>}, {pipeline_mode = #tpu.pipeline_mode<synchronous>, transform_indices = @transform_13, window_bounds = array<i64: 128, 128>}, {pipeline_mode = #tpu.pipeline_mode<synchronous>, transform_indices = @transform_14, window_bounds = array<i64: 1, 128>}, {transform_indices = @transform_15, window_bounds = array<i64: 16, 128>}]} {
    %c0 = arith.constant 0 : index
    %c0_0 = arith.constant 0 : index
    %0 = vector.load %arg1[%c0, %c0_0] : memref<16x768xbf16, #tpu.memory_space<vmem>>, vector<16x768xbf16>
    %c0_1 = arith.constant 0 : index
    %c0_2 = arith.constant 0 : index
    %1 = vector.load %arg2[%c0_1, %c0_2] : memref<768x384xbf16, #tpu.memory_space<vmem>>, vector<768x384xbf16>
    %cst = arith.constant dense<0.000000e+00> : vector<16x384xf32>
    %2 = tpu.matmul %0, %1, %cst {dimension_numbers = #tpu.dot_dimension_numbers<[1], [0], [0], [1], [0, 0, 1, 1], [], []>} : vector<16x768xbf16>, vector<768x384xbf16>, vector<16x384xf32> -> vector<16x384xf32>
    %c0_3 = arith.constant 0 : index
    %c0_4 = arith.constant 0 : index
    %3 = vector.load %arg3[%c0_3, %c0_4] : memref<1x384xf32, #tpu.memory_space<vmem>>, vector<1x384xf32>
    %4 = vector.broadcast %3 : vector<1x384xf32> to vector<16x384xf32>
    %5 = arith.addf %2, %4 : vector<16x384xf32>
    %cst_5 = arith.constant 0.000000e+00 : f32
    %6 = vector.broadcast %cst_5 : f32 to vector<16x384xf32>
    %7 = arith.maximumf %5, %6 : vector<16x384xf32>
    %8 = arith.truncf %7 : vector<16x384xf32> to vector<16x384xbf16>
    %c0_6 = arith.constant 0 : index
    %c0_7 = arith.constant 0 : index
    %9 = vector.load %arg4[%c0_6, %c0_7] : memref<384x256xbf16, #tpu.memory_space<vmem>>, vector<384x256xbf16>
    %cst_8 = arith.constant dense<0.000000e+00> : vector<16x256xf32>
    %10 = tpu.matmul %8, %9, %cst_8 {dimension_numbers = #tpu.dot_dimension_numbers<[1], [0], [0], [1], [0, 0, 1, 1], [], []>} : vector<16x384xbf16>, vector<384x256xbf16>, vector<16x256xf32> -> vector<16x256xf32>
    %c0_9 = arith.constant 0 : index
    %c0_10 = arith.constant 0 : index
    %11 = vector.load %arg5[%c0_9, %c0_10] : memref<1x256xf32, #tpu.memory_space<vmem>>, vector<1x256xf32>
    %12 = vector.broadcast %11 : vector<1x256xf32> to vector<16x256xf32>
    %13 = arith.addf %10, %12 : vector<16x256xf32>
    %cst_11 = arith.constant 0.000000e+00 : f32
    %14 = vector.broadcast %cst_11 : f32 to vector<16x256xf32>
    %15 = arith.maximumf %13, %14 : vector<16x256xf32>
    %16 = arith.truncf %15 : vector<16x256xf32> to vector<16x256xbf16>
    %c0_12 = arith.constant 0 : index
    %c0_13 = arith.constant 0 : index
    %17 = vector.load %arg6[%c0_12, %c0_13] : memref<256x256xbf16, #tpu.memory_space<vmem>>, vector<256x256xbf16>
    %cst_14 = arith.constant dense<0.000000e+00> : vector<16x256xf32>
    %18 = tpu.matmul %16, %17, %cst_14 {dimension_numbers = #tpu.dot_dimension_numbers<[1], [0], [0], [1], [0, 0, 1, 1], [], []>} : vector<16x256xbf16>, vector<256x256xbf16>, vector<16x256xf32> -> vector<16x256xf32>
    %c0_15 = arith.constant 0 : index
    %c0_16 = arith.constant 0 : index
    %19 = vector.load %arg7[%c0_15, %c0_16] : memref<1x256xf32, #tpu.memory_space<vmem>>, vector<1x256xf32>
    %20 = vector.broadcast %19 : vector<1x256xf32> to vector<16x256xf32>
    %21 = arith.addf %18, %20 : vector<16x256xf32>
    %cst_17 = arith.constant 0.000000e+00 : f32
    %22 = vector.broadcast %cst_17 : f32 to vector<16x256xf32>
    %23 = arith.maximumf %21, %22 : vector<16x256xf32>
    %24 = arith.truncf %23 : vector<16x256xf32> to vector<16x256xbf16>
    %c0_18 = arith.constant 0 : index
    %c0_19 = arith.constant 0 : index
    %25 = vector.load %arg8[%c0_18, %c0_19] : memref<256x128xbf16, #tpu.memory_space<vmem>>, vector<256x128xbf16>
    %cst_20 = arith.constant dense<0.000000e+00> : vector<16x128xf32>
    %26 = tpu.matmul %24, %25, %cst_20 {dimension_numbers = #tpu.dot_dimension_numbers<[1], [0], [0], [1], [0, 0, 1, 1], [], []>} : vector<16x256xbf16>, vector<256x128xbf16>, vector<16x128xf32> -> vector<16x128xf32>
    %c0_21 = arith.constant 0 : index
    %c0_22 = arith.constant 0 : index
    %27 = vector.load %arg9[%c0_21, %c0_22] : memref<1x128xf32, #tpu.memory_space<vmem>>, vector<1x128xf32>
    %28 = vector.broadcast %27 : vector<1x128xf32> to vector<16x128xf32>
    %29 = arith.addf %26, %28 : vector<16x128xf32>
    %cst_23 = arith.constant 0.000000e+00 : f32
    %30 = vector.broadcast %cst_23 : f32 to vector<16x128xf32>
    %31 = arith.maximumf %29, %30 : vector<16x128xf32>
    %32 = arith.truncf %31 : vector<16x128xf32> to vector<16x128xbf16>
    %c0_24 = arith.constant 0 : index
    %c0_25 = arith.constant 0 : index
    %33 = vector.load %arg10[%c0_24, %c0_25] : memref<128x128xbf16, #tpu.memory_space<vmem>>, vector<128x128xbf16>
    %cst_26 = arith.constant dense<0.000000e+00> : vector<16x128xf32>
    %34 = tpu.matmul %32, %33, %cst_26 {dimension_numbers = #tpu.dot_dimension_numbers<[1], [0], [0], [1], [0, 0, 1, 1], [], []>} : vector<16x128xbf16>, vector<128x128xbf16>, vector<16x128xf32> -> vector<16x128xf32>
    %c0_27 = arith.constant 0 : index
    %c0_28 = arith.constant 0 : index
    %35 = vector.load %arg11[%c0_27, %c0_28] : memref<1x128xf32, #tpu.memory_space<vmem>>, vector<1x128xf32>
    %36 = vector.broadcast %35 : vector<1x128xf32> to vector<16x128xf32>
    %37 = arith.addf %34, %36 : vector<16x128xf32>
    %cst_29 = arith.constant 0.000000e+00 : f32
    %38 = vector.broadcast %cst_29 : f32 to vector<16x128xf32>
    %39 = arith.maximumf %37, %38 : vector<16x128xf32>
    %40 = arith.truncf %39 : vector<16x128xf32> to vector<16x128xbf16>
    %c0_30 = arith.constant 0 : index
    %c0_31 = arith.constant 0 : index
    %41 = vector.load %arg12[%c0_30, %c0_31] : memref<128x128xbf16, #tpu.memory_space<vmem>>, vector<128x128xbf16>
    %cst_32 = arith.constant dense<0.000000e+00> : vector<16x128xf32>
    %42 = tpu.matmul %40, %41, %cst_32 {dimension_numbers = #tpu.dot_dimension_numbers<[1], [0], [0], [1], [0, 0, 1, 1], [], []>} : vector<16x128xbf16>, vector<128x128xbf16>, vector<16x128xf32> -> vector<16x128xf32>
    %c0_33 = arith.constant 0 : index
    %c0_34 = arith.constant 0 : index
    %43 = vector.load %arg13[%c0_33, %c0_34] : memref<1x128xf32, #tpu.memory_space<vmem>>, vector<1x128xf32>
    %44 = vector.broadcast %43 : vector<1x128xf32> to vector<16x128xf32>
    %45 = arith.addf %42, %44 : vector<16x128xf32>
    %cst_35 = arith.constant 0.000000e+00 : f32
    %46 = vector.broadcast %cst_35 : f32 to vector<16x128xf32>
    %47 = arith.maximumf %45, %46 : vector<16x128xf32>
    %48 = arith.truncf %47 : vector<16x128xf32> to vector<16x128xbf16>
    %c0_36 = arith.constant 0 : index
    %c0_37 = arith.constant 0 : index
    %49 = vector.load %arg14[%c0_36, %c0_37] : memref<128x128xbf16, #tpu.memory_space<vmem>>, vector<128x128xbf16>
    %cst_38 = arith.constant dense<0.000000e+00> : vector<16x128xf32>
    %50 = tpu.matmul %48, %49, %cst_38 {dimension_numbers = #tpu.dot_dimension_numbers<[1], [0], [0], [1], [0, 0, 1, 1], [], []>} : vector<16x128xbf16>, vector<128x128xbf16>, vector<16x128xf32> -> vector<16x128xf32>
    %c0_39 = arith.constant 0 : index
    %c0_40 = arith.constant 0 : index
    %51 = vector.load %arg15[%c0_39, %c0_40] : memref<1x128xf32, #tpu.memory_space<vmem>>, vector<1x128xf32>
    %52 = vector.broadcast %51 : vector<1x128xf32> to vector<16x128xf32>
    %53 = arith.addf %50, %52 : vector<16x128xf32>
    %54 = arith.truncf %53 : vector<16x128xf32> to vector<16x128xbf16>
    %c0_41 = arith.constant 0 : index
    %c0_42 = arith.constant 0 : index
    %55 = vector.load %arg16[%c0_41, %c0_42] : memref<16x128xbf16, #tpu.memory_space<vmem>>, vector<16x128xbf16>
    tpu.vector_store %arg16[%c0_41, %c0_42], %54 {strides = array<i32>} : memref<16x128xbf16, #tpu.memory_space<vmem>>, vector<16x128xbf16>,
    return
  }
  func.func @transform_0(%arg0: i32) -> (i32, i32) {
    %c0_i32 = arith.constant 0 : i32
    %c0_i32_0 = arith.constant 0 : i32
    return %arg0, %c0_i32 : i32, i32
  }
  func.func @transform_1(%arg0: i32) -> (i32, i32) {
    %c0_i32 = arith.constant 0 : i32
    %c0_i32_0 = arith.constant 0 : i32
    %c0_i32_1 = arith.constant 0 : i32
    return %c0_i32, %c0_i32_0 : i32, i32
  }
  func.func @transform_2(%arg0: i32) -> (i32, i32) {
    %c0_i32 = arith.constant 0 : i32
    %c0_i32_0 = arith.constant 0 : i32
    %c0_i32_1 = arith.constant 0 : i32
    return %c0_i32, %c0_i32_0 : i32, i32
  }
  func.func @transform_3(%arg0: i32) -> (i32, i32) {
    %c0_i32 = arith.constant 0 : i32
    %c0_i32_0 = arith.constant 0 : i32
    %c0_i32_1 = arith.constant 0 : i32
    return %c0_i32, %c0_i32_0 : i32, i32
  }
  func.func @transform_4(%arg0: i32) -> (i32, i32) {
    %c0_i32 = arith.constant 0 : i32
    %c0_i32_0 = arith.constant 0 : i32
    %c0_i32_1 = arith.constant 0 : i32
    return %c0_i32, %c0_i32_0 : i32, i32
  }
  func.func @transform_5(%arg0: i32) -> (i32, i32) {
    %c0_i32 = arith.constant 0 : i32
    %c0_i32_0 = arith.constant 0 : i32
    %c0_i32_1 = arith.constant 0 : i32
    return %c0_i32, %c0_i32_0 : i32, i32
  }
  func.func @transform_6(%arg0: i32) -> (i32, i32) {
    %c0_i32 = arith.constant 0 : i32
    %c0_i32_0 = arith.constant 0 : i32
    %c0_i32_1 = arith.constant 0 : i32
    return %c0_i32, %c0_i32_0 : i32, i32
  }
  func.func @transform_7(%arg0: i32) -> (i32, i32) {
    %c0_i32 = arith.constant 0 : i32
    %c0_i32_0 = arith.constant 0 : i32
    %c0_i32_1 = arith.constant 0 : i32
    return %c0_i32, %c0_i32_0 : i32, i32
  }
  func.func @transform_8(%arg0: i32) -> (i32, i32) {
    %c0_i32 = arith.constant 0 : i32
    %c0_i32_0 = arith.constant 0 : i32
    %c0_i32_1 = arith.constant 0 : i32
    return %c0_i32, %c0_i32_0 : i32, i32
  }
  func.func @transform_9(%arg0: i32) -> (i32, i32) {
    %c0_i32 = arith.constant 0 : i32
    %c0_i32_0 = arith.constant 0 : i32
    %c0_i32_1 = arith.constant 0 : i32
    return %c0_i32, %c0_i32_0 : i32, i32
  }
  func.func @transform_10(%arg0: i32) -> (i32, i32) {
    %c0_i32 = arith.constant 0 : i32
    %c0_i32_0 = arith.constant 0 : i32
    %c0_i32_1 = arith.constant 0 : i32
    return %c0_i32, %c0_i32_0 : i32, i32
  }
  func.func @transform_11(%arg0: i32) -> (i32, i32) {
    %c0_i32 = arith.constant 0 : i32
    %c0_i32_0 = arith.constant 0 : i32
    %c0_i32_1 = arith.constant 0 : i32
    return %c0_i32, %c0_i32_0 : i32, i32
  }
  func.func @transform_12(%arg0: i32) -> (i32, i32) {
    %c0_i32 = arith.constant 0 : i32
    %c0_i32_0 = arith.constant 0 : i32
    %c0_i32_1 = arith.constant 0 : i32
    return %c0_i32, %c0_i32_0 : i32, i32
  }
  func.func @transform_13(%arg0: i32) -> (i32, i32) {
    %c0_i32 = arith.constant 0 : i32
    %c0_i32_0 = arith.constant 0 : i32
    %c0_i32_1 = arith.constant 0 : i32
    return %c0_i32, %c0_i32_0 : i32, i32
  }
  func.func @transform_14(%arg0: i32) -> (i32, i32) {
    %c0_i32 = arith.constant 0 : i32
    %c0_i32_0 = arith.constant 0 : i32
    %c0_i32_1 = arith.constant 0 : i32
    return %c0_i32, %c0_i32_0 : i32, i32
  }
  func.func @transform_15(%arg0: i32) -> (i32, i32) {
    %c0_i32 = arith.constant 0 : i32
    %c0_i32_0 = arith.constant 0 : i32
    return %arg0, %c0_i32 : i32, i32
  }
}

module attributes {stable_mosaic.version = 11 : i64} {
  func.func @_mlp_kernel(%arg0: i32, %arg1: memref<16x768xbf16, #tpu.memory_space<vmem>>, %arg2: memref<768x384xbf16, #tpu.memory_space<vmem>>, %arg3: memref<1x384xf32, #tpu.memory_space<vmem>>, %arg4: memref<384x256xbf16, #tpu.memory_space<vmem>>, %arg5: memref<1x256xf32, #tpu.memory_space<vmem>>, %arg6: memref<256x256xbf16, #tpu.memory_space<vmem>>, %arg7: memref<1x256xf32, #tpu.memory_space<vmem>>, %arg8: memref<256x128xbf16, #tpu.memory_space<vmem>>, %arg9: memref<1x128xf32, #tpu.memory_space<vmem>>, %arg10: memref<128x128xbf16, #tpu.memory_space<vmem>>, %arg11: memref<1x128xf32, #tpu.memory_space<vmem>>, %arg12: memref<128x128xbf16, #tpu.memory_space<vmem>>, %arg13: memref<1x128xf32, #tpu.memory_space<vmem>>, %arg14: memref<128x128xbf16, #tpu.memory_space<vmem>>, %arg15: memref<1x128xf32, #tpu.memory_space<vmem>>, %arg16: memref<16x128xbf16, #tpu.memory_space<vmem>>) attributes {dimension_semantics = [#tpu.dimension_semantics<parallel>], iteration_bounds = array<i64: 1>, scalar_prefetch = 0 : i64, scratch_operands = 0 : i64, tpu.core_type = #tpu.core_type<tc>, window_params = [{transform_indices = @transform_0, window_bounds = array<i64: 16, 768>}, {pipeline_mode = #tpu.pipeline_mode<synchronous>, transform_indices = @transform_1, window_bounds = array<i64: 768, 384>}, {pipeline_mode = #tpu.pipeline_mode<synchronous>, transform_indices = @transform_2, window_bounds = array<i64: 1, 384>}, {pipeline_mode = #tpu.pipeline_mode<synchronous>, transform_indices = @transform_3, window_bounds = array<i64: 384, 256>}, {pipeline_mode = #tpu.pipeline_mode<synchronous>, transform_indices = @transform_4, window_bounds = array<i64: 1, 256>}, {pipeline_mode = #tpu.pipeline_mode<synchronous>, transform_indices = @transform_5, window_bounds = array<i64: 256, 256>}, {pipeline_mode = #tpu.pipeline_mode<synchronous>, transform_indices = @transform_6, window_bounds = array<i64: 1, 256>}, {pipeline_mode = #tpu.pipeline_mode<synchronous>, transform_indices = @transform_7, window_bounds = array<i64: 256, 128>}, {pipeline_mode = #tpu.pipeline_mode<synchronous>, transform_indices = @transform_8, window_bounds = array<i64: 1, 128>}, {pipeline_mode = #tpu.pipeline_mode<synchronous>, transform_indices = @transform_9, window_bounds = array<i64: 128, 128>}, {pipeline_mode = #tpu.pipeline_mode<synchronous>, transform_indices = @transform_10, window_bounds = array<i64: 1, 128>}, {pipeline_mode = #tpu.pipeline_mode<synchronous>, transform_indices = @transform_11, window_bounds = array<i64: 128, 128>}, {pipeline_mode = #tpu.pipeline_mode<synchronous>, transform_indices = @transform_12, window_bounds = array<i64: 1, 128>}, {pipeline_mode = #tpu.pipeline_mode<synchronous>, transform_indices = @transform_13, window_bounds = array<i64: 128, 128>}, {pipeline_mode = #tpu.pipeline_mode<synchronous>, transform_indices = @transform_14, window_bounds = array<i64: 1, 128>}, {transform_indices = @transform_15, window_bounds = array<i64: 16, 128>}]} {
    %c0 = arith.constant 0 : index
    %c0_0 = arith.constant 0 : index
    %0 = vector.load %arg1[%c0, %c0_0] : memref<16x768xbf16, #tpu.memory_space<vmem>>, vector<16x768xbf16>
    %c0_1 = arith.constant 0 : index
    %c0_2 = arith.constant 0 : index
    %1 = vector.load %arg2[%c0_1, %c0_2] : memref<768x384xbf16, #tpu.memory_space<vmem>>, vector<768x384xbf16>
    %cst = arith.constant dense<0.000000e+00> : vector<16x384xf32>
    %2 = tpu.matmul %0, %1, %cst {dimension_numbers = #tpu.dot_dimension_numbers<[1], [0], [0], [1], [0, 0, 1, 1], [], []>} : vector<16x768xbf16>, vector<768x384xbf16>, vector<16x384xf32> -> vector<16x384xf32>
    %c0_3 = arith.constant 0 : index
    %c0_4 = arith.constant 0 : index
    %3 = vector.load %arg3[%c0_3, %c0_4] : memref<1x384xf32, #tpu.memory_space<vmem>>, vector<1x384xf32>
    %4 = vector.broadcast %3 : vector<1x384xf32> to vector<16x384xf32>
    %5 = arith.addf %2, %4 : vector<16x384xf32>
    %cst_5 = arith.constant 0.000000e+00 : f32
    %6 = vector.broadcast %cst_5 : f32 to vector<16x384xf32>
    %7 = arith.maximumf %5, %6 : vector<16x384xf32>
    %8 = arith.truncf %7 : vector<16x384xf32> to vector<16x384xbf16>
    %c0_6 = arith.constant 0 : index
    %c0_7 = arith.constant 0 : index
    %9 = vector.load %arg4[%c0_6, %c0_7] : memref<384x256xbf16, #tpu.memory_space<vmem>>, vector<384x256xbf16>
    %cst_8 = arith.constant dense<0.000000e+00> : vector<16x256xf32>
    %10 = tpu.matmul %8, %9, %cst_8 {dimension_numbers = #tpu.dot_dimension_numbers<[1], [0], [0], [1], [0, 0, 1, 1], [], []>} : vector<16x384xbf16>, vector<384x256xbf16>, vector<16x256xf32> -> vector<16x256xf32>
    %c0_9 = arith.constant 0 : index
    %c0_10 = arith.constant 0 : index
    %11 = vector.load %arg5[%c0_9, %c0_10] : memref<1x256xf32, #tpu.memory_space<vmem>>, vector<1x256xf32>
    %12 = vector.broadcast %11 : vector<1x256xf32> to vector<16x256xf32>
    %13 = arith.addf %10, %12 : vector<16x256xf32>
    %cst_11 = arith.constant 0.000000e+00 : f32
    %14 = vector.broadcast %cst_11 : f32 to vector<16x256xf32>
    %15 = arith.maximumf %13, %14 : vector<16x256xf32>
    %16 = arith.truncf %15 : vector<16x256xf32> to vector<16x256xbf16>
    %c0_12 = arith.constant 0 : index
    %c0_13 = arith.constant 0 : index
    %17 = vector.load %arg6[%c0_12, %c0_13] : memref<256x256xbf16, #tpu.memory_space<vmem>>, vector<256x256xbf16>
    %cst_14 = arith.constant dense<0.000000e+00> : vector<16x256xf32>
    %18 = tpu.matmul %16, %17, %cst_14 {dimension_numbers = #tpu.dot_dimension_numbers<[1], [0], [0], [1], [0, 0, 1, 1], [], []>} : vector<16x256xbf16>, vector<256x256xbf16>, vector<16x256xf32> -> vector<16x256xf32>
    %c0_15 = arith.constant 0 : index
    %c0_16 = arith.constant 0 : index
    %19 = vector.load %arg7[%c0_15, %c0_16] : memref<1x256xf32, #tpu.memory_space<vmem>>, vector<1x256xf32>
    %20 = vector.broadcast %19 : vector<1x256xf32> to vector<16x256xf32>
    %21 = arith.addf %18, %20 : vector<16x256xf32>
    %cst_17 = arith.constant 0.000000e+00 : f32
    %22 = vector.broadcast %cst_17 : f32 to vector<16x256xf32>
    %23 = arith.maximumf %21, %22 : vector<16x256xf32>
    %24 = arith.truncf %23 : vector<16x256xf32> to vector<16x256xbf16>
    %c0_18 = arith.constant 0 : index
    %c0_19 = arith.constant 0 : index
    %25 = vector.load %arg8[%c0_18, %c0_19] : memref<256x128xbf16, #tpu.memory_space<vmem>>, vector<256x128xbf16>
    %cst_20 = arith.constant dense<0.000000e+00> : vector<16x128xf32>
    %26 = tpu.matmul %24, %25, %cst_20 {dimension_numbers = #tpu.dot_dimension_numbers<[1], [0], [0], [1], [0, 0, 1, 1], [], []>} : vector<16x256xbf16>, vector<256x128xbf16>, vector<16x128xf32> -> vector<16x128xf32>
    %c0_21 = arith.constant 0 : index
    %c0_22 = arith.constant 0 : index
    %27 = vector.load %arg9[%c0_21, %c0_22] : memref<1x128xf32, #tpu.memory_space<vmem>>, vector<1x128xf32>
    %28 = vector.broadcast %27 : vector<1x128xf32> to vector<16x128xf32>
    %29 = arith.addf %26, %28 : vector<16x128xf32>
    %cst_23 = arith.constant 0.000000e+00 : f32
    %30 = vector.broadcast %cst_23 : f32 to vector<16x128xf32>
    %31 = arith.maximumf %29, %30 : vector<16x128xf32>
    %32 = arith.truncf %31 : vector<16x128xf32> to vector<16x128xbf16>
    %c0_24 = arith.constant 0 : index
    %c0_25 = arith.constant 0 : index
    %33 = vector.load %arg10[%c0_24, %c0_25] : memref<128x128xbf16, #tpu.memory_space<vmem>>, vector<128x128xbf16>
    %cst_26 = arith.constant dense<0.000000e+00> : vector<16x128xf32>
    %34 = tpu.matmul %32, %33, %cst_26 {dimension_numbers = #tpu.dot_dimension_numbers<[1], [0], [0], [1], [0, 0, 1, 1], [], []>} : vector<16x128xbf16>, vector<128x128xbf16>, vector<16x128xf32> -> vector<16x128xf32>
    %c0_27 = arith.constant 0 : index
    %c0_28 = arith.constant 0 : index
    %35 = vector.load %arg11[%c0_27, %c0_28] : memref<1x128xf32, #tpu.memory_space<vmem>>, vector<1x128xf32>
    %36 = vector.broadcast %35 : vector<1x128xf32> to vector<16x128xf32>
    %37 = arith.addf %34, %36 : vector<16x128xf32>
    %cst_29 = arith.constant 0.000000e+00 : f32
    %38 = vector.broadcast %cst_29 : f32 to vector<16x128xf32>
    %39 = arith.maximumf %37, %38 : vector<16x128xf32>
    %40 = arith.truncf %39 : vector<16x128xf32> to vector<16x128xbf16>
    %c0_30 = arith.constant 0 : index
    %c0_31 = arith.constant 0 : index
    %41 = vector.load %arg12[%c0_30, %c0_31] : memref<128x128xbf16, #tpu.memory_space<vmem>>, vector<128x128xbf16>
    %cst_32 = arith.constant dense<0.000000e+00> : vector<16x128xf32>
    %42 = tpu.matmul %40, %41, %cst_32 {dimension_numbers = #tpu.dot_dimension_numbers<[1], [0], [0], [1], [0, 0, 1, 1], [], []>} : vector<16x128xbf16>, vector<128x128xbf16>, vector<16x128xf32> -> vector<16x128xf32>
    %c0_33 = arith.constant 0 : index
    %c0_34 = arith.constant 0 : index
    %43 = vector.load %arg13[%c0_33, %c0_34] : memref<1x128xf32, #tpu.memory_space<vmem>>, vector<1x128xf32>
    %44 = vector.broadcast %43 : vector<1x128xf32> to vector<16x128xf32>
    %45 = arith.addf %42, %44 : vector<16x128xf32>
    %cst_35 = arith.constant 0.000000e+00 : f32
    %46 = vector.broadcast %cst_35 : f32 to vector<16x128xf32>
    %47 = arith.maximumf %45, %46 : vector<16x128xf32>
    %48 = arith.truncf %47 : vector<16x128xf32> to vector<16x128xbf16>
    %c0_36 = arith.constant 0 : index
    %c0_37 = arith.constant 0 : index
    %49 = vector.load %arg14[%c0_36, %c0_37] : memref<128x128xbf16, #tpu.memory_space<vmem>>, vector<128x128xbf16>
    %cst_38 = arith.constant dense<0.000000e+00> : vector<16x128xf32>
    %50 = tpu.matmul %48, %49, %cst_38 {dimension_numbers = #tpu.dot_dimension_numbers<[1], [0], [0], [1], [0, 0, 1, 1], [], []>} : vector<16x128xbf16>, vector<128x128xbf16>, vector<16x128xf32> -> vector<16x128xf32>
    %c0_39 = arith.constant 0 : index
    %c0_40 = arith.constant 0 : index
    %51 = vector.load %arg15[%c0_39, %c0_40] : memref<1x128xf32, #tpu.memory_space<vmem>>, vector<1x128xf32>
    %52 = vector.broadcast %51 : vector<1x128xf32> to vector<16x128xf32>
    %53 = arith.addf %50, %52 : vector<16x128xf32>
    %54 = arith.truncf %53 : vector<16x128xf32> to vector<16x128xbf16>
    %c0_41 = arith.constant 0 : index
    %c0_42 = arith.constant 0 : index
    %55 = vector.load %arg16[%c0_41, %c0_42] : memref<16x128xbf16, #tpu.memory_space<vmem>>, vector<16x128xbf16>
    tpu.vector_store %arg16[%c0_41, %c0_42], %54 {strides = array<i32>} : memref<16x128xbf16, #tpu.memory_space<vmem>>, vector<16x128xbf16>,
    return
  }
  func.func @transform_0(%arg0: i32) -> (i32, i32) {
    %c0_i32 = arith.constant 0 : i32
    %c0_i32_0 = arith.constant 0 : i32
    return %arg0, %c0_i32 : i32, i32
  }
  func.func @transform_1(%arg0: i32) -> (i32, i32) {
    %c0_i32 = arith.constant 0 : i32
    %c0_i32_0 = arith.constant 0 : i32
    %c0_i32_1 = arith.constant 0 : i32
    return %c0_i32, %c0_i32_0 : i32, i32
  }
  func.func @transform_2(%arg0: i32) -> (i32, i32) {
    %c0_i32 = arith.constant 0 : i32
    %c0_i32_0 = arith.constant 0 : i32
    %c0_i32_1 = arith.constant 0 : i32
    return %c0_i32, %c0_i32_0 : i32, i32
  }
  func.func @transform_3(%arg0: i32) -> (i32, i32) {
    %c0_i32 = arith.constant 0 : i32
    %c0_i32_0 = arith.constant 0 : i32
    %c0_i32_1 = arith.constant 0 : i32
    return %c0_i32, %c0_i32_0 : i32, i32
  }
  func.func @transform_4(%arg0: i32) -> (i32, i32) {
    %c0_i32 = arith.constant 0 : i32
    %c0_i32_0 = arith.constant 0 : i32
    %c0_i32_1 = arith.constant 0 : i32
    return %c0_i32, %c0_i32_0 : i32, i32
  }
  func.func @transform_5(%arg0: i32) -> (i32, i32) {
    %c0_i32 = arith.constant 0 : i32
    %c0_i32_0 = arith.constant 0 : i32
    %c0_i32_1 = arith.constant 0 : i32
    return %c0_i32, %c0_i32_0 : i32, i32
  }
  func.func @transform_6(%arg0: i32) -> (i32, i32) {
    %c0_i32 = arith.constant 0 : i32
    %c0_i32_0 = arith.constant 0 : i32
    %c0_i32_1 = arith.constant 0 : i32
    return %c0_i32, %c0_i32_0 : i32, i32
  }
  func.func @transform_7(%arg0: i32) -> (i32, i32) {
    %c0_i32 = arith.constant 0 : i32
    %c0_i32_0 = arith.constant 0 : i32
    %c0_i32_1 = arith.constant 0 : i32
    return %c0_i32, %c0_i32_0 : i32, i32
  }
  func.func @transform_8(%arg0: i32) -> (i32, i32) {
    %c0_i32 = arith.constant 0 : i32
    %c0_i32_0 = arith.constant 0 : i32
    %c0_i32_1 = arith.constant 0 : i32
    return %c0_i32, %c0_i32_0 : i32, i32
  }
  func.func @transform_9(%arg0: i32) -> (i32, i32) {
    %c0_i32 = arith.constant 0 : i32
    %c0_i32_0 = arith.constant 0 : i32
    %c0_i32_1 = arith.constant 0 : i32
    return %c0_i32, %c0_i32_0 : i32, i32
  }
  func.func @transform_10(%arg0: i32) -> (i32, i32) {
    %c0_i32 = arith.constant 0 : i32
    %c0_i32_0 = arith.constant 0 : i32
    %c0_i32_1 = arith.constant 0 : i32
    return %c0_i32, %c0_i32_0 : i32, i32
  }
  func.func @transform_11(%arg0: i32) -> (i32, i32) {
    %c0_i32 = arith.constant 0 : i32
    %c0_i32_0 = arith.constant 0 : i32
    %c0_i32_1 = arith.constant 0 : i32
    return %c0_i32, %c0_i32_0 : i32, i32
  }
  func.func @transform_12(%arg0: i32) -> (i32, i32) {
    %c0_i32 = arith.constant 0 : i32
    %c0_i32_0 = arith.constant 0 : i32
    %c0_i32_1 = arith.constant 0 : i32
    return %c0_i32, %c0_i32_0 : i32, i32
  }
  func.func @transform_13(%arg0: i32) -> (i32, i32) {
    %c0_i32 = arith.constant 0 : i32
    %c0_i32_0 = arith.constant 0 : i32
    %c0_i32_1 = arith.constant 0 : i32
    return %c0_i32, %c0_i32_0 : i32, i32
  }
  func.func @transform_14(%arg0: i32) -> (i32, i32) {
    %c0_i32 = arith.constant 0 : i32
    %c0_i32_0 = arith.constant 0 : i32
    %c0_i32_1 = arith.constant 0 : i32
    return %c0_i32, %c0_i32_0 : i32, i32
  }
  func.func @transform_15(%arg0: i32) -> (i32, i32) {
    %c0_i32 = arith.constant 0 : i32
    %c0_i32_0 = arith.constant 0 : i32
    return %arg0, %c0_i32 : i32, i32
  }
}

</mosaic_0001>

<bundles_post_ra>
// kernel: tpu_custom_call.1
= control target key start
LH: loop header
LB: loop body
LE: loop exit
PB: predicated region body
PF: predicated region fallthrough
CT: control target
= control target key end

     0   :  { %20 = vsyncpa [#allocation3], 0  ;;  %s4371_s0 = inlined_call_operand.hbm [shape: bf16[16,768], index: 0, kind: input, shape index: {}]   ;;  %s4372_s1 = inlined_call_operand.hbm [shape: bf16[768,384], index: 1, kind: input, shape index: {}]   ;;  %s4373_s2 = inlined_call_operand.hbm [shape: f32[1,384], index: 2, kind: input, shape index: {}]   ;;  %s4374_s3 = inlined_call_operand.hbm [shape: bf16[384,256], index: 3, kind: input, shape index: {}]   ;;  %s4375_s4 = inlined_call_operand.vmem [shape: f32[1,256], index: 4, kind: input, shape index: {}]   ;;  %s4376_s5 = inlined_call_operand.hbm [shape: bf16[256,256], index: 5, kind: input, shape index: {}]   ;;  %s4377_s6 = inlined_call_operand.vmem [shape: f32[1,256], index: 6, kind: input, shape index: {}]   ;;  %s4378_s7 = inlined_call_operand.hbm [shape: bf16[256,128], index: 7, kind: input, shape index: {}]   ;;  %s4379_s8 = inlined_call_operand.vmem [shape: f32[1,128], index: 8, kind: input, shape index: {}]   ;;  %s4380_s9 = inlined_call_operand.hbm [shape: bf16[128,128], index: 9, kind: input, shape index: {}]   ;;  %s4381_s10 = inlined_call_operand.vmem [shape: f32[1,128], index: 10, kind: input, shape index: {}]   ;;  %s4382_s11 = inlined_call_operand.hbm [shape: bf16[128,128], index: 11, kind: input, shape index: {}]   ;;  %s4383_s12 = inlined_call_operand.vmem [shape: f32[1,128], index: 12, kind: input, shape index: {}]   ;;  %s4384_s13 = inlined_call_operand.hbm [shape: bf16[128,128], index: 13, kind: input, shape index: {}]   ;;  %s4385_s14 = inlined_call_operand.vmem [shape: f32[1,128], index: 14, kind: input, shape index: {}]   ;;  %s4386_s15 = inlined_call_operand.hbm [shape: bf16[16,128], index: 15, kind: output, shape index: {}]  }
   0x1   :  { %21 = vsyncpa [#allocation6], 0 }
   0x2   :  { %22 = vsyncpa [#allocation9], 0 }
   0x3   :  { %23 = vsyncpa [#allocation12], 0 }
   0x4   :  { %24 = vsyncpa [#allocation15], 0  ;;  %s43_s20 = sshll.u32 %s4372_s1, 4  ;;  %s44_s20 = int_to_ptr.hbm [resolvable:$true] %s43_s20 }
   0x5   :  { %25 = vsyncpa [#allocation4], 0  ;;  %s4169_s21 = smov [#allocation5]   ;;  %s67_s25 = sshll.u32 %s4374_s3, 4  ;;  %s68_s25 = int_to_ptr.hbm [resolvable:$true] %s67_s25 }
   0x6   :  { %s45_s22 = sshll.u32 %s4169_s21, 4  ;;  %s4170_s26 = smov 192   ;;  %s46_s22 = int_to_ptr.vmem [resolvable:$true] %s45_s22 }
   0x7   :  { %s4171_s27 = smov 12   ;;  %s4172_s28 = smov [#allocation8]  }
   0x8   :  { %51 = dma.hbm_to_vmem [thread:$0]  %s44_s20, 18432, %s46_s22, [#allocation6], %s4170_s26, %s4170_s26, %s4171_s27  }
   0x9   :  { %s69_s29 = sshll.u32 %s4172_s28, 4  ;;  %s4173_s30 = smov 128   ;;  %s70_s29 = int_to_ptr.vmem [resolvable:$true] %s69_s29 }
   0xa   :  { %s4174_s16 = smov 8   ;;  %s97_s18 = sshll.u32 %s4378_s7, 4  ;;  %s98_s18 = int_to_ptr.hbm [resolvable:$true] %s97_s18 }
   0xb   :  { %75 = dma.hbm_to_vmem [thread:$0]  %s68_s25, 6144, %s70_s29, [#allocation9], %s4173_s30, %s4173_s30, %s4174_s16  }
   0xc   :  { %s4175_s19 = smov [#allocation11]   ;;  %s127_s22 = sshll.u32 %s4382_s11, 4  ;;  %s128_s22 = int_to_ptr.hbm [resolvable:$true] %s127_s22 }
   0xd   :  { %s99_s3 = sshll.u32 %s4175_s19, 4  ;;  %s4176_s23 = smov 64   ;;  %s100_s3 = int_to_ptr.vmem [resolvable:$true] %s99_s3 }
   0xe   :  { %s4177_s24 = smov 4   ;;  %s4178_s25 = smov [#allocation14]  }
   0xf   :  { %105 = dma.hbm_to_vmem [thread:$0]  %s98_s18, 2048, %s100_s3, [#allocation12], %s4176_s23, %s4176_s23, %s4177_s24  }
  0x10   :  { %s129_s26 = sshll.u32 %s4178_s25, 4  ;;  %s30_s7 = sshll.u32 %s4371_s0, 4  ;;  %s130_s26 = int_to_ptr.vmem [resolvable:$true] %s129_s26  ;;  %s31_s7 = int_to_ptr.hbm [resolvable:$true] %s30_s7 }
  0x11   :  { %135 = dma.hbm_to_vmem [thread:$0]  %s128_s22, 1024, %s130_s26, [#allocation15], %s4176_s23, %s4176_s23, %s4177_s24  }
  0x12   :  { %s4179_s11 = smov [#allocation2]   ;;  %s57_s18 = sshll.u32 %s4373_s2, 4  ;;  %s58_s18 = int_to_ptr.hbm [resolvable:$true] %s57_s18 }
  0x13   :  { %s32_s29 = sshll.u32 %s4179_s11, 4  ;;  %s4180_s19 = smov 384   ;;  %s33_s29 = int_to_ptr.vmem [resolvable:$true] %s32_s29 }
  0x14   :  { %s4181_s3 = smov 24   ;;  %s4182_s21 = smov [#allocation7]  }
  0x15   :  { %38 = dma.hbm_to_vmem [thread:$0]  %s31_s7, 768, %s33_s29, [#allocation3], %s4180_s19, %s4180_s19, %s4181_s3  }
  0x16   :  { %s59_s20 = sshll.u32 %s4182_s21, 4  ;;  %s82_s27 = sshll.u32 %s4376_s5, 4  ;;  %s60_s20 = int_to_ptr.vmem [resolvable:$true] %s59_s20  ;;  %s83_s27 = int_to_ptr.hbm [resolvable:$true] %s82_s27 }
  0x17   :  { %62 = dma.hbm_to_vmem [thread:$0]  %s58_s18, 48, %s60_s20, [#allocation6]  }
  0x18   :  { %s112_s28 = sshll.u32 %s4380_s9, 4  ;;  %s4183_s11 = smov [#allocation10]   ;;  %s113_s28 = int_to_ptr.hbm [resolvable:$true] %s112_s28 }
  0x19   :  { %s84_s1 = sshll.u32 %s4183_s11, 4  ;;  %s4184_s2 = smov [#allocation13]   ;;  %s85_s1 = int_to_ptr.vmem [resolvable:$true] %s84_s1 }
  0x1a   :  { %90 = dma.hbm_to_vmem [thread:$0]  %s83_s27, 4096, %s85_s1, [#allocation9], %s4173_s30, %s4173_s30, %s4174_s16  }
  0x1b   :  { %s114_s7 = sshll.u32 %s4184_s2, 4  ;;  %s142_s5 = sshll.u32 %s4384_s13, 4  ;;  %s115_s7 = int_to_ptr.vmem [resolvable:$true] %s114_s7  ;;  %s143_s5 = int_to_ptr.hbm [resolvable:$true] %s142_s5 }
  0x1c   :  { %120 = dma.hbm_to_vmem [thread:$0]  %s113_s28, 1024, %s115_s7, [#allocation12], %s4176_s23, %s4176_s23, %s4177_s24  }
  0x1d   :  { %s4185_s9 = smov [#allocation16]  }
  0x1e   :  { %s144_s18 = sshll.u32 %s4185_s9, 4  ;;  %s145_s18 = int_to_ptr.vmem [resolvable:$true] %s144_s18 }
  0x1f   :  { %150 = dma.hbm_to_vmem [thread:$0]  %s143_s5, 1024, %s145_s18, [#allocation15], %s4176_s23, %s4176_s23, %s4177_s24  }
  0x20   :  { %4157 = dma.done.wait [#allocation3], 768  }
  0x21   :  { %4158 = vsyncadd [#allocation3], 4294966528 }
  0x22   :  { %4159 = dma.done.wait [#allocation6], 18480  }
  0x23   :  { %4160 = vsyncadd [#allocation6], 4294948816 }
  0x24   :  { %4161 = dma.done.wait [#allocation9], 10240  }
  0x25   :  { %4162 = vsyncadd [#allocation9], 4294957056 }
  0x26   :  { %4163 = dma.done.wait [#allocation12], 3072  }
  0x27   :  { %4164 = vsyncadd [#allocation12], 4294964224 }
  0x28   :  { %4165 = dma.done.wait [#allocation15], 2048  }
  0x29   :  { %4166 = vsyncadd [#allocation15], 4294965248  ;;  %v2650_v0 = vld [vmem:[#allocation5 + $0xa8] sm:$0xf]  ;;  %v3648_v1 = vld [vmem:[#allocation5 + $0xb0] sm:$0xf0] }
  0x2a   :  { %v2746_v2 = vld [vmem:[#allocation5 + $0x168] sm:$0xf]  ;;  %v2651_v3 = vor.u32 %v3648_v1, %v2650_v0  ;;  %v3672_v4 = vld [vmem:[#allocation5 + $0x170] sm:$0xf0]  ;;  %v2638_v11 = vld [vmem:[#allocation5 + $0x90] sm:$0xf] }
  0x2b   :  { %v2842_v5 = vld [vmem:[#allocation5 + $0x228] sm:$0xf]  ;;  %v3696_v6 = vld [vmem:[#allocation5 + $0x230] sm:$0xf0]  ;;  %v2747_v7 = vor.u32 %v3672_v4, %v2746_v2  ;;  %v3645_v13 = vld [vmem:[#allocation5 + $0x98] sm:$0xf0] }
  0x2c   :  { %v2843_v8 = vor.u32 %v3696_v6, %v2842_v5  ;;  %v2938_v9 = vld [vmem:[#allocation5 + $0x2e8] sm:$0xf]  ;;  %v3720_v10 = vld [vmem:[#allocation5 + $0x2f0] sm:$0xf0]  ;;  %1193 = vmatpush.bf16.msra.mxu0 %v2651_v3  ;;  %v2734_v14 = vld [vmem:[#allocation5 + $0x150] sm:$0xf]  ;;  %v2639_v16 = vor.u32 %v3645_v13, %v2638_v11 }
  0x2d   :  { %v2939_v12 = vor.u32 %v3720_v10, %v2938_v9  ;;  %v3669_v15 = vld [vmem:[#allocation5 + $0x158] sm:$0xf0]  ;;  %1207 = vmatpush.bf16.msra.mxu1 %v2747_v7  ;;  %v2830_v18 = vld [vmem:[#allocation5 + $0x210] sm:$0xf]  ;;  %v2626_v23 = vld [vmem:[#allocation5 + $0x78] sm:$0xf] }
  0x2e   :  { %1221 = vmatpush.bf16.msra.mxu2 %v2843_v8  ;;  %v2735_v17 = vor.u32 %v3669_v15, %v2734_v14  ;;  %v3693_v19 = vld [vmem:[#allocation5 + $0x218] sm:$0xf0]  ;;  %v2926_v20 = vld [vmem:[#allocation5 + $0x2d0] sm:$0xf]  ;;  %v3642_v24 = vld [vmem:[#allocation5 + $0x80] sm:$0xf0] }
  0x2f   :  { %1235 = vmatpush.bf16.msra.mxu3 %v2939_v12  ;;  %v2831_v21 = vor.u32 %v3693_v19, %v2830_v18  ;;  %v3717_v22 = vld [vmem:[#allocation5 + $0x2d8] sm:$0xf0]  ;;  %v2722_v26 = vld [vmem:[#allocation5 + $0x138] sm:$0xf]  ;;  %v3666_v27 = vld [vmem:[#allocation5 + $0x140] sm:$0xf0]  ;;  %v2627_v29 = vor.u32 %v3642_v24, %v2626_v23 }
  0x30   :  { %v2927_v25 = vor.u32 %v3717_v22, %v2926_v20  ;;  %v2818_v28 = vld [vmem:[#allocation5 + $0x1f8] sm:$0xf]  ;;  %1194 = vmatpush.bf16.msra.mxu0 %v2639_v16  ;;  %v3690_v30 = vld [vmem:[#allocation5 + $0x200] sm:$0xf0]  ;;  %v2723_v33 = vor.u32 %v3666_v27, %v2722_v26  ;;  %v2614_v35 = vld [vmem:[#allocation5 + $0x60] sm:$0xf] }
  0x31   :  { %v2914_v31 = vld [vmem:[#allocation5 + $0x2b8] sm:$0xf]  ;;  %v3714_v32 = vld [vmem:[#allocation5 + $0x2c0] sm:$0xf0]  ;;  %1208 = vmatpush.bf16.msra.mxu1 %v2735_v17  ;;  %v2819_v34 = vor.u32 %v3690_v30, %v2818_v28  ;;  %v3639_v36 = vld [vmem:[#allocation5 + $0x68] sm:$0xf0] }
  0x32   :  { %1222 = vmatpush.bf16.msra.mxu2 %v2831_v21  ;;  %v2710_v37 = vld [vmem:[#allocation5 + $0x120] sm:$0xf]  ;;  %v2915_v38 = vor.u32 %v3714_v32, %v2914_v31  ;;  %v3663_v39 = vld [vmem:[#allocation5 + $0x128] sm:$0xf0]  ;;  %v2615_v44 = vor.u32 %v3639_v36, %v2614_v35  ;;  %v2602_v47 = vld [vmem:[#allocation5 + $0x48] sm:$0xf] }
  0x33   :  { %1236 = vmatpush.bf16.msra.mxu3 %v2927_v25  ;;  %v2806_v40 = vld [vmem:[#allocation5 + $0x1e0] sm:$0xf]  ;;  %v3687_v41 = vld [vmem:[#allocation5 + $0x1e8] sm:$0xf0]  ;;  %v2711_v45 = vor.u32 %v3663_v39, %v2710_v37  ;;  %v3636_v48 = vld [vmem:[#allocation5 + $0x50] sm:$0xf0] }
  0x34   :  { %v2902_v42 = vld [vmem:[#allocation5 + $0x2a0] sm:$0xf]  ;;  %v3711_v43 = vld [vmem:[#allocation5 + $0x2a8] sm:$0xf0]  ;;  %1195 = vmatpush.bf16.msra.mxu0 %v2627_v29  ;;  %v2807_v46 = vor.u32 %v3687_v41, %v2806_v40  ;;  %v2698_v49 = vld [vmem:[#allocation5 + $0x108] sm:$0xf]  ;;  %v2603_v56 = vor.u32 %v3636_v48, %v2602_v47 }
  0x35   :  { %1209 = vmatpush.bf16.msra.mxu1 %v2723_v33  ;;  %v2903_v50 = vor.u32 %v3711_v43, %v2902_v42  ;;  %v3660_v51 = vld [vmem:[#allocation5 + $0x110] sm:$0xf0]  ;;  %v2794_v52 = vld [vmem:[#allocation5 + $0x1c8] sm:$0xf]  ;;  %v2590_v59 = vld [vmem:[#allocation5 + $0x30] sm:$0xf] }
  0x36   :  { %1223 = vmatpush.bf16.msra.mxu2 %v2819_v34  ;;  %v3684_v53 = vld [vmem:[#allocation5 + $0x1d0] sm:$0xf0]  ;;  %v2890_v54 = vld [vmem:[#allocation5 + $0x288] sm:$0xf]  ;;  %v2699_v57 = vor.u32 %v3660_v51, %v2698_v49  ;;  %v3633_v60 = vld [vmem:[#allocation5 + $0x38] sm:$0xf0] }
  0x37   :  { %1237 = vmatpush.bf16.msra.mxu3 %v2915_v38  ;;  %v3708_v55 = vld [vmem:[#allocation5 + $0x290] sm:$0xf0]  ;;  %v2795_v58 = vor.u32 %v3684_v53, %v2794_v52  ;;  %v2686_v61 = vld [vmem:[#allocation5 + $0xf0] sm:$0xf]  ;;  %v3657_v63 = vld [vmem:[#allocation5 + $0xf8] sm:$0xf0]  ;;  %v2591_v4 = vor.u32 %v3633_v60, %v2590_v59 }
  0x38   :  { %1196 = vmatpush.bf16.msra.mxu0 %v2615_v44  ;;  %v2891_v62 = vor.u32 %v3708_v55, %v2890_v54  ;;  %v2782_v0 = vld [vmem:[#allocation5 + $0x1b0] sm:$0xf]  ;;  %v3681_v1 = vld [vmem:[#allocation5 + $0x1b8] sm:$0xf0]  ;;  %v2687_v5 = vor.u32 %v3657_v63, %v2686_v61  ;;  %v2578_v7 = vld [vmem:[#allocation5 + $0x18] sm:$0xf] }
  0x39   :  { %1210 = vmatpush.bf16.msra.mxu1 %v2711_v45  ;;  %v2878_v2 = vld [vmem:[#allocation5 + $0x270] sm:$0xf]  ;;  %v3705_v3 = vld [vmem:[#allocation5 + $0x278] sm:$0xf0]  ;;  %v2783_v6 = vor.u32 %v3681_v1, %v2782_v0  ;;  %v3630_v8 = vld [vmem:[#allocation5 + $0x20] sm:$0xf0] }
  0x3a   :  { %1224 = vmatpush.bf16.msra.mxu2 %v2807_v46  ;;  %v2674_v9 = vld [vmem:[#allocation5 + $0xd8] sm:$0xf]  ;;  %v2879_v10 = vor.u32 %v3705_v3, %v2878_v2  ;;  %v3654_v11 = vld [vmem:[#allocation5 + $0xe0] sm:$0xf0]  ;;  %v2579_v16 = vor.u32 %v3630_v8, %v2578_v7  ;;  %v2566_v17 = vld [vmem:[#allocation5] sm:$0xf] }
  0x3b   :  { %1238 = vmatpush.bf16.msra.mxu3 %v2903_v50  ;;  %v2770_v12 = vld [vmem:[#allocation5 + $0x198] sm:$0xf]  ;;  %v3678_v13 = vld [vmem:[#allocation5 + $0x1a0] sm:$0xf0]  ;;  %v3627_v18 = vld [vmem:[#allocation5 + $0x8] sm:$0xf0]  ;;  %v2675_v19 = vor.u32 %v3654_v11, %v2674_v9 }
  0x3c   :  { %1197 = vmatpush.bf16.msra.mxu0 %v2603_v56  ;;  %v2866_v14 = vld [vmem:[#allocation5 + $0x258] sm:$0xf]  ;;  %v3702_v15 = vld [vmem:[#allocation5 + $0x260] sm:$0xf0]  ;;  %v2771_v20 = vor.u32 %v3678_v13, %v2770_v12  ;;  %v2662_v21 = vld [vmem:[#allocation5 + $0xc0] sm:$0xf]  ;;  %v2567_v31 = vor.u32 %v3627_v18, %v2566_v17 }
  0x3d   :  { %1211 = vmatpush.bf16.msra.mxu1 %v2699_v57  ;;  %v3651_v22 = vld [vmem:[#allocation5 + $0xc8] sm:$0xf0]  ;;  %v2758_v23 = vld [vmem:[#allocation5 + $0x180] sm:$0xf]  ;;  %v2867_v24 = vor.u32 %v3702_v15, %v2866_v14  ;;  %v3034_v26 = vld [vmem:[#allocation5 + $0x3a8] sm:$0xf] }
  0x3e   :  { %1225 = vmatpush.bf16.msra.mxu2 %v2795_v58  ;;  %v3675_v25 = vld [vmem:[#allocation5 + $0x188] sm:$0xf0]  ;;  %v3744_v27 = vld [vmem:[#allocation5 + $0x3b0] sm:$0xf0]  ;;  %v3130_v28 = vld [vmem:[#allocation5 + $0x468] sm:$0xf]  ;;  %v2663_v35 = vor.u32 %v3651_v22, %v2662_v21 }
  0x3f   :  { %1239 = vmatpush.bf16.msra.mxu3 %v2891_v62  ;;  %v3768_v29 = vld [vmem:[#allocation5 + $0x470] sm:$0xf0]  ;;  %v3647_v30 = vld [vmem:[#allocation5 + $0xac] sm:$0xf]  ;;  %v2652_v32 = vld [vmem:[#allocation5 + $0xb4] sm:$0xf0]  ;;  %v2759_v36 = vor.u32 %v3675_v25, %v2758_v23  ;;  %v3035_v39 = vor.u32 %v3744_v27, %v3034_v26 }
  0x40   :  { %1198 = vmatpush.bf16.msra.mxu0 %v2591_v4  ;;  %v2854_v33 = vld [vmem:[#allocation5 + $0x240] sm:$0xf]  ;;  %v3699_v34 = vld [vmem:[#allocation5 + $0x248] sm:$0xf0]  ;;  %v2748_v38 = vld [vmem:[#allocation5 + $0x174] sm:$0xf0]  ;;  %v3131_v40 = vor.u32 %v3768_v29, %v3130_v28  ;;  %v2655_v42 = vor.u32 %v3647_v30, %v2652_v32 }
  0x41   :  { %1212 = vmatpush.bf16.msra.mxu1 %v2687_v5  ;;  %v3671_v37 = vld [vmem:[#allocation5 + $0x16c] sm:$0xf]  ;;  %v3022_v41 = vld [vmem:[#allocation5 + $0x390] sm:$0xf]  ;;  %v2855_v43 = vor.u32 %v3699_v34, %v2854_v33  ;;  %v3741_v44 = vld [vmem:[#allocation5 + $0x398] sm:$0xf0] }
  0x42   :  { %1226 = vmatpush.bf16.msra.mxu2 %v2783_v6  ;;  %v3118_v45 = vld [vmem:[#allocation5 + $0x450] sm:$0xf]  ;;  %v3765_v46 = vld [vmem:[#allocation5 + $0x458] sm:$0xf0]  ;;  %v2751_v47 = vor.u32 %v3671_v37, %v2748_v38  ;;  %v3644_v48 = vld [vmem:[#allocation5 + $0x94] sm:$0xf]  ;;  %v3023_v54 = vor.u32 %v3741_v44, %v3022_v41 }
  0x43   :  { %1240 = vmatpush.bf16.msra.mxu3 %v2879_v10  ;;  %v2640_v49 = vld [vmem:[#allocation5 + $0x9c] sm:$0xf0]  ;;  %v3668_v50 = vld [vmem:[#allocation5 + $0x154] sm:$0xf]  ;;  %v2542_v52 = vld [vmem:[#allocation2] sm:$0xf]  ;;  %v3119_v55 = vor.u32 %v3765_v46, %v3118_v45 }
  0x44   :  { %1199 = vmatpush.bf16.msra.mxu0 %v2579_v16  ;;  %v2736_v51 = vld [vmem:[#allocation5 + $0x15c] sm:$0xf0]  ;;  %v3623_v53 = vld [vmem:[#allocation2 + $0x14] sm:$0xf0]  ;;  %v3010_v56 = vld [vmem:[#allocation5 + $0x378] sm:$0xf]  ;;  %v2643_v60 = vor.u32 %v3644_v48, %v2640_v49 }
  0x45   :  { %1213 = vmatpush.bf16.msra.mxu1 %v2675_v19  ;;  %v3738_v57 = vld [vmem:[#allocation5 + $0x380] sm:$0xf0]  ;;  %v3106_v58 = vld [vmem:[#allocation5 + $0x438] sm:$0xf]  ;;  %v4312_v59 = vor.u32 %v3623_v53, %v2542_v52  ;;  %v3641_v62 = vld [vmem:[#allocation5 + $0x7c] sm:$0xf]  ;;  %v2739_v0 = vor.u32 %v3668_v50, %v2736_v51 }
  0x46   :  { %1227 = vmatpush.bf16.msra.mxu2 %v2771_v20  ;;  %v3762_v61 = vld [vmem:[#allocation5 + $0x440] sm:$0xf0]  ;;  %v3620_v63 = vld [vmem:[#allocation2 + $0x4] sm:$0xf]  ;;  %v2628_v1 = vld [vmem:[#allocation5 + $0x84] sm:$0xf0]  ;;  %v3011_v8 = vor.u32 %v3738_v57, %v3010_v56 }
  0x47   :  { %1241 = vmatpush.bf16.msra.mxu3 %v2867_v24  ;;  %v3665_v2 = vld [vmem:[#allocation5 + $0x13c] sm:$0xf]  ;;  %v2544_v3 = vld [vmem:[#allocation2 + $0x18] sm:$0xf0]  ;;  %v2724_v4 = vld [vmem:[#allocation5 + $0x144] sm:$0xf0]  ;;  %v3107_v9 = vor.u32 %v3762_v61, %v3106_v58  ;;  %v2631_v13 = vor.u32 %v3641_v62, %v2628_v1 }
  0x48   :  { %1200 = vmatpush.bf16.msra.mxu0 %v2567_v31  ;;  %v4315_v5 = vor.u32 %v3620_v63, %v2544_v3  ;;  %v2550_v6 = vld [vmem:[#allocation2 + $0x8] sm:$0xf]  ;;  %v3624_v7 = vld [vmem:[#allocation2 + $0x1c] sm:$0xf0]  ;;  %v2998_v10 = vld [vmem:[#allocation5 + $0x360] sm:$0xf]  ;;  %v2727_v17 = vor.u32 %v3665_v2, %v2724_v4 }
  0x49   :  { %1214 = vmatpush.bf16.msra.mxu1 %v2663_v35  ;;  %v3735_v11 = vld [vmem:[#allocation5 + $0x368] sm:$0xf0]  ;;  %v4317_v12 = vor.u32 %v3624_v7, %v2550_v6  ;;  %v3094_v14 = vld [vmem:[#allocation5 + $0x420] sm:$0xf]  ;;  %v3621_v16 = vld [vmem:[#allocation2 + $0xc] sm:$0xf] }
  0x4a   :  { %1228 = vmatpush.bf16.msra.mxu2 %v2759_v36  ;;  %v3759_v15 = vld [vmem:[#allocation5 + $0x428] sm:$0xf0]  ;;  %v3638_v18 = vld [vmem:[#allocation5 + $0x64] sm:$0xf]  ;;  %v2616_v19 = vld [vmem:[#allocation5 + $0x6c] sm:$0xf0]  ;;  %v2999_v24 = vor.u32 %v3735_v11, %v2998_v10 }
  0x4b   :  { %1242 = vmatpush.bf16.msra.mxu3 %v2855_v43  ;;  %1201 = vmatmul.bf16.vlgmr.msra.gmra.mxu0 %v4312_v59  ;;  %v2552_v20 = vld [vmem:[#allocation2 + $0x20] sm:$0xf0]  ;;  %v3662_v21 = vld [vmem:[#allocation5 + $0x124] sm:$0xf]  ;;  %v2712_v22 = vld [vmem:[#allocation5 + $0x12c] sm:$0xf0]  ;;  %v3095_v25 = vor.u32 %v3759_v15, %v3094_v14  ;;  %v2619_v27 = vor.u32 %v3638_v18, %v2616_v19 }
  0x4c   :  { %1249 = vmatpush.bf16.msrb.mxu0 %v3035_v39  ;;  %1215 = vmatmul.bf16.vlgmr.msra.gmra.mxu1 %v4315_v5  ;;  %v4321_v23 = vor.u32 %v3621_v16, %v2552_v20  ;;  %v2986_v26 = vld [vmem:[#allocation5 + $0x348] sm:$0xf]  ;;  %v3732_v28 = vld [vmem:[#allocation5 + $0x350] sm:$0xf0]  ;;  %v2715_v31 = vor.u32 %v3662_v21, %v2712_v22  ;;  %v3635_v32 = vld [vmem:[#allocation5 + $0x4c] sm:$0xf] }
  0x4d   :  { %1263 = vmatpush.bf16.msrb.mxu1 %v3131_v40  ;;  %1229 = vmatmul.bf16.vlgmr.msra.gmra.mxu2 %v4317_v12  ;;  %v3082_v29 = vld [vmem:[#allocation5 + $0x408] sm:$0xf]  ;;  %v3756_v30 = vld [vmem:[#allocation5 + $0x410] sm:$0xf0]  ;;  %v2604_v33 = vld [vmem:[#allocation5 + $0x54] sm:$0xf0]  ;;  %v2987_v36 = vor.u32 %v3732_v28, %v2986_v26 }
  0x4e   :  { %1277 = vmatpush.bf16.msrb.mxu2 %v2655_v42  ;;  %1243 = vmatmul.bf16.vlgmr.msra.gmra.mxu3 %v4321_v23  ;;  %v3659_v34 = vld [vmem:[#allocation5 + $0x10c] sm:$0xf]  ;;  %v2700_v35 = vld [vmem:[#allocation5 + $0x114] sm:$0xf0]  ;;  %v3083_v37 = vor.u32 %v3756_v30, %v3082_v29  ;;  %v2974_v38 = vld [vmem:[#allocation5 + $0x330] sm:$0xf]  ;;  %v2607_v39 = vor.u32 %v3635_v32, %v2604_v33 }
  0x4f   :  { %1291 = vmatpush.bf16.msrb.mxu3 %v2751_v47  ;;  %v3729_v40 = vld [vmem:[#allocation5 + $0x338] sm:$0xf0]  ;;  %v3070_v41 = vld [vmem:[#allocation5 + $0x3f0] sm:$0xf]  ;;  %v2703_v43 = vor.u32 %v3659_v34, %v2700_v35  ;;  %v3632_v44 = vld [vmem:[#allocation5 + $0x34] sm:$0xf] }
  0x50   :  { %1250 = vmatpush.bf16.msrb.mxu0 %v3023_v54  ;;  %v3753_v42 = vld [vmem:[#allocation5 + $0x3f8] sm:$0xf0]  ;;  %v2592_v45 = vld [vmem:[#allocation5 + $0x3c] sm:$0xf0]  ;;  %v3656_v46 = vld [vmem:[#allocation5 + $0xf4] sm:$0xf]  ;;  %v2975_v48 = vor.u32 %v3729_v40, %v2974_v38 }
  0x51   :  { %1264 = vmatpush.bf16.msrb.mxu1 %v3119_v55  ;;  %v2688_v47 = vld [vmem:[#allocation5 + $0xfc] sm:$0xf0]  ;;  %v3071_v49 = vor.u32 %v3753_v42, %v3070_v41  ;;  %v2962_v50 = vld [vmem:[#allocation5 + $0x318] sm:$0xf]  ;;  %v2595_v51 = vor.u32 %v3632_v44, %v2592_v45  ;;  %v3726_v52 = vld [vmem:[#allocation5 + $0x320] sm:$0xf0] }
  0x52   :  { %1278 = vmatpush.bf16.msrb.mxu2 %v2643_v60  ;;  %v3058_v53 = vld [vmem:[#allocation5 + $0x3d8] sm:$0xf]  ;;  %v3750_v54 = vld [vmem:[#allocation5 + $0x3e0] sm:$0xf0]  ;;  %v2691_v55 = vor.u32 %v3656_v46, %v2688_v47  ;;  %v3629_v56 = vld [vmem:[#allocation5 + $0x1c] sm:$0xf]  ;;  %v2963_v63 = vor.u32 %v3726_v52, %v2962_v50 }
  0x53   :  { %1292 = vmatpush.bf16.msrb.mxu3 %v2739_v0  ;;  %v2580_v57 = vld [vmem:[#allocation5 + $0x24] sm:$0xf0]  ;;  %v3653_v58 = vld [vmem:[#allocation5 + $0xdc] sm:$0xf]  ;;  %v2950_v61 = vld [vmem:[#allocation5 + $0x300] sm:$0xf]  ;;  %v3059_v0 = vor.u32 %v3750_v54, %v3058_v53 }
  0x54   :  { %1251 = vmatpush.bf16.msrb.mxu0 %v3011_v8  ;;  %v2676_v60 = vld [vmem:[#allocation5 + $0xe4] sm:$0xf0]  ;;  %v3723_v62 = vld [vmem:[#allocation5 + $0x308] sm:$0xf0]  ;;  %v3046_v1 = vld [vmem:[#allocation5 + $0x3c0] sm:$0xf]  ;;  %v2583_v4 = vor.u32 %v3629_v56, %v2580_v57 }
  0x55   :  { %1265 = vmatpush.bf16.msrb.mxu1 %v3107_v9  ;;  %v3747_v2 = vld [vmem:[#allocation5 + $0x3c8] sm:$0xf0]  ;;  %v3626_v3 = vld [vmem:[#allocation5 + $0x4] sm:$0xf]  ;;  %v2568_v6 = vld [vmem:[#allocation5 + $0xc] sm:$0xf0]  ;;  %v2679_v9 = vor.u32 %v3653_v58, %v2676_v60 }
  0x56   :  { %1279 = vmatpush.bf16.msrb.mxu2 %v2631_v13  ;;  %v3695_v7 = vld [vmem:[#allocation5 + $0x22c] sm:$0xf]  ;;  %v2844_v8 = vld [vmem:[#allocation5 + $0x234] sm:$0xf0]  ;;  %v3650_v15 = vld [vmem:[#allocation5 + $0xc4] sm:$0xf]  ;;  %v3047_v18 = vor.u32 %v3747_v2, %v3046_v1  ;;  %v2571_v22 = vor.u32 %v3626_v3, %v2568_v6 }
  0x57   :  { %1293 = vmatpush.bf16.msrb.mxu3 %v2727_v17  ;;  %v3719_v10 = vld [vmem:[#allocation5 + $0x2ec] sm:$0xf]  ;;  %v2940_v11 = vld [vmem:[#allocation5 + $0x2f4] sm:$0xf0]  ;;  %v2664_v16 = vld [vmem:[#allocation5 + $0xcc] sm:$0xf0]  ;;  %v2951_v17 = vor.u32 %v3723_v62, %v2950_v61 }
  0x58   :  { %1252 = vmatpush.bf16.msrb.mxu0 %v2999_v24  ;;  %v3743_v13 = vld [vmem:[#allocation5 + $0x3ac] sm:$0xf]  ;;  %v3036_v14 = vld [vmem:[#allocation5 + $0x3b4] sm:$0xf0]  ;;  %v2558_v19 = vld [vmem:[#allocation2 + $0x10] sm:$0xf]  ;;  %v2847_v24 = vor.u32 %v3695_v7, %v2844_v8  ;;  %v2943_v28 = vor.u32 %v3719_v10, %v2940_v11  ;;  %v2667_v33 = vor.u32 %v3650_v15, %v2664_v16 }
  0x59   :  { %1266 = vmatpush.bf16.msrb.mxu1 %v3095_v25  ;;  %v3625_v20 = vld [vmem:[#allocation2 + $0x24] sm:$0xf0]  ;;  %v3767_v21 = vld [vmem:[#allocation5 + $0x46c] sm:$0xf]  ;;  %v3622_v26 = vld [vmem:[#allocation2 + $0x14] sm:$0xf]  ;;  %v3039_v29 = vor.u32 %v3743_v13, %v3036_v14 }
  0x5a   :  { %1280 = vmatpush.bf16.msrb.mxu2 %v2619_v27  ;;  %v3132_v25 = vld [vmem:[#allocation5 + $0x474] sm:$0xf0]  ;;  %v2560_v27 = vld [vmem:[#allocation2 + $0x28] sm:$0xf0]  ;;  %v3692_v30 = vld [vmem:[#allocation5 + $0x214] sm:$0xf]  ;;  %v4324_v34 = vor.u32 %v3625_v20, %v2558_v19 }
  0x5b   :  { %1294 = vmatpush.bf16.msrb.mxu3 %v2715_v31  ;;  %v2832_v31 = vld [vmem:[#allocation5 + $0x21c] sm:$0xf0]  ;;  %v3716_v32 = vld [vmem:[#allocation5 + $0x2d4] sm:$0xf]  ;;  %v3135_v38 = vor.u32 %v3767_v21, %v3132_v25  ;;  %v3689_v45 = vld [vmem:[#allocation5 + $0x1fc] sm:$0xf] }
  0x5c   :  { %1253 = vmatpush.bf16.msrb.mxu0 %v2987_v36  ;;  %v2928_v35 = vld [vmem:[#allocation5 + $0x2dc] sm:$0xf0]  ;;  %v3740_v36 = vld [vmem:[#allocation5 + $0x394] sm:$0xf]  ;;  %v2835_v40 = vor.u32 %v3692_v30, %v2832_v31  ;;  %v2820_v46 = vld [vmem:[#allocation5 + $0x204] sm:$0xf0] }
  0x5d   :  { %1267 = vmatpush.bf16.msrb.mxu1 %v3083_v37  ;;  %v3024_v37 = vld [vmem:[#allocation5 + $0x39c] sm:$0xf0]  ;;  %v3764_v41 = vld [vmem:[#allocation5 + $0x454] sm:$0xf]  ;;  %v3713_v47 = vld [vmem:[#allocation5 + $0x2bc] sm:$0xf]  ;;  %v2823_v52 = vor.u32 %v3689_v45, %v2820_v46 }
  0x5e   :  { %1281 = vmatpush.bf16.msrb.mxu2 %v2607_v39  ;;  %v4326_v39 = vor.u32 %v3622_v26, %v2560_v27  ;;  %v3120_v42 = vld [vmem:[#allocation5 + $0x45c] sm:$0xf0]  ;;  %v3027_v44 = vor.u32 %v3740_v36, %v3024_v37  ;;  %v3012_v50 = vld [vmem:[#allocation5 + $0x384] sm:$0xf0]  ;;  %v3761_v53 = vld [vmem:[#allocation5 + $0x43c] sm:$0xf] }
  0x5f   :  { %1295 = vmatpush.bf16.msrb.mxu3 %v2703_v43  ;;  %v2931_v43 = vor.u32 %v3716_v32, %v2928_v35  ;;  %v3108_v54 = vld [vmem:[#allocation5 + $0x444] sm:$0xf0]  ;;  %v3686_v57 = vld [vmem:[#allocation5 + $0x1e4] sm:$0xf]  ;;  %v2808_v58 = vld [vmem:[#allocation5 + $0x1ec] sm:$0xf0] }
  0x60   :  { %1254 = vmatpush.bf16.msrb.mxu0 %v2975_v48  ;;  %v2916_v48 = vld [vmem:[#allocation5 + $0x2c4] sm:$0xf0]  ;;  %v3710_v60 = vld [vmem:[#allocation5 + $0x2a4] sm:$0xf]  ;;  %v2904_v61 = vld [vmem:[#allocation5 + $0x2ac] sm:$0xf0]  ;;  %v2811_v1 = vor.u32 %v3686_v57, %v2808_v58 }
  0x61   :  { %1268 = vmatpush.bf16.msrb.mxu1 %v3071_v49  ;;  %v3737_v49 = vld [vmem:[#allocation5 + $0x37c] sm:$0xf]  ;;  %v3734_v62 = vld [vmem:[#allocation5 + $0x364] sm:$0xf]  ;;  %v3096_v3 = vld [vmem:[#allocation5 + $0x42c] sm:$0xf0] }
  0x62   :  { %1282 = vmatpush.bf16.msrb.mxu2 %v2595_v51  ;;  %v3123_v51 = vor.u32 %v3764_v41, %v3120_v42  ;;  %v3015_v56 = vor.u32 %v3737_v49, %v3012_v50  ;;  %v3758_v2 = vld [vmem:[#allocation5 + $0x424] sm:$0xf]  ;;  %v3683_v7 = vld [vmem:[#allocation5 + $0x1cc] sm:$0xf]  ;;  %v2796_v8 = vld [vmem:[#allocation5 + $0x1d4] sm:$0xf0] }
  0x63   :  { %1296 = vmatpush.bf16.msrb.mxu3 %v2691_v55  ;;  %v2919_v55 = vor.u32 %v3713_v47, %v2916_v48  ;;  %v2892_v10 = vld [vmem:[#allocation5 + $0x294] sm:$0xf0]  ;;  %v3731_v11 = vld [vmem:[#allocation5 + $0x34c] sm:$0xf]  ;;  %v3099_v14 = vor.u32 %v3758_v2, %v3096_v3  ;;  %v2799_v15 = vor.u32 %v3683_v7, %v2796_v8  ;;  %v3680_v20 = vld [vmem:[#allocation5 + $0x1b4] sm:$0xf] }
  0x64   :  { %1255 = vmatpush.bf16.msrb.mxu0 %v2963_v63  ;;  %v3000_v63 = vld [vmem:[#allocation5 + $0x36c] sm:$0xf0]  ;;  %v2988_v13 = vld [vmem:[#allocation5 + $0x354] sm:$0xf0]  ;;  %v3755_v16 = vld [vmem:[#allocation5 + $0x40c] sm:$0xf] }
  0x65   :  { %1269 = vmatpush.bf16.msrb.mxu1 %v3059_v0  ;;  %v3111_v0 = vor.u32 %v3761_v53, %v3108_v54  ;;  %v3003_v6 = vor.u32 %v3734_v62, %v3000_v63  ;;  %v2991_v19 = vor.u32 %v3731_v11, %v2988_v13  ;;  %v2784_v21 = vld [vmem:[#allocation5 + $0x1bc] sm:$0xf0]  ;;  %v3728_v25 = vld [vmem:[#allocation5 + $0x334] sm:$0xf]  ;;  %v2772_v35 = vld [vmem:[#allocation5 + $0x1a4] sm:$0xf0] }
  0x66   :  { %1283 = vmatpush.bf16.msrb.mxu2 %v2583_v4  ;;  %v2907_v4 = vor.u32 %v3710_v60, %v2904_v61  ;;  %v2976_v26 = vld [vmem:[#allocation5 + $0x33c] sm:$0xf0]  ;;  %v3701_v36 = vld [vmem:[#allocation5 + $0x25c] sm:$0xf]  ;;  %v2868_v37 = vld [vmem:[#allocation5 + $0x264] sm:$0xf0] }
  0x67   :  { %1297 = vmatpush.bf16.msrb.mxu3 %v2679_v9  ;;  %v3707_v9 = vld [vmem:[#allocation5 + $0x28c] sm:$0xf]  ;;  %v3072_v30 = vld [vmem:[#allocation5 + $0x3fc] sm:$0xf0]  ;;  %v2979_v32 = vor.u32 %v3728_v25, %v2976_v26  ;;  %v3749_v42 = vld [vmem:[#allocation5 + $0x3dc] sm:$0xf]  ;;  %v2871_v47 = vor.u32 %v3701_v36, %v2868_v37 }
  0x68   :  { %1256 = vmatpush.bf16.msrb.mxu0 %v2951_v17  ;;  %v3084_v17 = vld [vmem:[#allocation5 + $0x414] sm:$0xf0]  ;;  %v3674_v45 = vld [vmem:[#allocation5 + $0x184] sm:$0xf]  ;;  %v2760_v46 = vld [vmem:[#allocation5 + $0x18c] sm:$0xf0] }
  0x69   :  { %1270 = vmatpush.bf16.msrb.mxu1 %v3047_v18  ;;  %v2895_v18 = vor.u32 %v3707_v9, %v2892_v10  ;;  %v3087_v27 = vor.u32 %v3755_v16, %v3084_v17  ;;  %v3698_v49 = vld [vmem:[#allocation5 + $0x244] sm:$0xf]  ;;  %v2856_v50 = vld [vmem:[#allocation5 + $0x24c] sm:$0xf0]  ;;  %v3649_v54 = vld [vmem:[#allocation5 + $0xb8] sm:$0xf0]  ;;  %v2763_v60 = vor.u32 %v3674_v45, %v2760_v46 }
  0x6a   :  { %1284 = vmatpush.bf16.msrb.mxu2 %v2571_v22  ;;  %v3704_v22 = vld [vmem:[#allocation5 + $0x274] sm:$0xf]  ;;  %v2658_v53 = vld [vmem:[#allocation5 + $0xb0] sm:$0xf]  ;;  %v3673_v57 = vld [vmem:[#allocation5 + $0x178] sm:$0xf0] }
  0x6b   :  { %1298 = vmatpush.bf16.msrb.mxu3 %v2667_v33  ;;  %1257 = vmatmul.bf16.vlgmr.msrb.gmra.mxu0 %v4324_v34  ;;  %v3677_v33 = vld [vmem:[#allocation5 + $0x19c] sm:$0xf]  ;;  %v3746_v58 = vld [vmem:[#allocation5 + $0x3c4] sm:$0xf]  ;;  %v3048_v61 = vld [vmem:[#allocation5 + $0x3cc] sm:$0xf0]  ;;  %v2659_v2 = vor.u32 %v3649_v54, %v2658_v53 }
  0x6c   :  { %1305 = vmatpush.bf16.msra.mxu0 %v2847_v24  ;;  %1271 = vmatmul.bf16.vlgmr.msrb.gmra.mxu1 %v4326_v39  ;;  %v2880_v24 = vld [vmem:[#allocation5 + $0x27c] sm:$0xf0]  ;;  %v2850_v62 = vld [vmem:[#allocation5 + $0x230] sm:$0xf]  ;;  %v3697_v63 = vld [vmem:[#allocation5 + $0x238] sm:$0xf0]  ;;  %v3051_v8 = vor.u32 %v3746_v58, %v3048_v61 }
  0x6d   :  { %1319 = vmatpush.bf16.msra.mxu1 %v2943_v28  ;;  %1285 = vmatmul.bf16.vlgmr.msrb.gmra.mxu2 %v4312_v59  ;;  %v2787_v28 = vor.u32 %v3680_v20, %v2784_v21  ;;  %v2883_v31 = vor.u32 %v3704_v22, %v2880_v24  ;;  %v3721_v7 = vld [vmem:[#allocation5 + $0x2f8] sm:$0xf0]  ;;  %v2851_v9 = vor.u32 %v3697_v63, %v2850_v62  ;;  %v3646_v10 = vld [vmem:[#allocation5 + $0xa0] sm:$0xf0]  ;;  %v2742_v11 = vld [vmem:[#allocation5 + $0x158] sm:$0xf] }
  0x6e   :  { %1333 = vmatpush.bf16.msra.mxu2 %v3039_v29  ;;  %1299 = vmatmul.bf16.vlgmr.msrb.gmra.mxu3 %v4315_v5  ;;  %v3752_v29 = vld [vmem:[#allocation5 + $0x3f4] sm:$0xf]  ;;  %v3670_v13 = vld [vmem:[#allocation5 + $0x160] sm:$0xf0]  ;;  %v2634_v17 = vld [vmem:[#allocation5 + $0x80] sm:$0xf] }
  0x6f   :  { %1347 = vmatpush.bf16.msra.mxu3 %v3135_v38  ;;  %v3725_v38 = vld [vmem:[#allocation5 + $0x31c] sm:$0xf]  ;;  %v3075_v41 = vor.u32 %v3752_v29, %v3072_v30  ;;  %v3718_v20 = vld [vmem:[#allocation5 + $0x2e0] sm:$0xf0]  ;;  %v2743_v21 = vor.u32 %v3670_v13, %v2742_v11  ;;  %v3643_v24 = vld [vmem:[#allocation5 + $0x88] sm:$0xf0] }
  0x70   :  { %1306 = vmatpush.bf16.msra.mxu0 %v2835_v40  ;;  %v2964_v40 = vld [vmem:[#allocation5 + $0x324] sm:$0xf0]  ;;  %v2730_v25 = vld [vmem:[#allocation5 + $0x140] sm:$0xf]  ;;  %v3667_v26 = vld [vmem:[#allocation5 + $0x148] sm:$0xf0]  ;;  %v2635_v30 = vor.u32 %v3643_v24, %v2634_v17 }
  0x71   :  { %1320 = vmatpush.bf16.msra.mxu1 %v2931_v43  ;;  %v2775_v43 = vor.u32 %v3677_v33, %v2772_v35  ;;  %v2967_v48 = vor.u32 %v3725_v38, %v2964_v40  ;;  %v2731_v33 = vor.u32 %v3667_v26, %v2730_v25  ;;  %v2622_v36 = vld [vmem:[#allocation5 + $0x68] sm:$0xf]  ;;  %v3640_v37 = vld [vmem:[#allocation5 + $0x70] sm:$0xf0]  ;;  %v2802_v53 = vld [vmem:[#allocation5 + $0x1d0] sm:$0xf] }
  0x72   :  { %1334 = vmatpush.bf16.msra.mxu2 %v3027_v44  ;;  %v3060_v44 = vld [vmem:[#allocation5 + $0x3e4] sm:$0xf0]  ;;  %v3664_v40 = vld [vmem:[#allocation5 + $0x130] sm:$0xf0]  ;;  %v3685_v54 = vld [vmem:[#allocation5 + $0x1d8] sm:$0xf0] }
  0x73   :  { %1348 = vmatpush.bf16.msra.mxu3 %v3123_v51  ;;  %v3722_v51 = vld [vmem:[#allocation5 + $0x304] sm:$0xf]  ;;  %v2718_v38 = vld [vmem:[#allocation5 + $0x128] sm:$0xf]  ;;  %v3712_v46 = vld [vmem:[#allocation5 + $0x2b0] sm:$0xf0]  ;;  %v2803_v61 = vor.u32 %v3685_v54, %v2802_v53 }
  0x74   :  { %1307 = vmatpush.bf16.msra.mxu0 %v2823_v52  ;;  %v2952_v52 = vld [vmem:[#allocation5 + $0x30c] sm:$0xf0]  ;;  %v2910_v45 = vld [vmem:[#allocation5 + $0x2a8] sm:$0xf]  ;;  %v3709_v58 = vld [vmem:[#allocation5 + $0x298] sm:$0xf0] }
  0x75   :  { %1321 = vmatpush.bf16.msra.mxu1 %v2919_v55  ;;  %v3063_v55 = vor.u32 %v3749_v42, %v3060_v44  ;;  %v3688_v42 = vld [vmem:[#allocation5 + $0x1f0] sm:$0xf0]  ;;  %v2623_v44 = vor.u32 %v3640_v37, %v2622_v36  ;;  %v2598_v62 = vld [vmem:[#allocation5 + $0x38] sm:$0xf]  ;;  %v3634_v63 = vld [vmem:[#allocation5 + $0x40] sm:$0xf0] }
  0x76   :  { %1335 = vmatpush.bf16.msra.mxu2 %v3015_v56  ;;  %v2754_v56 = vld [vmem:[#allocation5 + $0x170] sm:$0xf]  ;;  %v2586_v11 = vld [vmem:[#allocation5 + $0x20] sm:$0xf]  ;;  %v3631_v13 = vld [vmem:[#allocation5 + $0x28] sm:$0xf0] }
  0x77   :  { %1349 = vmatpush.bf16.msra.mxu3 %v3111_v0  ;;  %v2859_v0 = vor.u32 %v3698_v49, %v2856_v50  ;;  %v2755_v3 = vor.u32 %v3673_v57, %v2754_v56  ;;  %v2610_v49 = vld [vmem:[#allocation5 + $0x50] sm:$0xf]  ;;  %v3637_v50 = vld [vmem:[#allocation5 + $0x58] sm:$0xf0]  ;;  %v3679_v17 = vld [vmem:[#allocation5 + $0x1a8] sm:$0xf0] }
  0x78   :  { %1308 = vmatpush.bf16.msra.mxu0 %v2811_v1  ;;  %v2955_v1 = vor.u32 %v3722_v51, %v2952_v52  ;;  %v2706_v51 = vld [vmem:[#allocation5 + $0x110] sm:$0xf]  ;;  %v3661_v52 = vld [vmem:[#allocation5 + $0x118] sm:$0xf0]  ;;  %v2611_v56 = vor.u32 %v3637_v50, %v2610_v49  ;;  %v3628_v26 = vld [vmem:[#allocation5 + $0x10] sm:$0xf0] }
  0x79   :  { %1322 = vmatpush.bf16.msra.mxu1 %v2907_v4  ;;  %v2646_v4 = vld [vmem:[#allocation5 + $0x98] sm:$0xf]  ;;  %v2898_v57 = vld [vmem:[#allocation5 + $0x290] sm:$0xf]  ;;  %v3676_v36 = vld [vmem:[#allocation5 + $0x190] sm:$0xf0] }
  0x7a   :  { %1336 = vmatpush.bf16.msra.mxu2 %v3003_v6  ;;  %v2946_v6 = vld [vmem:[#allocation5 + $0x2f0] sm:$0xf]  ;;  %v3766_v49 = vld [vmem:[#allocation5 + $0x460] sm:$0xf0]  ;;  %v3739_v53 = vld [vmem:[#allocation5 + $0x388] sm:$0xf0] }
  0x7b   :  { %1350 = vmatpush.bf16.msra.mxu3 %v3099_v14  ;;  %v2838_v14 = vld [vmem:[#allocation5 + $0x218] sm:$0xf]  ;;  %v2947_v16 = vor.u32 %v3721_v7, %v2946_v6  ;;  %v2599_v6 = vor.u32 %v3634_v63, %v2598_v62  ;;  %v3114_v54 = vld [vmem:[#allocation5 + $0x440] sm:$0xf]  ;;  %v3760_v62 = vld [vmem:[#allocation5 + $0x430] sm:$0xf0] }
  0x7c   :  { %1309 = vmatpush.bf16.msra.mxu0 %v2799_v15  ;;  %v3694_v15 = vld [vmem:[#allocation5 + $0x220] sm:$0xf0]  ;;  %v2886_v7 = vld [vmem:[#allocation5 + $0x278] sm:$0xf]  ;;  %s4186_s25 = smov [#allocation17]   ;;  %s2523_s28 = sshll.u32 %s4386_s15, 4  ;;  %s2524_s28 = int_to_ptr.hbm [resolvable:$true] %s2523_s28 }
  0x7d   :  { %1323 = vmatpush.bf16.msra.mxu1 %v2895_v18  ;;  %v2934_v18 = vld [vmem:[#allocation5 + $0x2d8] sm:$0xf]  ;;  %v2839_v22 = vor.u32 %v3694_v15, %v2838_v14  ;;  %v2682_v14 = vld [vmem:[#allocation5 + $0xe0] sm:$0xf]  ;;  %v3655_v15 = vld [vmem:[#allocation5 + $0xe8] sm:$0xf0] }
  0x7e   :  { %1337 = vmatpush.bf16.msra.mxu2 %v2991_v19  ;;  %v2647_v19 = vor.u32 %v3646_v10, %v2646_v4  ;;  %v2935_v29 = vor.u32 %v3718_v20, %v2934_v18  ;;  %v2899_v4 = vor.u32 %v3709_v58, %v2898_v57  ;;  %v2574_v20 = vld [vmem:[#allocation5 + $0x8] sm:$0xf]  ;;  %v2683_v24 = vor.u32 %v3655_v15, %v2682_v14  ;;  %s2521_s27 = sshll.u32 %s4186_s25, 4  ;;  %s2522_s27 = int_to_ptr.vmem [resolvable:$true] %s2521_s27 }
  0x7f   :  { %1351 = vmatpush.bf16.msra.mxu3 %v3087_v27  ;;  %v2826_v27 = vld [vmem:[#allocation5 + $0x200] sm:$0xf]  ;;  %v2575_v37 = vor.u32 %v3628_v26, %v2574_v20  ;;  %v3006_v58 = vld [vmem:[#allocation5 + $0x368] sm:$0xf]  ;;  %v3751_v20 = vld [vmem:[#allocation5 + $0x3e8] sm:$0xf0] }
  0x80   :  { %1310 = vmatpush.bf16.msra.mxu0 %v2787_v28  ;;  %v3691_v28 = vld [vmem:[#allocation5 + $0x208] sm:$0xf0] }
  0x81   :  { %1324 = vmatpush.bf16.msra.mxu1 %v2883_v31  ;;  %v2922_v31 = vld [vmem:[#allocation5 + $0x2c0] sm:$0xf]  ;;  %v2827_v35 = vor.u32 %v3691_v28, %v2826_v27  ;;  %v2670_v27 = vld [vmem:[#allocation5 + $0xc8] sm:$0xf]  ;;  %v3652_v28 = vld [vmem:[#allocation5 + $0xd0] sm:$0xf0] }
  0x82   :  { %1338 = vmatpush.bf16.msra.mxu2 %v2979_v32  ;;  %v3715_v32 = vld [vmem:[#allocation5 + $0x2c8] sm:$0xf0] }
  0x83   :  { %1352 = vmatpush.bf16.msra.mxu3 %v3075_v41  ;;  %v2814_v41 = vld [vmem:[#allocation5 + $0x1e8] sm:$0xf] }
  0x84   :  { %1311 = vmatpush.bf16.msra.mxu0 %v2775_v43  ;;  %v2923_v43 = vor.u32 %v3715_v32, %v2922_v31  ;;  %v3138_v31 = vld [vmem:[#allocation5 + $0x470] sm:$0xf] }
  0x85   :  { %1325 = vmatpush.bf16.msra.mxu1 %v2871_v47  ;;  %v2719_v47 = vor.u32 %v3664_v40, %v2718_v38  ;;  %v2862_v38 = vld [vmem:[#allocation5 + $0x248] sm:$0xf]  ;;  %v3700_v40 = vld [vmem:[#allocation5 + $0x250] sm:$0xf0] }
  0x86   :  { %1339 = vmatpush.bf16.msra.mxu2 %v2967_v48  ;;  %v2815_v48 = vor.u32 %v3688_v42, %v2814_v41  ;;  %v2671_v41 = vor.u32 %v3652_v28, %v2670_v27  ;;  %v3724_v28 = vld [vmem:[#allocation5 + $0x310] sm:$0xf0] }
  0x87   :  { %1353 = vmatpush.bf16.msra.mxu3 %v3063_v55  ;;  %v2911_v55 = vor.u32 %v3712_v46, %v2910_v45  ;;  %v3030_v45 = vld [vmem:[#allocation5 + $0x398] sm:$0xf]  ;;  %v3742_v46 = vld [vmem:[#allocation5 + $0x3a0] sm:$0xf0] }
  0x88   :  { %1312 = vmatpush.bf16.msra.mxu0 %v2763_v60  ;;  %v2707_v60 = vor.u32 %v3661_v52, %v2706_v51  ;;  %v3031_v50 = vor.u32 %v3742_v46, %v3030_v45  ;;  %v3018_v52 = vld [vmem:[#allocation5 + $0x380] sm:$0xf] }
  0x89   :  { %1326 = vmatpush.bf16.msra.mxu1 %v2859_v0  ;;  %v2694_v0 = vld [vmem:[#allocation5 + $0xf8] sm:$0xf]  ;;  %v3184_v45 = vld [vmem:[#allocation8 + $0x58] sm:$0xf0] }
  0x8a   :  { %1340 = vmatpush.bf16.msra.mxu2 %v2955_v1  ;;  %v3658_v1 = vld [vmem:[#allocation5 + $0x100] sm:$0xf0] }
  0x8b   :  { %1354 = vmatpush.bf16.msra.mxu3 %v3051_v8  ;;  %1313 = vmatmul.bf16.vlgmr.msra.gmra.mxu0 %v4317_v12  ;;  %v3706_v8 = vld [vmem:[#allocation5 + $0x280] sm:$0xf0] }
  0x8c   :  { %1361 = vmatpush.bf16.msrb.mxu0 %v2659_v2  ;;  %1327 = vmatmul.bf16.vlgmr.msra.gmra.mxu1 %v4321_v23  ;;  %v2790_v2 = vld [vmem:[#allocation5 + $0x1b8] sm:$0xf]  ;;  %v2887_v18 = vor.u32 %v3706_v8, %v2886_v7  ;;  %v3190_v7 = vld [vmem:[#allocation8 + $0x60] sm:$0xf] }
  0x8d   :  { %1375 = vmatpush.bf16.msrb.mxu1 %v2755_v3  ;;  %1341 = vmatmul.bf16.vlgmr.msra.gmra.mxu2 %v4324_v34  ;;  %v3682_v3 = vld [vmem:[#allocation5 + $0x1c0] sm:$0xf0] }
  0x8e   :  { %1389 = vmatpush.bf16.msrb.mxu2 %v2851_v9  ;;  %1355 = vmatmul.bf16.vlgmr.msra.gmra.mxu3 %v4326_v39  ;;  %v2695_v9 = vor.u32 %v3658_v1, %v2694_v0  ;;  %v2791_v10 = vor.u32 %v3682_v3, %v2790_v2  ;;  %v2994_v0 = vld [vmem:[#allocation5 + $0x350] sm:$0xf]  ;;  %v3733_v1 = vld [vmem:[#allocation5 + $0x358] sm:$0xf0]  ;;  %v3198_v3 = vld [vmem:[#allocation8 + $0x70] sm:$0xf] }
  0x8f   :  { %1403 = vmatpush.bf16.msrb.mxu3 %v2947_v16  ;;  %v2778_v16 = vld [vmem:[#allocation5 + $0x1a0] sm:$0xf]  ;;  %v3090_v2 = vld [vmem:[#allocation5 + $0x410] sm:$0xf] }
  0x90   :  { %1362 = vmatpush.bf16.msrb.mxu0 %v2647_v19  ;;  %v2587_v19 = vor.u32 %v3631_v13, %v2586_v11  ;;  %v2779_v25 = vor.u32 %v3679_v17, %v2778_v16  ;;  %v3078_v11 = vld [vmem:[#allocation5 + $0x3f8] sm:$0xf]  ;;  %v3754_v13 = vld [vmem:[#allocation5 + $0x400] sm:$0xf0]  ;;  %v2970_v17 = vld [vmem:[#allocation5 + $0x320] sm:$0xf] }
  0x91   :  { %1376 = vmatpush.bf16.msrb.mxu1 %v2743_v21  ;;  %v2874_v21 = vld [vmem:[#allocation5 + $0x260] sm:$0xf]  ;;  %v3079_v16 = vor.u32 %v3754_v13, %v3078_v11 }
  0x92   :  { %1390 = vmatpush.bf16.msrb.mxu2 %v2839_v22  ;;  %v3703_v22 = vld [vmem:[#allocation5 + $0x268] sm:$0xf0] }
  0x93   :  { %1404 = vmatpush.bf16.msrb.mxu3 %v2935_v29  ;;  %v3042_v29 = vld [vmem:[#allocation5 + $0x3b0] sm:$0xf]  ;;  %v2875_v32 = vor.u32 %v3703_v22, %v2874_v21  ;;  %v3182_v21 = vld [vmem:[#allocation8 + $0x50] sm:$0xf]  ;;  %v3781_v22 = vld [vmem:[#allocation8 + $0x54] sm:$0xf0] }
  0x94   :  { %1363 = vmatpush.bf16.msrb.mxu0 %v2635_v30  ;;  %v3745_v30 = vld [vmem:[#allocation5 + $0x3b8] sm:$0xf0]  ;;  %v3183_v26 = vor.u32 %v3781_v22, %v3182_v21 }
  0x95   :  { %1377 = vmatpush.bf16.msrb.mxu1 %v2731_v33  ;;  %v3769_v33 = vld [vmem:[#allocation5 + $0x478] sm:$0xf0]  ;;  %v3043_v42 = vor.u32 %v3745_v30, %v3042_v29  ;;  %v3174_v29 = vld [vmem:[#allocation8 + $0x40] sm:$0xf]  ;;  %v3779_v30 = vld [vmem:[#allocation8 + $0x44] sm:$0xf0] }
  0x96   :  { %1391 = vmatpush.bf16.msrb.mxu2 %v2827_v35  ;;  %v2766_v35 = vld [vmem:[#allocation5 + $0x188] sm:$0xf] }
  0x97   :  { %1405 = vmatpush.bf16.msrb.mxu3 %v2923_v43  ;;  %v3139_v43 = vor.u32 %v3769_v33, %v3138_v31  ;;  %v3054_v31 = vld [vmem:[#allocation5 + $0x3c8] sm:$0xf]  ;;  %v3175_v33 = vor.u32 %v3779_v30, %v3174_v29  ;;  %v3796_v29 = vld [vmem:[#allocation8 + $0xd4] sm:$0xf]  ;;  %v3248_v30 = vld [vmem:[#allocation8 + $0xd8] sm:$0xf0] }
  0x98   :  { %1364 = vmatpush.bf16.msrb.mxu0 %v2623_v44  ;;  %v2767_v44 = vor.u32 %v3676_v36, %v2766_v35  ;;  %v3784_v35 = vld [vmem:[#allocation8 + $0x74] sm:$0xf]  ;;  %v3200_v36 = vld [vmem:[#allocation8 + $0x78] sm:$0xf0] }
  0x99   :  { %1378 = vmatpush.bf16.msrb.mxu1 %v2719_v47  ;;  %v2863_v47 = vor.u32 %v3700_v40, %v2862_v38  ;;  %v3203_v40 = vor.u32 %v3784_v35, %v3200_v36  ;;  %v3251_v35 = vor.u32 %v3796_v29, %v3248_v30 }
  0x9a   :  { %1392 = vmatpush.bf16.msrb.mxu2 %v2815_v48  ;;  %v3126_v48 = vld [vmem:[#allocation5 + $0x458] sm:$0xf] }
  0x9b   :  { %1406 = vmatpush.bf16.msrb.mxu3 %v2911_v55  ;;  %v3127_v51 = vor.u32 %v3766_v49, %v3126_v48  ;;  %v3763_v55 = vld [vmem:[#allocation5 + $0x448] sm:$0xf0]  ;;  %v3176_v48 = vld [vmem:[#allocation8 + $0x48] sm:$0xf0]  ;;  %v3166_v49 = vld [vmem:[#allocation8 + $0x30] sm:$0xf] }
  0x9c   :  { %1365 = vmatpush.bf16.msrb.mxu0 %v2611_v56  ;;  %v3019_v56 = vor.u32 %v3739_v53, %v3018_v52  ;;  %v3115_v57 = vor.u32 %v3763_v55, %v3114_v54  ;;  %v3776_v53 = vld [vmem:[#allocation8 + $0x34] sm:$0xf]  ;;  %v3168_v54 = vld [vmem:[#allocation8 + $0x38] sm:$0xf0]  ;;  %v3158_v55 = vld [vmem:[#allocation8 + $0x20] sm:$0xf] }
  0x9d   :  { %1379 = vmatpush.bf16.msrb.mxu1 %v2707_v60  ;;  %v3736_v60 = vld [vmem:[#allocation5 + $0x370] sm:$0xf0] }
  0x9e   :  { %1393 = vmatpush.bf16.msrb.mxu2 %v2803_v61  ;;  %v3102_v61 = vld [vmem:[#allocation5 + $0x428] sm:$0xf]  ;;  %v3007_v63 = vor.u32 %v3736_v60, %v3006_v58  ;;  %v3160_v60 = vld [vmem:[#allocation8 + $0x28] sm:$0xf0] }
  0x9f   :  { %1407 = vmatpush.bf16.msrb.mxu3 %v2899_v4  ;;  %v3785_v4 = vld [vmem:[#allocation8 + $0x74] sm:$0xf0]  ;;  %v3774_v58 = vld [vmem:[#allocation8 + $0x24] sm:$0xf] }
  0xa0   :  { %1366 = vmatpush.bf16.msrb.mxu0 %v2599_v6  ;;  %v3199_v6 = vor.u32 %v3785_v4, %v3198_v3  ;;  %v3771_v3 = vld [vmem:[#allocation8 + $0x4] sm:$0xf0]  ;;  %v4342_v4 = vld [vmem:[#allocation7] sm:$0x7] }
  0xa1   :  { %1380 = vmatpush.bf16.msrb.mxu1 %v2695_v9  ;;  %v2982_v9 = vld [vmem:[#allocation5 + $0x338] sm:$0xf] }
  0xa2   :  { %1394 = vmatpush.bf16.msrb.mxu2 %v2791_v10  ;;  %v3730_v10 = vld [vmem:[#allocation5 + $0x340] sm:$0xf0] }
  0xa3   :  { %1408 = vmatpush.bf16.msrb.mxu3 %v2887_v18  ;;  %v2983_v15 = vor.u32 %v3730_v10, %v2982_v9  ;;  %v3727_v18 = vld [vmem:[#allocation5 + $0x328] sm:$0xf0]  ;;  %v3262_v9 = vld [vmem:[#allocation8 + $0xf0] sm:$0xf]  ;;  %v3801_v10 = vld [vmem:[#allocation8 + $0xf4] sm:$0xf0] }
  0xa4   :  { %1367 = vmatpush.bf16.msrb.mxu0 %v2587_v19  ;;  %v3066_v19 = vld [vmem:[#allocation5 + $0x3e0] sm:$0xf]  ;;  %v3263_v13 = vor.u32 %v3801_v10, %v3262_v9 }
  0xa5   :  { %1381 = vmatpush.bf16.msrb.mxu1 %v2683_v24  ;;  %v2971_v24 = vor.u32 %v3727_v18, %v2970_v17  ;;  %v3067_v27 = vor.u32 %v3751_v20, %v3066_v19  ;;  %v3799_v18 = vld [vmem:[#allocation8 + $0xe4] sm:$0xf0]  ;;  %v3798_v19 = vld [vmem:[#allocation8 + $0xe4] sm:$0xf]  ;;  %v3256_v20 = vld [vmem:[#allocation8 + $0xe8] sm:$0xf0] }
  0xa6   :  { %1395 = vmatpush.bf16.msrb.mxu2 %v2779_v25  ;;  %v2958_v25 = vld [vmem:[#allocation5 + $0x308] sm:$0xf] }
  0xa7   :  { %1409 = vmatpush.bf16.msrb.mxu3 %v2875_v32  ;;  %v3748_v32 = vld [vmem:[#allocation5 + $0x3d0] sm:$0xf0] }
  0xa8   :  { %1368 = vmatpush.bf16.msrb.mxu0 %v2575_v37  ;;  %v2959_v37 = vor.u32 %v3724_v28, %v2958_v25  ;;  %v3055_v38 = vor.u32 %v3748_v32, %v3054_v31  ;;  %v3246_v25 = vld [vmem:[#allocation8 + $0xd0] sm:$0xf] }
  0xa9   :  { %1382 = vmatpush.bf16.msrb.mxu1 %v2671_v41  ;;  %v3782_v41 = vld [vmem:[#allocation8 + $0x64] sm:$0xf] }
  0xaa   :  { %1396 = vmatpush.bf16.msrb.mxu2 %v2767_v44  ;;  %v3780_v44 = vld [vmem:[#allocation8 + $0x54] sm:$0xf] }
  0xab   :  { %1410 = vmatpush.bf16.msrb.mxu3 %v2863_v47  ;;  %1369 = vmatmul.bf16.vlgmr.msrb.gmra.mxu0 %v4312_v59  ;;  %v3103_v59 = vor.u32 %v3760_v62, %v3102_v61  ;;  %v3187_v46 = vor.u32 %v3780_v44, %v3184_v45  ;;  %v3778_v47 = vld [vmem:[#allocation8 + $0x44] sm:$0xf]  ;;  %v3773_v61 = vld [vmem:[#allocation8 + $0x14] sm:$0xf0]  ;;  %v3163_v62 = vor.u32 %v3774_v58, %v3160_v60  ;;  %v3795_v44 = vld [vmem:[#allocation8 + $0xc4] sm:$0xf0] }
  0xac   :  { %1417 = vmatpush.bf16.msra.mxu0 %v3043_v42  ;;  %1383 = vmatmul.bf16.vlgmr.msrb.gmra.mxu1 %v4315_v5  ;;  %v3757_v5 = vld [vmem:[#allocation5 + $0x418] sm:$0xf0]  ;;  %v3192_v42 = vld [vmem:[#allocation8 + $0x68] sm:$0xf0]  ;;  %v3794_v45 = vld [vmem:[#allocation8 + $0xc4] sm:$0xf] }
  0xad   :  { %1431 = vmatpush.bf16.msra.mxu1 %v3139_v43  ;;  %1397 = vmatmul.bf16.vlgmr.msrb.gmra.mxu2 %v4317_v12  ;;  %v2995_v12 = vor.u32 %v3733_v1, %v2994_v0  ;;  %v3091_v8 = vor.u32 %v3757_v5, %v3090_v2  ;;  %v3195_v43 = vor.u32 %v3782_v41, %v3192_v42  ;;  %v3152_v0 = vld [vmem:[#allocation8 + $0x18] sm:$0xf0]  ;;  %v3142_v5 = vld [vmem:[#allocation8] sm:$0xf] }
  0xae   :  { %1411 = vmatmul.bf16.vlgmr.msrb.gmra.mxu3 %v4321_v23  ;;  %v3783_v23 = vld [vmem:[#allocation8 + $0x64] sm:$0xf0]  ;;  %1748 = vmatpush.bf16.msra.mxu2 %v3199_v6  ;;  %v3143_v6 = vor.u32 %v3771_v3, %v3142_v5  ;;  %v3224_v5 = vld [vmem:[#allocation8 + $0xa8] sm:$0xf0] }
  0xaf   :  { %v3191_v14 = vor.u32 %v3783_v23, %v3190_v7  ;;  %v3770_v7 = vld [vmem:[#allocation8 + $0x4] sm:$0xf]  ;;  %v3144_v23 = vld [vmem:[#allocation8 + $0x8] sm:$0xf0]  ;;  %1762 = vmatpush.bf16.msra.mxu3 %v3263_v13 }
  0xb0   :  { %1418 = vmatpush.bf16.msra.mxu0 %v3031_v50  ;;  %v3777_v50 = vld [vmem:[#allocation8 + $0x34] sm:$0xf0]  ;;  %v3147_v11 = vor.u32 %v3770_v7, %v3144_v23  ;;  %v3788_v23 = vld [vmem:[#allocation8 + $0x94] sm:$0xf] }
  0xb1   :  { %1432 = vmatpush.bf16.msra.mxu1 %v3127_v51  ;;  %v3179_v51 = vor.u32 %v3778_v47, %v3176_v48  ;;  %v3167_v52 = vor.u32 %v3777_v50, %v3166_v49  ;;  %v3240_v49 = vld [vmem:[#allocation8 + $0xc8] sm:$0xf0]  ;;  %v3789_v7 = vld [vmem:[#allocation8 + $0x94] sm:$0xf0] }
  0xb2   :  { %1749 = vmatpush.bf16.msra.mxu2 %v3191_v14  ;;  %v3800_v14 = vld [vmem:[#allocation8 + $0xf4] sm:$0xf]  ;;  %v3243_v50 = vor.u32 %v3794_v45, %v3240_v49 }
  0xb4   :  { %1419 = vmatpush.bf16.msra.mxu0 %v3019_v56  ;;  %v3775_v56 = vld [vmem:[#allocation8 + $0x24] sm:$0xf0] }
  0xb5   :  { %1433 = vmatpush.bf16.msra.mxu1 %v3115_v57  ;;  %v3159_v57 = vor.u32 %v3775_v56, %v3158_v55  ;;  %v3792_v55 = vld [vmem:[#allocation8 + $0xb4] sm:$0xf] }
  0xb6   :  { %1750 = vmatpush.bf16.msra.mxu2 %v3183_v26  ;;  %v3797_v26 = vld [vmem:[#allocation8 + $0xd4] sm:$0xf0] }
  0xb7   :  { %v3247_v32 = vor.u32 %v3797_v26, %v3246_v25 }
  0xb8   :  { %1420 = vmatpush.bf16.msra.mxu0 %v3007_v63 }
  0xb9   :  { %1434 = vmatpush.bf16.msra.mxu1 %v3103_v59  ;;  %v3772_v59 = vld [vmem:[#allocation8 + $0x14] sm:$0xf] }
  0xba   :  { %1751 = vmatpush.bf16.msra.mxu2 %v3175_v33 }
  0xbc   :  { %1421 = vmatpush.bf16.msra.mxu0 %v2995_v12  ;;  %v3155_v12 = vor.u32 %v3772_v59, %v3152_v0 }
  0xbd   :  { %1435 = vmatpush.bf16.msra.mxu1 %v3091_v8  ;;  %v389_v8 = vperm.slane %v4342_v4, 0 }
  0xbe   :  { %1752 = vmatpush.bf16.msra.mxu2 %v3167_v52 }
  0xc0   :  { %1422 = vmatpush.bf16.msra.mxu0 %v2983_v15  ;;  %v3264_v15 = vld [vmem:[#allocation8 + $0xf8] sm:$0xf0] }
  0xc1   :  { %1436 = vmatpush.bf16.msra.mxu1 %v3079_v16  ;;  %v3254_v16 = vld [vmem:[#allocation8 + $0xe0] sm:$0xf]  ;;  %v3267_v17 = vor.u32 %v3800_v14, %v3264_v15 }
  0xc2   :  { %1753 = vmatpush.bf16.msra.mxu2 %v3159_v57  ;;  %v3255_v21 = vor.u32 %v3799_v18, %v3254_v16  ;;  %v3232_v57 = vld [vmem:[#allocation8 + $0xb8] sm:$0xf0]  ;;  %v3206_v16 = vld [vmem:[#allocation8 + $0x80] sm:$0xf]  ;;  %v3786_v18 = vld [vmem:[#allocation8 + $0x84] sm:$0xf] }
  0xc3   :  { %v3235_v58 = vor.u32 %v3792_v55, %v3232_v57 }
  0xc4   :  { %1423 = vmatpush.bf16.msra.mxu0 %v2971_v24  ;;  %v3259_v24 = vor.u32 %v3798_v19, %v3256_v20  ;;  %1763 = vmatpush.bf16.msra.mxu3 %v3255_v21  ;;  %v3208_v20 = vld [vmem:[#allocation8 + $0x88] sm:$0xf0] }
  0xc5   :  { %1437 = vmatpush.bf16.msra.mxu1 %v3067_v27 }
  0xc8   :  { %1424 = vmatpush.bf16.msra.mxu0 %v2959_v37  ;;  %v1202_v1 = vpop.f32.mrf.mxu0  ;;  %1764 = vmatpush.bf16.msra.mxu3 %v3247_v32 }
  0xc9   :  { %1438 = vmatpush.bf16.msra.mxu1 %v3055_v38  ;;  %v1216_v2 = vpop.f32.mrf.mxu1  ;;  %v1203_v22 = vadd.f32 %v1202_v1, %v389_v8 }
  0xcb   :  { %1425 = vmatmul.bf16.vlgmr.msra.gmra.mxu0 %v4324_v34  ;;  %v3171_v34 = vor.u32 %v3776_v53, %v3168_v54  ;;  %v1217_v33 = vadd.f32 %v1216_v2, %v1203_v22  ;;  %v3230_v53 = vld [vmem:[#allocation8 + $0xb0] sm:$0xf]  ;;  %v3793_v54 = vld [vmem:[#allocation8 + $0xb4] sm:$0xf0]  ;;  %v3211_v22 = vor.u32 %v3786_v18, %v3208_v20  ;;  %v3806_v18 = vld [vmem:[#allocation8 + $0x124] sm:$0xf] }
  0xcc   :  { %1439 = vmatmul.bf16.vlgmr.msra.gmra.mxu1 %v4326_v39  ;;  %v3150_v39 = vld [vmem:[#allocation8 + $0x10] sm:$0xf]  ;;  %v3288_v20 = vld [vmem:[#allocation8 + $0x128] sm:$0xf0] }
  0xcd   :  { %1790 = vmatpush.bf16.msrb.mxu1 %v3203_v40  ;;  %v3151_v63 = vor.u32 %v3773_v61, %v3150_v39  ;;  %v3222_v61 = vld [vmem:[#allocation8 + $0xa0] sm:$0xf] }
  0xcf   :  { %1754 = vmatpush.bf16.msra.mxu2 %v3151_v63  ;;  %v3790_v63 = vld [vmem:[#allocation8 + $0xa4] sm:$0xf] }
  0xd0   :  { %v1204_v27 = vpop.f32.mrf.mxu0  ;;  %v1230_v28 = vpop.f32.mrf.mxu2  ;;  %v3227_v3 = vor.u32 %v3790_v63, %v3224_v5  ;;  %v3811_v5 = vld [vmem:[#allocation8 + $0x144] sm:$0xf0] }
  0xd1   :  { %1791 = vmatpush.bf16.msrb.mxu1 %v3195_v43  ;;  %v1218_v31 = vpop.f32.mrf.mxu1  ;;  %v1244_v36 = vpop.f32.mrf.mxu3  ;;  %v1205_v37 = vadd.f32 %v1204_v27, %v389_v8  ;;  %v1231_v38 = vadd.f32 %v1230_v28, %v1217_v33  ;;  %v3238_v43 = vld [vmem:[#allocation8 + $0xc0] sm:$0xf] }
  0xd2   :  { %v3239_v48 = vor.u32 %v3795_v44, %v3238_v43 }
  0xd3   :  { %1755 = vmatpush.bf16.msra.mxu2 %v3143_v6  ;;  %v1219_v40 = vadd.f32 %v1218_v31, %v1205_v37  ;;  %v3214_v6 = vld [vmem:[#allocation8 + $0x90] sm:$0xf] }
  0xd4   :  { %1765 = vmatpush.bf16.msra.mxu3 %v3239_v48  ;;  %v3215_v10 = vor.u32 %v3789_v7, %v3214_v6  ;;  %v3304_v6 = vld [vmem:[#allocation8 + $0x148] sm:$0xf0] }
  0xd5   :  { %1792 = vmatpush.bf16.msrb.mxu1 %v3187_v46  ;;  %v1245_v46 = vadd.f32 %v1244_v36, %v1231_v38 }
  0xd7   :  { %1804 = vmatpush.bf16.msrb.mxu2 %v3267_v17  ;;  %v3787_v17 = vld [vmem:[#allocation8 + $0x84] sm:$0xf0] }
  0xd8   :  { %v1232_v42 = vpop.f32.mrf.mxu2  ;;  %v3207_v19 = vor.u32 %v3787_v17, %v3206_v16  ;;  %v3286_v16 = vld [vmem:[#allocation8 + $0x120] sm:$0xf]  ;;  %v3807_v17 = vld [vmem:[#allocation8 + $0x124] sm:$0xf0] }
  0xd9   :  { %1793 = vmatpush.bf16.msrb.mxu1 %v3179_v51  ;;  %v1233_v51 = vadd.f32 %v1232_v42, %v1219_v40  ;;  %v1246_v52 = vpop.f32.mrf.mxu3  ;;  %v3326_v40 = vld [vmem:[#allocation8 + $0x170] sm:$0xf]  ;;  %v3816_v42 = vld [vmem:[#allocation8 + $0x174] sm:$0xf] }
  0xdb   :  { %1805 = vmatpush.bf16.msrb.mxu2 %v3259_v24  ;;  %v1247_v60 = vadd.f32 %v1246_v52, %v1233_v51  ;;  %v390_v24 = vperm.slane %v4342_v4, 1  ;;  %v3318_v52 = vld [vmem:[#allocation8 + $0x160] sm:$0xf] }
  0xdd   :  { %1794 = vmatpush.bf16.msrb.mxu1 %v3171_v34  ;;  %v3231_v34 = vor.u32 %v3793_v54, %v3230_v53  ;;  %v3815_v53 = vld [vmem:[#allocation8 + $0x164] sm:$0xf0]  ;;  %v3814_v54 = vld [vmem:[#allocation8 + $0x164] sm:$0xf] }
  0xdf   :  { %1806 = vmatpush.bf16.msrb.mxu2 %v3251_v35  ;;  %1766 = vmatpush.bf16.msra.mxu3 %v3231_v34  ;;  %v3320_v34 = vld [vmem:[#allocation8 + $0x168] sm:$0xf0] }
  0xe1   :  { %1795 = vmatpush.bf16.msrb.mxu1 %v3163_v62  ;;  %v3791_v62 = vld [vmem:[#allocation8 + $0xa4] sm:$0xf0] }
  0xe2   :  { %v3223_v2 = vor.u32 %v3791_v62, %v3222_v61  ;;  %v3812_v61 = vld [vmem:[#allocation8 + $0x154] sm:$0xf] }
  0xe3   :  { %1807 = vmatpush.bf16.msrb.mxu2 %v3243_v50 }
  0xe4   :  { %1767 = vmatpush.bf16.msra.mxu3 %v3223_v2  ;;  %v3302_v2 = vld [vmem:[#allocation8 + $0x140] sm:$0xf] }
  0xe5   :  { %1796 = vmatpush.bf16.msrb.mxu1 %v3155_v12 }
  0xe7   :  { %1808 = vmatpush.bf16.msrb.mxu2 %v3235_v58  ;;  %v3323_v58 = vor.u32 %v3814_v54, %v3320_v34 }
  0xe8   :  { %v1258_v41 = vpop.f32.mrf.mxu0  ;;  %1768 = vmatpush.bf16.msra.mxu3 %v3215_v10  ;;  %v3809_v10 = vld [vmem:[#allocation8 + $0x134] sm:$0xf0] }
  0xe9   :  { %1797 = vmatpush.bf16.msrb.mxu1 %v3147_v11  ;;  %v1272_v47 = vpop.f32.mrf.mxu1  ;;  %v1259_v56 = vadd.f32 %v1258_v41, %v1245_v46  ;;  %v3216_v11 = vld [vmem:[#allocation8 + $0x98] sm:$0xf0]  ;;  %v3817_v41 = vld [vmem:[#allocation8 + $0x174] sm:$0xf0] }
  0xea   :  { %v3219_v13 = vor.u32 %v3788_v23, %v3216_v11  ;;  %v3327_v46 = vor.u32 %v3817_v41, %v3326_v40  ;;  %v3303_v23 = vor.u32 %v3811_v5, %v3302_v2  ;;  %v3808_v11 = vld [vmem:[#allocation8 + $0x134] sm:$0xf]  ;;  %v3392_v2 = vld [vmem:[#allocation10 + $0x78] sm:$0xf0]  ;;  %v3382_v5 = vld [vmem:[#allocation10 + $0x60] sm:$0xf] }
  0xeb   :  { %v1273_v59 = vadd.f32 %v1272_v47, %v1259_v56  ;;  %1809 = vmatpush.bf16.msrb.mxu2 %v3227_v3  ;;  %v3328_v47 = vld [vmem:[#allocation8 + $0x178] sm:$0xf0]  ;;  %v3319_v56 = vor.u32 %v3815_v53, %v3318_v52 }
  0xec   :  { %1769 = vmatpush.bf16.msra.mxu3 %v3207_v19  ;;  %v3331_v48 = vor.u32 %v3816_v42, %v3328_v47  ;;  %1776 = vmatpush.bf16.msrb.mxu0 %v3327_v46  ;;  %v3287_v19 = vor.u32 %v3807_v17, %v3286_v16  ;;  %v3374_v16 = vld [vmem:[#allocation10 + $0x50] sm:$0xf]  ;;  %v3829_v17 = vld [vmem:[#allocation10 + $0x54] sm:$0xf0] }
  0xed   :  { %v1445_v8 = vmax.f32 %v1273_v59, 0.0 }
  0xef   :  { %1810 = vmatpush.bf16.msrb.mxu2 %v3219_v13 }
  0xf0   :  { %v1260_v39 = vpop.f32.mrf.mxu0  ;;  %v1286_v15 = vpop.f32.mrf.mxu2  ;;  %1818 = vmatpush.bf16.msrb.mxu3 %v3331_v48  ;;  %1777 = vmatpush.bf16.msrb.mxu0 %v3319_v56 }
  0xf1   :  { %v1261_v0 = vadd.f32 %v1260_v39, %v1247_v60  ;;  %v1274_v1 = vpop.f32.mrf.mxu1  ;;  %v1300_v21 = vpop.f32.mrf.mxu3  ;;  %v1287_v25 = vadd.f32 %v1286_v15, %v390_v24  ;;  %v3310_v60 = vld [vmem:[#allocation8 + $0x150] sm:$0xf]  ;;  %v3813_v39 = vld [vmem:[#allocation8 + $0x154] sm:$0xf0] }
  0xf2   :  { %v3311_v59 = vor.u32 %v3813_v39, %v3310_v60 }
  0xf3   :  { %v1275_v12 = vadd.f32 %v1274_v1, %v1261_v0  ;;  %1811 = vmatpush.bf16.msrb.mxu2 %v3211_v22  ;;  %v1301_v27 = vadd.f32 %v1300_v21, %v1287_v25  ;;  %v3312_v0 = vld [vmem:[#allocation8 + $0x158] sm:$0xf0]  ;;  %v3291_v21 = vor.u32 %v3806_v18, %v3288_v20  ;;  %v3278_v22 = vld [vmem:[#allocation8 + $0x110] sm:$0xf]  ;;  %v3804_v25 = vld [vmem:[#allocation8 + $0x114] sm:$0xf] }
  0xf4   :  { %1819 = vmatpush.bf16.msrb.mxu3 %v3323_v58  ;;  %v3315_v1 = vor.u32 %v3812_v61, %v3312_v0  ;;  %1778 = vmatpush.bf16.msrb.mxu0 %v3311_v59  ;;  %v3833_v59 = vld [vmem:[#allocation10 + $0x74] sm:$0xf0]  ;;  %v3832_v0 = vld [vmem:[#allocation10 + $0x74] sm:$0xf]  ;;  %v3446_v20 = vld [vmem:[#allocation10 + $0xe0] sm:$0xf] }
  0xf5   :  { %v1448_v9 = vmax.f32 %v1275_v12, 0.0  ;;  %v3810_v12 = vld [vmem:[#allocation8 + $0x144] sm:$0xf]  ;;  %v3828_v18 = vld [vmem:[#allocation10 + $0x54] sm:$0xf] }
  0xf7   :  { %v1451_v14 = vpack.c.bf16 %v1448_v9, %v1445_v8  ;;  %v3307_v8 = vor.u32 %v3810_v12, %v3304_v6  ;;  %v3294_v9 = vld [vmem:[#allocation8 + $0x130] sm:$0xf]  ;;  %v3395_v12 = vor.u32 %v3832_v0, %v3392_v2  ;;  %v3830_v6 = vld [vmem:[#allocation10 + $0x64] sm:$0xf]  ;;  %v3820_v2 = vld [vmem:[#allocation10 + $0x14] sm:$0xf] }
  0xf8   :  { %v1288_v26 = vpop.f32.mrf.mxu2  ;;  %1820 = vmatpush.bf16.msrb.mxu3 %v3315_v1  ;;  %1779 = vmatpush.bf16.msrb.mxu0 %v3303_v23  ;;  %v3295_v13 = vor.u32 %v3809_v10, %v3294_v9  ;;  %v3454_v23 = vld [vmem:[#allocation10 + $0xf0] sm:$0xf]  ;;  %v3849_v9 = vld [vmem:[#allocation10 + $0xf4] sm:$0xf0]  ;;  %v3848_v10 = vld [vmem:[#allocation10 + $0xf4] sm:$0xf] }
  0xf9   :  { %1756 = vmatmul.bf16.vlgmr.msra.gmra.mxu2 %v1451_v14  ;;  %1798 = vmatmul.bf16.vlgmr.msrb.gmra.mxu1 %v1451_v14  ;;  %v1302_v28 = vpop.f32.mrf.mxu3  ;;  %v1289_v30 = vadd.f32 %v1288_v26, %v390_v24  ;;  %v3296_v14 = vld [vmem:[#allocation8 + $0x138] sm:$0xf0]  ;;  %v3805_v24 = vld [vmem:[#allocation8 + $0x114] sm:$0xf0]  ;;  %v3342_v0 = vld [vmem:[#allocation10 + $0x10] sm:$0xf] }
  0xfa   :  { %v3299_v15 = vor.u32 %v3808_v11, %v3296_v14  ;;  %v3279_v26 = vor.u32 %v3805_v24, %v3278_v22  ;;  %v3456_v11 = vld [vmem:[#allocation10 + $0xf8] sm:$0xf0]  ;;  %2064 = vmatpush.bf16.msra.mxu2 %v3395_v12  ;;  %v3455_v14 = vor.u32 %v3849_v9, %v3454_v23  ;;  %v3846_v24 = vld [vmem:[#allocation10 + $0xe4] sm:$0xf]  ;;  %v3416_v9 = vld [vmem:[#allocation10 + $0xa8] sm:$0xf0] }
  0xfb   :  { %v1303_v33 = vadd.f32 %v1302_v28, %v1289_v30  ;;  %v3803_v30 = vld [vmem:[#allocation8 + $0x104] sm:$0xf0]  ;;  %v3838_v23 = vld [vmem:[#allocation10 + $0xa4] sm:$0xf] }
  0xfc   :  { %1821 = vmatpush.bf16.msrb.mxu3 %v3307_v8  ;;  %1780 = vmatpush.bf16.msrb.mxu0 %v3295_v13 }
  0xfd   :  { %2050 = vmatpush.bf16.msra.mxu1 %v3455_v14  ;;  %v3818_v14 = vld [vmem:[#allocation10 + $0x4] sm:$0xf] }
 0x100   :  { %1822 = vmatpush.bf16.msrb.mxu3 %v3299_v15  ;;  %1781 = vmatpush.bf16.msrb.mxu0 %v3287_v19  ;;  %v3459_v15 = vor.u32 %v3848_v10, %v3456_v11  ;;  %v3376_v19 = vld [vmem:[#allocation10 + $0x58] sm:$0xf0]  ;;  %v3419_v10 = vor.u32 %v3838_v23, %v3416_v9  ;;  %v3334_v11 = vld [vmem:[#allocation10] sm:$0xf]  ;;  %v3852_v23 = vld [vmem:[#allocation11 + $0x10] sm:$0xff] }
 0x101   :  { %v3851_v9 = vld [vmem:[#allocation11 + $0x8] sm:$0xff] }
 0x104   :  { %1823 = vmatpush.bf16.msrb.mxu3 %v3291_v21  ;;  %1782 = vmatpush.bf16.msrb.mxu0 %v3279_v26  ;;  %v3847_v21 = vld [vmem:[#allocation10 + $0xe4] sm:$0xf0]  ;;  %v3375_v26 = vor.u32 %v3829_v17, %v3374_v16  ;;  %v3336_v16 = vld [vmem:[#allocation10 + $0x8] sm:$0xf0] }
 0x105   :  { %v3447_v22 = vor.u32 %v3847_v21, %v3446_v20  ;;  %v3339_v17 = vor.u32 %v3818_v14, %v3336_v16  ;;  %v3836_v20 = vld [vmem:[#allocation10 + $0x94] sm:$0xf]  ;;  %v3858_v14 = vld [vmem:[#allocation11 + $0x40] sm:$0xff] }
 0x106   :  { %v3872_v16 = vld [vmem:[#allocation13 + $0x30] sm:$0xff] }
 0x107   :  { %2051 = vmatpush.bf16.msra.mxu1 %v3447_v22  ;;  %v3408_v22 = vld [vmem:[#allocation10 + $0x98] sm:$0xf0] }
 0x108   :  { %v1314_v29 = vpop.f32.mrf.mxu0 }
 0x109   :  { %v1315_v31 = vadd.f32 %v1314_v29, %v1301_v27  ;;  %v1328_v32 = vpop.f32.mrf.mxu1  ;;  %v3280_v27 = vld [vmem:[#allocation8 + $0x118] sm:$0xf0]  ;;  %v3270_v29 = vld [vmem:[#allocation8 + $0x100] sm:$0xf] }
 0x10a   :  { %v3283_v28 = vor.u32 %v3804_v25, %v3280_v27  ;;  %v3448_v25 = vld [vmem:[#allocation10 + $0xe8] sm:$0xf0] }
 0x10b   :  { %v1329_v35 = vadd.f32 %v1328_v32, %v1315_v31  ;;  %v3802_v31 = vld [vmem:[#allocation8 + $0x104] sm:$0xf]  ;;  %v3271_v32 = vor.u32 %v3803_v30, %v3270_v29  ;;  %v3451_v27 = vor.u32 %v3846_v24, %v3448_v25  ;;  %v3827_v29 = vld [vmem:[#allocation10 + $0x44] sm:$0xf0]  ;;  %v3379_v30 = vor.u32 %v3828_v18, %v3376_v19  ;;  %v3406_v18 = vld [vmem:[#allocation10 + $0x90] sm:$0xf] }
 0x10c   :  { %1824 = vmatpush.bf16.msrb.mxu3 %v3283_v28  ;;  %v3366_v28 = vld [vmem:[#allocation10 + $0x40] sm:$0xf]  ;;  %v3837_v19 = vld [vmem:[#allocation10 + $0x94] sm:$0xf0]  ;;  %v3411_v25 = vor.u32 %v3836_v20, %v3408_v22 }
 0x10d   :  { %1783 = vmatpush.bf16.msrb.mxu0 %v3271_v32  ;;  %v3845_v32 = vld [vmem:[#allocation10 + $0xd4] sm:$0xf0]  ;;  %v3407_v21 = vor.u32 %v3837_v19, %v3406_v18  ;;  %v3871_v18 = vld [vmem:[#allocation13 + $0x28] sm:$0xff] }
 0x10e   :  { %v1870_v19 = vld [vmem:[%s4377_s6] sm:$0x3] }
 0x10f   :  { %v1872_v22 = vperm.slane %v1870_v19, 0 }
 0x110   :  { %v1342_v36 = vpop.f32.mrf.mxu2  ;;  %v1316_v38 = vpop.f32.mrf.mxu0 }
 0x111   :  { %v1356_v37 = vpop.f32.mrf.mxu3  ;;  %v1343_v43 = vadd.f32 %v1342_v36, %v1329_v35  ;;  %v1317_v44 = vadd.f32 %v1316_v38, %v1303_v33  ;;  %v1330_v45 = vpop.f32.mrf.mxu1  ;;  %v3272_v33 = vld [vmem:[#allocation8 + $0x108] sm:$0xf0]  ;;  %v391_v38 = vperm.slane %v4342_v4, 2 }
 0x112   :  { %v3275_v36 = vor.u32 %v3802_v31, %v3272_v33  ;;  %v3438_v31 = vld [vmem:[#allocation10 + $0xd0] sm:$0xf]  ;;  %v3844_v33 = vld [vmem:[#allocation10 + $0xd4] sm:$0xf] }
 0x113   :  { %v1331_v49 = vadd.f32 %v1330_v45, %v1317_v44  ;;  %v1357_v50 = vadd.f32 %v1356_v37, %v1343_v43 }
 0x114   :  { %1825 = vmatpush.bf16.msrb.mxu3 %v3275_v36  ;;  %v3368_v36 = vld [vmem:[#allocation10 + $0x48] sm:$0xf0] }
 0x115   :  { %v1446_v62 = vmax.f32 %v1357_v50, 0.0 }
 0x118   :  { %v1344_v51 = vpop.f32.mrf.mxu2 }
 0x119   :  { %v1345_v55 = vadd.f32 %v1344_v51, %v1331_v49  ;;  %v1358_v57 = vpop.f32.mrf.mxu3 }
 0x11b   :  { %v1359_v63 = vadd.f32 %v1358_v57, %v1345_v55 }
 0x11d   :  { %v1449_v3 = vmax.f32 %v1359_v63, 0.0  ;;  %v3390_v63 = vld [vmem:[#allocation10 + $0x70] sm:$0xf] }
 0x11e   :  { %v3391_v1 = vor.u32 %v3833_v59, %v3390_v63  ;;  %v3424_v63 = vld [vmem:[#allocation10 + $0xb8] sm:$0xf0] }
 0x11f   :  { %v1452_v7 = vpack.c.bf16 %v1449_v3, %v1446_v62  ;;  %v3831_v3 = vld [vmem:[#allocation10 + $0x64] sm:$0xf0] }
 0x120   :  { %2036 = vmatpush.bf16.msra.mxu0 %v3391_v1  ;;  %v3383_v8 = vor.u32 %v3831_v3, %v3382_v5  ;;  %v3821_v1 = vld [vmem:[#allocation10 + $0x14] sm:$0xf0]  ;;  %v3344_v3 = vld [vmem:[#allocation10 + $0x18] sm:$0xf0] }
 0x121   :  { %1770 = vmatmul.bf16.vlgmr.msra.gmra.mxu3 %v1452_v7  ;;  %1812 = vmatmul.bf16.vlgmr.msrb.gmra.mxu2 %v1452_v7  ;;  %v3384_v7 = vld [vmem:[#allocation10 + $0x68] sm:$0xf0]  ;;  %v3343_v5 = vor.u32 %v3821_v1, %v3342_v0  ;;  %v3347_v12 = vor.u32 %v3820_v2, %v3344_v3  ;;  %v3854_v3 = vld [vmem:[#allocation11 + $0x20] sm:$0xff] }
 0x122   :  { %v3387_v13 = vor.u32 %v3830_v6, %v3384_v7  ;;  %2078 = vmatpush.bf16.msra.mxu3 %v3459_v15  ;;  %v3414_v6 = vld [vmem:[#allocation10 + $0xa0] sm:$0xf]  ;;  %v3839_v7 = vld [vmem:[#allocation10 + $0xa4] sm:$0xf0] }
 0x124   :  { %2037 = vmatpush.bf16.msra.mxu0 %v3383_v8  ;;  %2065 = vmatpush.bf16.msra.mxu2 %v3387_v13  ;;  %v3415_v8 = vor.u32 %v3839_v7, %v3414_v6  ;;  %v3819_v13 = vld [vmem:[#allocation10 + $0x4] sm:$0xf0]  ;;  %v3853_v6 = vld [vmem:[#allocation11 + $0x18] sm:$0xff]  ;;  %v3862_v7 = vld [vmem:[#allocation11 + $0x60] sm:$0xff] }
 0x125   :  { %v3335_v15 = vor.u32 %v3819_v13, %v3334_v11  ;;  %v3850_v11 = vld [vmem:[#allocation11] sm:$0xff]  ;;  %v3859_v13 = vld [vmem:[#allocation11 + $0x48] sm:$0xff] }
 0x126   :  { %2079 = vmatpush.bf16.msra.mxu3 %v3451_v27  ;;  %v3835_v27 = vld [vmem:[#allocation10 + $0x84] sm:$0xf0] }
 0x128   :  { %v1370_v35 = vpop.f32.mrf.mxu0  ;;  %2038 = vmatpush.bf16.msra.mxu0 %v3375_v26  ;;  %2066 = vmatpush.bf16.msra.mxu2 %v3379_v30  ;;  %v3398_v26 = vld [vmem:[#allocation10 + $0x80] sm:$0xf]  ;;  %v3400_v30 = vld [vmem:[#allocation10 + $0x88] sm:$0xf0] }
 0x129   :  { %v1384_v37 = vpop.f32.mrf.mxu1  ;;  %v1371_v41 = vadd.f32 %v1370_v35, %v391_v38  ;;  %v3826_v35 = vld [vmem:[#allocation10 + $0x44] sm:$0xf] }
 0x12b   :  { %v1385_v45 = vadd.f32 %v1384_v37, %v1371_v41  ;;  %v3440_v37 = vld [vmem:[#allocation10 + $0xd8] sm:$0xf0]  ;;  %v3367_v41 = vor.u32 %v3827_v29, %v3366_v28  ;;  %v3834_v28 = vld [vmem:[#allocation10 + $0x84] sm:$0xf]  ;;  %v3399_v29 = vor.u32 %v3835_v27, %v3398_v26 }
 0x12d   :  { %2039 = vmatpush.bf16.msra.mxu0 %v3367_v41 }
 0x130   :  { %v1398_v40 = vpop.f32.mrf.mxu2  ;;  %v1372_v42 = vpop.f32.mrf.mxu0 }
 0x131   :  { %v1386_v43 = vpop.f32.mrf.mxu1  ;;  %v1412_v44 = vpop.f32.mrf.mxu3  ;;  %v1373_v46 = vadd.f32 %v1372_v42, %v391_v38  ;;  %v1399_v47 = vadd.f32 %v1398_v40, %v1385_v45  ;;  %v3439_v38 = vor.u32 %v3845_v32, %v3438_v31  ;;  %v3443_v40 = vor.u32 %v3844_v33, %v3440_v37  ;;  %v3824_v45 = vld [vmem:[#allocation10 + $0x34] sm:$0xf]  ;;  %v3857_v33 = vld [vmem:[#allocation11 + $0x38] sm:$0xff] }
 0x132   :  { %v3371_v42 = vor.u32 %v3826_v35, %v3368_v36  ;;  %v3403_v31 = vor.u32 %v3834_v28, %v3400_v30  ;;  %v3865_v35 = vld [vmem:[#allocation11 + $0x78] sm:$0xff]  ;;  %v3856_v36 = vld [vmem:[#allocation11 + $0x30] sm:$0xff]  ;;  %v1873_v28 = vperm.slane %v1870_v19, 1  ;;  %v3882_v19 = vld [vmem:[#allocation16] sm:$0xff] }
 0x133   :  { %v1387_v48 = vadd.f32 %v1386_v43, %v1373_v46  ;;  %v1413_v52 = vadd.f32 %v1412_v44, %v1399_v47  ;;  %2052 = vmatpush.bf16.msra.mxu1 %v3439_v38  ;;  %2080 = vmatpush.bf16.msra.mxu3 %v3443_v40  ;;  %v3358_v43 = vld [vmem:[#allocation10 + $0x30] sm:$0xf]  ;;  %v3825_v44 = vld [vmem:[#allocation10 + $0x34] sm:$0xf0]  ;;  %v3360_v47 = vld [vmem:[#allocation10 + $0x38] sm:$0xf0] }
 0x134   :  { %2067 = vmatpush.bf16.msra.mxu2 %v3371_v42  ;;  %v3359_v46 = vor.u32 %v3825_v44, %v3358_v43  ;;  %v3855_v38 = vld [vmem:[#allocation11 + $0x28] sm:$0xff] }
 0x135   :  { %v1502_v40 = vld [vmem:[%s4375_s4] sm:$0x3] }
 0x136   :  { %2040 = vmatpush.bf16.msra.mxu0 %v3359_v46  ;;  %v1504_v43 = vperm.slane %v1502_v40, 0 }
 0x138   :  { %v1400_v49 = vpop.f32.mrf.mxu2 }
 0x139   :  { %v1401_v53 = vadd.f32 %v1400_v49, %v1387_v48  ;;  %v1414_v54 = vpop.f32.mrf.mxu3  ;;  %v3363_v48 = vor.u32 %v3824_v45, %v3360_v47  ;;  %v3430_v49 = vld [vmem:[#allocation10 + $0xc0] sm:$0xf]  ;;  %v1505_v47 = vperm.slane %v1502_v40, 1 }
 0x13b   :  { %v1415_v56 = vadd.f32 %v1414_v54, %v1401_v53  ;;  %v3432_v53 = vld [vmem:[#allocation10 + $0xc8] sm:$0xf0]  ;;  %2068 = vmatpush.bf16.msra.mxu2 %v3363_v48 }
 0x148   :  { %v1426_v50 = vpop.f32.mrf.mxu0 }
 0x149   :  { %v1440_v51 = vpop.f32.mrf.mxu1  ;;  %v1427_v55 = vadd.f32 %v1426_v50, %v1413_v52  ;;  %v3843_v50 = vld [vmem:[#allocation10 + $0xc4] sm:$0xf0] }
 0x14a   :  { %v3431_v52 = vor.u32 %v3843_v50, %v3430_v49 }
 0x14b   :  { %v1441_v57 = vadd.f32 %v1440_v51, %v1427_v55  ;;  %v3842_v51 = vld [vmem:[#allocation10 + $0xc4] sm:$0xf]  ;;  %v3350_v55 = vld [vmem:[#allocation10 + $0x20] sm:$0xf] }
 0x14c   :  { %v3435_v54 = vor.u32 %v3842_v51, %v3432_v53  ;;  %2053 = vmatpush.bf16.msra.mxu1 %v3431_v52 }
 0x14d   :  { %v1447_v39 = vmax.f32 %v1441_v57, 0.0 }
 0x14e   :  { %2081 = vmatpush.bf16.msra.mxu3 %v3435_v54 }
 0x150   :  { %v1428_v34 = vpop.f32.mrf.mxu0 }
 0x151   :  { %v1429_v4 = vadd.f32 %v1428_v34, %v1415_v56  ;;  %v1442_v58 = vpop.f32.mrf.mxu1  ;;  %v3823_v56 = vld [vmem:[#allocation10 + $0x24] sm:$0xf0]  ;;  %v3822_v34 = vld [vmem:[#allocation10 + $0x24] sm:$0xf] }
 0x152   :  { %v3351_v57 = vor.u32 %v3823_v56, %v3350_v55 }
 0x153   :  { %v1443_v60 = vadd.f32 %v1442_v58, %v1429_v4  ;;  %v3352_v4 = vld [vmem:[#allocation10 + $0x28] sm:$0xf0] }
 0x154   :  { %v3355_v58 = vor.u32 %v3822_v34, %v3352_v4  ;;  %2041 = vmatpush.bf16.msra.mxu0 %v3351_v57 }
 0x155   :  { %v1450_v61 = vmax.f32 %v1443_v60, 0.0  ;;  %v3422_v60 = vld [vmem:[#allocation10 + $0xb0] sm:$0xf] }
 0x156   :  { %2069 = vmatpush.bf16.msra.mxu2 %v3355_v58 }
 0x157   :  { %v1453_v62 = vpack.c.bf16 %v1450_v61, %v1447_v39  ;;  %v3841_v39 = vld [vmem:[#allocation10 + $0xb4] sm:$0xf0]  ;;  %v3840_v61 = vld [vmem:[#allocation10 + $0xb4] sm:$0xf] }
 0x158   :  { %v3427_v59 = vor.u32 %v3840_v61, %v3424_v63  ;;  %2042 = vmatpush.bf16.msra.mxu0 %v3343_v5  ;;  %v3864_v5 = vld [vmem:[#allocation11 + $0x70] sm:$0xff] }
 0x159   :  { %1784 = vmatmul.bf16.vlgmr.msrb.gmra.mxu0 %v1453_v62  ;;  %1826 = vmatmul.bf16.vlgmr.msrb.gmra.mxu3 %v1453_v62  ;;  %v3423_v62 = vor.u32 %v3841_v39, %v3422_v60 }
 0x15a   :  { %2082 = vmatpush.bf16.msra.mxu3 %v3427_v59  ;;  %2070 = vmatpush.bf16.msra.mxu2 %v3347_v12  ;;  %v3863_v12 = vld [vmem:[#allocation11 + $0x68] sm:$0xff] }
 0x15b   :  { %2054 = vmatpush.bf16.msra.mxu1 %v3423_v62 }
 0x15c   :  { %2043 = vmatpush.bf16.msra.mxu0 %v3335_v15  ;;  %v3873_v15 = vld [vmem:[#allocation13 + $0x38] sm:$0xff] }
 0x15e   :  { %2083 = vmatpush.bf16.msra.mxu3 %v3419_v10  ;;  %2071 = vmatpush.bf16.msra.mxu2 %v3339_v17  ;;  %v3860_v10 = vld [vmem:[#allocation11 + $0x50] sm:$0xff] }
 0x15f   :  { %2055 = vmatpush.bf16.msra.mxu1 %v3415_v8  ;;  %v3861_v8 = vld [vmem:[#allocation11 + $0x58] sm:$0xff] }
 0x160   :  { %2230 = vmatpush.bf16.msrb.mxu0 %v3857_v33 }
 0x162   :  { %2084 = vmatpush.bf16.msra.mxu3 %v3411_v25  ;;  %2329 = vmatpush.bf16.msrb.mxu2 %v3873_v15 }
 0x163   :  { %2056 = vmatpush.bf16.msra.mxu1 %v3407_v21 }
 0x164   :  { %2231 = vmatpush.bf16.msrb.mxu0 %v3856_v36 }
 0x166   :  { %2085 = vmatpush.bf16.msra.mxu3 %v3403_v31  ;;  %2330 = vmatpush.bf16.msrb.mxu2 %v3872_v16  ;;  %v3885_v16 = vld [vmem:[#allocation16 + $0x18] sm:$0xff] }
 0x167   :  { %2057 = vmatpush.bf16.msra.mxu1 %v3399_v29 }
 0x168   :  { %2232 = vmatpush.bf16.msrb.mxu0 %v3855_v38 }
 0x16a   :  { %2331 = vmatpush.bf16.msrb.mxu2 %v3871_v18  ;;  %v3883_v18 = vld [vmem:[#allocation16 + $0x8] sm:$0xff] }
 0x16b   :  { %2244 = vmatpush.bf16.msrb.mxu1 %v3865_v35 }
 0x16c   :  { %2233 = vmatpush.bf16.msrb.mxu0 %v3854_v3  ;;  %v3889_v3 = vld [vmem:[#allocation16 + $0x38] sm:$0xff] }
 0x16f   :  { %2245 = vmatpush.bf16.msrb.mxu1 %v3864_v5  ;;  %v3874_v5 = vld [vmem:[#allocation14] sm:$0xff] }
 0x170   :  { %2234 = vmatpush.bf16.msrb.mxu0 %v3853_v6  ;;  %v3887_v6 = vld [vmem:[#allocation16 + $0x28] sm:$0xff] }
 0x173   :  { %2246 = vmatpush.bf16.msrb.mxu1 %v3863_v12  ;;  %v3888_v12 = vld [vmem:[#allocation16 + $0x30] sm:$0xff] }
 0x174   :  { %2235 = vmatpush.bf16.msrb.mxu0 %v3852_v23 }
 0x176   :  { %v1799_v41 = vpop.f32.mrf.mxu1 }
 0x177   :  { %v1800_v55 = vadd.f32 %v1799_v41, %v1505_v47  ;;  %2247 = vmatpush.bf16.msrb.mxu1 %v3862_v7  ;;  %v3886_v7 = vld [vmem:[#allocation16 + $0x20] sm:$0xff] }
 0x178   :  { %2236 = vmatpush.bf16.msrb.mxu0 %v3851_v9 }
 0x17b   :  { %2248 = vmatpush.bf16.msrb.mxu1 %v3861_v8  ;;  %v3914_v8 = vld [vmem:[%s4381_s10] ss:$0 sm:$0xff] }
 0x17c   :  { %v1757_v24 = vpop.f32.mrf.mxu2  ;;  %2237 = vmatpush.bf16.msrb.mxu0 %v3850_v11 }
 0x17d   :  { %v1758_v46 = vadd.f32 %v1757_v24, %v1504_v43 }
 0x17e   :  { %v1801_v53 = vpop.f32.mrf.mxu1 }
 0x17f   :  { %v1802_v57 = vadd.f32 %v1801_v53, %v1505_v47  ;;  %2249 = vmatpush.bf16.msrb.mxu1 %v3860_v10  ;;  %v3869_v47 = vld [vmem:[#allocation13 + $0x18] sm:$0xff]  ;;  %v3879_v53 = vld [vmem:[#allocation14 + $0x28] sm:$0xff] }
 0x183   :  { %2250 = vmatpush.bf16.msrb.mxu1 %v3859_v13 }
 0x184   :  { %v1759_v37 = vpop.f32.mrf.mxu2 }
 0x185   :  { %v1760_v48 = vadd.f32 %v1759_v37, %v1504_v43 }
 0x187   :  { %2251 = vmatpush.bf16.msrb.mxu1 %v3858_v14 }
 0x1a4   :  { %v1771_v32 = vpop.f32.mrf.mxu3  ;;  %v1813_v44 = vpop.f32.mrf.mxu2 }
 0x1a5   :  { %v1772_v49 = vadd.f32 %v1771_v32, %v1758_v46  ;;  %v1814_v4 = vadd.f32 %v1813_v44, %v1800_v55  ;;  %v3870_v46 = vld [vmem:[#allocation13 + $0x20] sm:$0xff] }
 0x1a6   :  { %2332 = vmatpush.bf16.msrb.mxu2 %v3870_v46 }
 0x1aa   :  { %2333 = vmatpush.bf16.msrb.mxu2 %v3869_v47 }
 0x1ac   :  { %v1773_v42 = vpop.f32.mrf.mxu3  ;;  %v1815_v34 = vpop.f32.mrf.mxu2 }
 0x1ad   :  { %v1774_v51 = vadd.f32 %v1773_v42, %v1760_v48  ;;  %v1816_v39 = vadd.f32 %v1815_v34, %v1802_v57  ;;  %v3868_v48 = vld [vmem:[#allocation13 + $0x10] sm:$0xff]  ;;  %v3913_v34 = vld [vmem:[%s4379_s8] ss:$0 sm:$0xff] }
 0x1ae   :  { %2334 = vmatpush.bf16.msrb.mxu2 %v3868_v48 }
 0x1d6   :  { %v1785_v45 = vpop.f32.mrf.mxu0 }
 0x1d7   :  { %v1786_v52 = vadd.f32 %v1785_v45, %v1772_v49  ;;  %v3867_v49 = vld [vmem:[#allocation13 + $0x8] sm:$0xff] }
 0x1d8   :  { %2335 = vmatpush.bf16.msrb.mxu2 %v3867_v49 }
 0x1d9   :  { %v1832_v58 = vmax.f32 %v1786_v52, 0.0  ;;  %v3880_v52 = vld [vmem:[#allocation14 + $0x30] sm:$0xff] }
 0x1dc   :  { %v1827_v50 = vpop.f32.mrf.mxu3 }
 0x1dd   :  { %v1828_v61 = vadd.f32 %v1827_v50, %v1814_v4  ;;  %v3866_v50 = vld [vmem:[#allocation13] sm:$0xff] }
 0x1de   :  { %v1787_v54 = vpop.f32.mrf.mxu0  ;;  %2336 = vmatpush.bf16.msrb.mxu2 %v3866_v50 }
 0x1df   :  { %v1788_v56 = vadd.f32 %v1787_v54, %v1774_v51  ;;  %v1833_v0 = vmax.f32 %v1828_v61, 0.0  ;;  %v3881_v51 = vld [vmem:[#allocation14 + $0x38] sm:$0xff]  ;;  %v3878_v54 = vld [vmem:[#allocation14 + $0x20] sm:$0xff] }
 0x1e0   :  { %2414 = vmatpush.bf16.msrb.mxu3 %v3881_v51 }
 0x1e1   :  { %v1834_v60 = vmax.f32 %v1788_v56, 0.0 }
 0x1e3   :  { %v1836_v62 = vpack.c.bf16 %v1834_v60, %v1832_v58 }
 0x1e4   :  { %v1829_v63 = vpop.f32.mrf.mxu3  ;;  %2415 = vmatpush.bf16.msrb.mxu3 %v3880_v52 }
 0x1e5   :  { %v1830_v59 = vadd.f32 %v1829_v63, %v1816_v39  ;;  %2044 = vmatmul.bf16.vlgmr.msra.gmra.mxu0 %v1836_v62  ;;  %2072 = vmatmul.bf16.vlgmr.msra.gmra.mxu2 %v1836_v62 }
 0x1e6   :  { %2499 = vmatpush.bf16.msra.mxu0 %v3889_v3 }
 0x1e7   :  { %v1835_v1 = vmax.f32 %v1830_v59, 0.0 }
 0x1e8   :  { %2416 = vmatpush.bf16.msrb.mxu3 %v3879_v53 }
 0x1e9   :  { %v1837_v2 = vpack.c.bf16 %v1835_v1, %v1833_v0  ;;  %v3877_v0 = vld [vmem:[#allocation14 + $0x18] sm:$0xff]  ;;  %v3876_v1 = vld [vmem:[#allocation14 + $0x10] sm:$0xff] }
 0x1ea   :  { %2500 = vmatpush.bf16.msra.mxu0 %v3888_v12 }
 0x1eb   :  { %2058 = vmatmul.bf16.vlgmr.msra.gmra.mxu1 %v1837_v2  ;;  %2086 = vmatmul.bf16.vlgmr.msra.gmra.mxu3 %v1837_v2  ;;  %v3875_v2 = vld [vmem:[#allocation14 + $0x8] sm:$0xff] }
 0x1ec   :  { %2417 = vmatpush.bf16.msrb.mxu3 %v3878_v54 }
 0x1ee   :  { %2501 = vmatpush.bf16.msra.mxu0 %v3887_v6 }
 0x1f0   :  { %2418 = vmatpush.bf16.msrb.mxu3 %v3877_v0 }
 0x1f2   :  { %2502 = vmatpush.bf16.msra.mxu0 %v3886_v7 }
 0x1f4   :  { %2419 = vmatpush.bf16.msrb.mxu3 %v3876_v1 }
 0x1f6   :  { %2503 = vmatpush.bf16.msra.mxu0 %v3885_v16 }
 0x1f8   :  { %2420 = vmatpush.bf16.msrb.mxu3 %v3875_v2 }
 0x1fc   :  { %2421 = vmatpush.bf16.msrb.mxu3 %v3874_v5 }
 0x262   :  { %v2045_v17 = vpop.f32.mrf.mxu0 }
 0x263   :  { %v2046_v25 = vadd.f32 %v2045_v17, %v1872_v22  ;;  %v3884_v17 = vld [vmem:[#allocation16 + $0x10] sm:$0xff] }
 0x264   :  { %2504 = vmatpush.bf16.msra.mxu0 %v3884_v17 }
 0x268   :  { %v2059_v20 = vpop.f32.mrf.mxu1  ;;  %v2073_v21 = vpop.f32.mrf.mxu2  ;;  %2505 = vmatpush.bf16.msra.mxu0 %v3883_v18 }
 0x269   :  { %v2060_v27 = vadd.f32 %v2059_v20, %v2046_v25  ;;  %v2074_v35 = vadd.f32 %v2073_v21, %v1873_v28  ;;  %v3915_v21 = vld [vmem:[%s4383_s12] ss:$0 sm:$0xff] }
 0x26a   :  { %v2047_v24 = vpop.f32.mrf.mxu0 }
 0x26b   :  { %v2048_v29 = vadd.f32 %v2047_v24, %v1872_v22  ;;  %v2092_v33 = vmax.f32 %v2060_v27, 0.0 }
 0x26c   :  { %2506 = vmatpush.bf16.msra.mxu0 %v3882_v19 }
 0x26e   :  { %v2087_v26 = vpop.f32.mrf.mxu3 }
 0x26f   :  { %v2088_v37 = vadd.f32 %v2087_v26, %v2074_v35 }
 0x270   :  { %v2061_v30 = vpop.f32.mrf.mxu1  ;;  %v2075_v32 = vpop.f32.mrf.mxu2 }
 0x271   :  { %v2062_v31 = vadd.f32 %v2061_v30, %v2048_v29  ;;  %v2076_v40 = vadd.f32 %v2075_v32, %v1873_v28  ;;  %v2093_v43 = vmax.f32 %v2088_v37, 0.0  ;;  %v3916_v30 = vld [vmem:[%s4385_s14] ss:$0 sm:$0xff] }
 0x273   :  { %v2094_v36 = vmax.f32 %v2062_v31, 0.0 }
 0x275   :  { %v2096_v38 = vpack.c.bf16 %v2094_v36, %v2092_v33 }
 0x276   :  { %v2089_v41 = vpop.f32.mrf.mxu3 }
 0x277   :  { %v2090_v42 = vadd.f32 %v2089_v41, %v2076_v40  ;;  %2238 = vmatmul.bf16.vlgmr.msrb.gmra.mxu0 %v2096_v38 }
 0x279   :  { %v2095_v44 = vmax.f32 %v2090_v42, 0.0 }
 0x27b   :  { %v2097_v45 = vpack.c.bf16 %v2095_v44, %v2093_v43 }
 0x27d   :  { %2252 = vmatmul.bf16.vlgmr.msrb.gmra.mxu1 %v2097_v45 }
 0x2f4   :  { %v2239_v55 = vpop.f32.mrf.mxu0 }
 0x2f5   :  { %v2240_v4 = vadd.f32 %v3913_v34, %v2239_v55 }
 0x2fa   :  { %v2253_v56 = vpop.f32.mrf.mxu1 }
 0x2fb   :  { %v2254_v58 = vadd.f32 %v2253_v56, %v2240_v4 }
 0x2fc   :  { %v2241_v57 = vpop.f32.mrf.mxu0 }
 0x2fd   :  { %v2242_v60 = vadd.f32 %v3913_v34, %v2241_v57  ;;  %v2258_v62 = vmax.f32 %v2254_v58, 0.0 }
 0x302   :  { %v2255_v39 = vpop.f32.mrf.mxu1 }
 0x303   :  { %v2256_v61 = vadd.f32 %v2255_v39, %v2242_v60 }
 0x305   :  { %v2259_v63 = vmax.f32 %v2256_v61, 0.0 }
 0x307   :  { %v2260_v59 = vpack.c.bf16 %v2259_v63, %v2258_v62 }
 0x309   :  { %2337 = vmatmul.bf16.vlgmr.msrb.gmra.mxu2 %v2260_v59 }
 0x38c   :  { %v2338_v23 = vpop.f32.mrf.mxu2 }
 0x38d   :  { %v2339_v9 = vadd.f32 %v3914_v8, %v2338_v23 }
 0x38f   :  { %v2343_v13 = vmax.f32 %v2339_v9, 0.0 }
 0x394   :  { %v2340_v10 = vpop.f32.mrf.mxu2 }
 0x395   :  { %v2341_v11 = vadd.f32 %v3914_v8, %v2340_v10 }
 0x397   :  { %v2344_v14 = vmax.f32 %v2341_v11, 0.0 }
 0x399   :  { %v2345_v15 = vpack.c.bf16 %v2344_v14, %v2343_v13 }
 0x39b   :  { %2422 = vmatmul.bf16.vlgmr.msrb.gmra.mxu3 %v2345_v15 }
 0x41e   :  { %v2423_v20 = vpop.f32.mrf.mxu3 }
 0x41f   :  { %v2424_v22 = vadd.f32 %v3915_v21, %v2423_v20 }
 0x421   :  { %v2428_v26 = vmax.f32 %v2424_v22, 0.0 }
 0x426   :  { %v2425_v24 = vpop.f32.mrf.mxu3 }
 0x427   :  { %v2426_v25 = vadd.f32 %v3915_v21, %v2425_v24 }
 0x429   :  { %v2429_v27 = vmax.f32 %v2426_v25, 0.0 }
 0x42b   :  { %v2430_v28 = vpack.c.bf16 %v2429_v27, %v2428_v26 }
 0x42d   :  { %2507 = vmatmul.bf16.vlgmr.msra.gmra.mxu0 %v2430_v28 }
 0x4aa   :  { %v2508_v29 = vpop.f32.mrf.mxu0 }
 0x4ab   :  { %v2509_v32 = vadd.f32 %v3916_v30, %v2508_v29 }
 0x4b2   :  { %v2510_v31 = vpop.f32.mrf.mxu0 }
 0x4b3   :  { %v2511_v33 = vadd.f32 %v3916_v30, %v2510_v31 }
 0x4b5   :  { %v3893_v35 = vpack.c.bf16 %v2511_v33, %v2509_v32 }
 0x4b7   :  { %3894 = vst [vmem:[#allocation17] sm:$0xff] %v3893_v35  }
 0x4b8   :  { %2529 = dma.vmem_to_hbm [thread:$0]  %s2522_s27, 128, %s2524_s28, [#allocation4], %s4176_s23, %s4176_s23, %s4177_s24  }
 0x4b9   :  { %4167 = dma.done.wait [#allocation4], 128  }
 0x4ba   :  { %4168 = vsyncadd [#allocation4], 4294967168 }
 0x4bb   :  { %2534 = vsyncpa [#allocation3], 1 }
 0x4bc   :  { %2535 = vsyncpa [#allocation6], 1 }
 0x4bd   :  { %2536 = vsyncpa [#allocation9], 1 }
 0x4be   :  { %2537 = vsyncpa [#allocation12], 1 }
 0x4bf   :  { %2538 = vsyncpa [#allocation15], 1 }
 0x4c0   :  { %2539 = vsyncpa [#allocation4], 1 }

// kernel: tpu_custom_call.1
= control target key start
LH: loop header
LB: loop body
LE: loop exit
PB: predicated region body
PF: predicated region fallthrough
CT: control target
= control target key end

     0   :  { %20 = vsyncpa [#allocation3], 0  ;;  %s4371_s0 = inlined_call_operand.hbm [shape: bf16[16,768], index: 0, kind: input, shape index: {}]   ;;  %s4372_s1 = inlined_call_operand.hbm [shape: bf16[768,384], index: 1, kind: input, shape index: {}]   ;;  %s4373_s2 = inlined_call_operand.hbm [shape: f32[1,384], index: 2, kind: input, shape index: {}]   ;;  %s4374_s3 = inlined_call_operand.hbm [shape: bf16[384,256], index: 3, kind: input, shape index: {}]   ;;  %s4375_s4 = inlined_call_operand.vmem [shape: f32[1,256], index: 4, kind: input, shape index: {}]   ;;  %s4376_s5 = inlined_call_operand.hbm [shape: bf16[256,256], index: 5, kind: input, shape index: {}]   ;;  %s4377_s6 = inlined_call_operand.vmem [shape: f32[1,256], index: 6, kind: input, shape index: {}]   ;;  %s4378_s7 = inlined_call_operand.hbm [shape: bf16[256,128], index: 7, kind: input, shape index: {}]   ;;  %s4379_s8 = inlined_call_operand.vmem [shape: f32[1,128], index: 8, kind: input, shape index: {}]   ;;  %s4380_s9 = inlined_call_operand.hbm [shape: bf16[128,128], index: 9, kind: input, shape index: {}]   ;;  %s4381_s10 = inlined_call_operand.vmem [shape: f32[1,128], index: 10, kind: input, shape index: {}]   ;;  %s4382_s11 = inlined_call_operand.hbm [shape: bf16[128,128], index: 11, kind: input, shape index: {}]   ;;  %s4383_s12 = inlined_call_operand.vmem [shape: f32[1,128], index: 12, kind: input, shape index: {}]   ;;  %s4384_s13 = inlined_call_operand.hbm [shape: bf16[128,128], index: 13, kind: input, shape index: {}]   ;;  %s4385_s14 = inlined_call_operand.vmem [shape: f32[1,128], index: 14, kind: input, shape index: {}]   ;;  %s4386_s15 = inlined_call_operand.hbm [shape: bf16[16,128], index: 15, kind: output, shape index: {}]  }
   0x1   :  { %21 = vsyncpa [#allocation6], 0 }
   0x2   :  { %22 = vsyncpa [#allocation9], 0 }
   0x3   :  { %23 = vsyncpa [#allocation12], 0 }
   0x4   :  { %24 = vsyncpa [#allocation15], 0  ;;  %s43_s20 = sshll.u32 %s4372_s1, 4  ;;  %s44_s20 = int_to_ptr.hbm [resolvable:$true] %s43_s20 }
   0x5   :  { %25 = vsyncpa [#allocation4], 0  ;;  %s4169_s21 = smov [#allocation5]   ;;  %s67_s25 = sshll.u32 %s4374_s3, 4  ;;  %s68_s25 = int_to_ptr.hbm [resolvable:$true] %s67_s25 }
   0x6   :  { %s45_s22 = sshll.u32 %s4169_s21, 4  ;;  %s4170_s26 = smov 192   ;;  %s46_s22 = int_to_ptr.vmem [resolvable:$true] %s45_s22 }
   0x7   :  { %s4171_s27 = smov 12   ;;  %s4172_s28 = smov [#allocation8]  }
   0x8   :  { %51 = dma.hbm_to_vmem [thread:$0]  %s44_s20, 18432, %s46_s22, [#allocation6], %s4170_s26, %s4170_s26, %s4171_s27  }
   0x9   :  { %s69_s29 = sshll.u32 %s4172_s28, 4  ;;  %s4173_s30 = smov 128   ;;  %s70_s29 = int_to_ptr.vmem [resolvable:$true] %s69_s29 }
   0xa   :  { %s4174_s16 = smov 8   ;;  %s97_s18 = sshll.u32 %s4378_s7, 4  ;;  %s98_s18 = int_to_ptr.hbm [resolvable:$true] %s97_s18 }
   0xb   :  { %75 = dma.hbm_to_vmem [thread:$0]  %s68_s25, 6144, %s70_s29, [#allocation9], %s4173_s30, %s4173_s30, %s4174_s16  }
   0xc   :  { %s4175_s19 = smov [#allocation11]   ;;  %s127_s22 = sshll.u32 %s4382_s11, 4  ;;  %s128_s22 = int_to_ptr.hbm [resolvable:$true] %s127_s22 }
   0xd   :  { %s99_s3 = sshll.u32 %s4175_s19, 4  ;;  %s4176_s23 = smov 64   ;;  %s100_s3 = int_to_ptr.vmem [resolvable:$true] %s99_s3 }
   0xe   :  { %s4177_s24 = smov 4   ;;  %s4178_s25 = smov [#allocation14]  }
   0xf   :  { %105 = dma.hbm_to_vmem [thread:$0]  %s98_s18, 2048, %s100_s3, [#allocation12], %s4176_s23, %s4176_s23, %s4177_s24  }
  0x10   :  { %s129_s26 = sshll.u32 %s4178_s25, 4  ;;  %s30_s7 = sshll.u32 %s4371_s0, 4  ;;  %s130_s26 = int_to_ptr.vmem [resolvable:$true] %s129_s26  ;;  %s31_s7 = int_to_ptr.hbm [resolvable:$true] %s30_s7 }
  0x11   :  { %135 = dma.hbm_to_vmem [thread:$0]  %s128_s22, 1024, %s130_s26, [#allocation15], %s4176_s23, %s4176_s23, %s4177_s24  }
  0x12   :  { %s4179_s11 = smov [#allocation2]   ;;  %s57_s18 = sshll.u32 %s4373_s2, 4  ;;  %s58_s18 = int_to_ptr.hbm [resolvable:$true] %s57_s18 }
  0x13   :  { %s32_s29 = sshll.u32 %s4179_s11, 4  ;;  %s4180_s19 = smov 384   ;;  %s33_s29 = int_to_ptr.vmem [resolvable:$true] %s32_s29 }
  0x14   :  { %s4181_s3 = smov 24   ;;  %s4182_s21 = smov [#allocation7]  }
  0x15   :  { %38 = dma.hbm_to_vmem [thread:$0]  %s31_s7, 768, %s33_s29, [#allocation3], %s4180_s19, %s4180_s19, %s4181_s3  }
  0x16   :  { %s59_s20 = sshll.u32 %s4182_s21, 4  ;;  %s82_s27 = sshll.u32 %s4376_s5, 4  ;;  %s60_s20 = int_to_ptr.vmem [resolvable:$true] %s59_s20  ;;  %s83_s27 = int_to_ptr.hbm [resolvable:$true] %s82_s27 }
  0x17   :  { %62 = dma.hbm_to_vmem [thread:$0]  %s58_s18, 48, %s60_s20, [#allocation6]  }
  0x18   :  { %s112_s28 = sshll.u32 %s4380_s9, 4  ;;  %s4183_s11 = smov [#allocation10]   ;;  %s113_s28 = int_to_ptr.hbm [resolvable:$true] %s112_s28 }
  0x19   :  { %s84_s1 = sshll.u32 %s4183_s11, 4  ;;  %s4184_s2 = smov [#allocation13]   ;;  %s85_s1 = int_to_ptr.vmem [resolvable:$true] %s84_s1 }
  0x1a   :  { %90 = dma.hbm_to_vmem [thread:$0]  %s83_s27, 4096, %s85_s1, [#allocation9], %s4173_s30, %s4173_s30, %s4174_s16  }
  0x1b   :  { %s114_s7 = sshll.u32 %s4184_s2, 4  ;;  %s142_s5 = sshll.u32 %s4384_s13, 4  ;;  %s115_s7 = int_to_ptr.vmem [resolvable:$true] %s114_s7  ;;  %s143_s5 = int_to_ptr.hbm [resolvable:$true] %s142_s5 }
  0x1c   :  { %120 = dma.hbm_to_vmem [thread:$0]  %s113_s28, 1024, %s115_s7, [#allocation12], %s4176_s23, %s4176_s23, %s4177_s24  }
  0x1d   :  { %s4185_s9 = smov [#allocation16]  }
  0x1e   :  { %s144_s18 = sshll.u32 %s4185_s9, 4  ;;  %s145_s18 = int_to_ptr.vmem [resolvable:$true] %s144_s18 }
  0x1f   :  { %150 = dma.hbm_to_vmem [thread:$0]  %s143_s5, 1024, %s145_s18, [#allocation15], %s4176_s23, %s4176_s23, %s4177_s24  }
  0x20   :  { %4157 = dma.done.wait [#allocation3], 768  }
  0x21   :  { %4158 = vsyncadd [#allocation3], 4294966528 }
  0x22   :  { %4159 = dma.done.wait [#allocation6], 18480  }
  0x23   :  { %4160 = vsyncadd [#allocation6], 4294948816 }
  0x24   :  { %4161 = dma.done.wait [#allocation9], 10240  }
  0x25   :  { %4162 = vsyncadd [#allocation9], 4294957056 }
  0x26   :  { %4163 = dma.done.wait [#allocation12], 3072  }
  0x27   :  { %4164 = vsyncadd [#allocation12], 4294964224 }
  0x28   :  { %4165 = dma.done.wait [#allocation15], 2048  }
  0x29   :  { %4166 = vsyncadd [#allocation15], 4294965248  ;;  %v2650_v0 = vld [vmem:[#allocation5 + $0xa8] sm:$0xf]  ;;  %v3648_v1 = vld [vmem:[#allocation5 + $0xb0] sm:$0xf0] }
  0x2a   :  { %v2746_v2 = vld [vmem:[#allocation5 + $0x168] sm:$0xf]  ;;  %v2651_v3 = vor.u32 %v3648_v1, %v2650_v0  ;;  %v3672_v4 = vld [vmem:[#allocation5 + $0x170] sm:$0xf0]  ;;  %v2638_v11 = vld [vmem:[#allocation5 + $0x90] sm:$0xf] }
  0x2b   :  { %v2842_v5 = vld [vmem:[#allocation5 + $0x228] sm:$0xf]  ;;  %v3696_v6 = vld [vmem:[#allocation5 + $0x230] sm:$0xf0]  ;;  %v2747_v7 = vor.u32 %v3672_v4, %v2746_v2  ;;  %v3645_v13 = vld [vmem:[#allocation5 + $0x98] sm:$0xf0] }
  0x2c   :  { %v2843_v8 = vor.u32 %v3696_v6, %v2842_v5  ;;  %v2938_v9 = vld [vmem:[#allocation5 + $0x2e8] sm:$0xf]  ;;  %v3720_v10 = vld [vmem:[#allocation5 + $0x2f0] sm:$0xf0]  ;;  %1193 = vmatpush.bf16.msra.mxu0 %v2651_v3  ;;  %v2734_v14 = vld [vmem:[#allocation5 + $0x150] sm:$0xf]  ;;  %v2639_v16 = vor.u32 %v3645_v13, %v2638_v11 }
  0x2d   :  { %v2939_v12 = vor.u32 %v3720_v10, %v2938_v9  ;;  %v3669_v15 = vld [vmem:[#allocation5 + $0x158] sm:$0xf0]  ;;  %1207 = vmatpush.bf16.msra.mxu1 %v2747_v7  ;;  %v2830_v18 = vld [vmem:[#allocation5 + $0x210] sm:$0xf]  ;;  %v2626_v23 = vld [vmem:[#allocation5 + $0x78] sm:$0xf] }
  0x2e   :  { %1221 = vmatpush.bf16.msra.mxu2 %v2843_v8  ;;  %v2735_v17 = vor.u32 %v3669_v15, %v2734_v14  ;;  %v3693_v19 = vld [vmem:[#allocation5 + $0x218] sm:$0xf0]  ;;  %v2926_v20 = vld [vmem:[#allocation5 + $0x2d0] sm:$0xf]  ;;  %v3642_v24 = vld [vmem:[#allocation5 + $0x80] sm:$0xf0] }
  0x2f   :  { %1235 = vmatpush.bf16.msra.mxu3 %v2939_v12  ;;  %v2831_v21 = vor.u32 %v3693_v19, %v2830_v18  ;;  %v3717_v22 = vld [vmem:[#allocation5 + $0x2d8] sm:$0xf0]  ;;  %v2722_v26 = vld [vmem:[#allocation5 + $0x138] sm:$0xf]  ;;  %v3666_v27 = vld [vmem:[#allocation5 + $0x140] sm:$0xf0]  ;;  %v2627_v29 = vor.u32 %v3642_v24, %v2626_v23 }
  0x30   :  { %v2927_v25 = vor.u32 %v3717_v22, %v2926_v20  ;;  %v2818_v28 = vld [vmem:[#allocation5 + $0x1f8] sm:$0xf]  ;;  %1194 = vmatpush.bf16.msra.mxu0 %v2639_v16  ;;  %v3690_v30 = vld [vmem:[#allocation5 + $0x200] sm:$0xf0]  ;;  %v2723_v33 = vor.u32 %v3666_v27, %v2722_v26  ;;  %v2614_v35 = vld [vmem:[#allocation5 + $0x60] sm:$0xf] }
  0x31   :  { %v2914_v31 = vld [vmem:[#allocation5 + $0x2b8] sm:$0xf]  ;;  %v3714_v32 = vld [vmem:[#allocation5 + $0x2c0] sm:$0xf0]  ;;  %1208 = vmatpush.bf16.msra.mxu1 %v2735_v17  ;;  %v2819_v34 = vor.u32 %v3690_v30, %v2818_v28  ;;  %v3639_v36 = vld [vmem:[#allocation5 + $0x68] sm:$0xf0] }
  0x32   :  { %1222 = vmatpush.bf16.msra.mxu2 %v2831_v21  ;;  %v2710_v37 = vld [vmem:[#allocation5 + $0x120] sm:$0xf]  ;;  %v2915_v38 = vor.u32 %v3714_v32, %v2914_v31  ;;  %v3663_v39 = vld [vmem:[#allocation5 + $0x128] sm:$0xf0]  ;;  %v2615_v44 = vor.u32 %v3639_v36, %v2614_v35  ;;  %v2602_v47 = vld [vmem:[#allocation5 + $0x48] sm:$0xf] }
  0x33   :  { %1236 = vmatpush.bf16.msra.mxu3 %v2927_v25  ;;  %v2806_v40 = vld [vmem:[#allocation5 + $0x1e0] sm:$0xf]  ;;  %v3687_v41 = vld [vmem:[#allocation5 + $0x1e8] sm:$0xf0]  ;;  %v2711_v45 = vor.u32 %v3663_v39, %v2710_v37  ;;  %v3636_v48 = vld [vmem:[#allocation5 + $0x50] sm:$0xf0] }
  0x34   :  { %v2902_v42 = vld [vmem:[#allocation5 + $0x2a0] sm:$0xf]  ;;  %v3711_v43 = vld [vmem:[#allocation5 + $0x2a8] sm:$0xf0]  ;;  %1195 = vmatpush.bf16.msra.mxu0 %v2627_v29  ;;  %v2807_v46 = vor.u32 %v3687_v41, %v2806_v40  ;;  %v2698_v49 = vld [vmem:[#allocation5 + $0x108] sm:$0xf]  ;;  %v2603_v56 = vor.u32 %v3636_v48, %v2602_v47 }
  0x35   :  { %1209 = vmatpush.bf16.msra.mxu1 %v2723_v33  ;;  %v2903_v50 = vor.u32 %v3711_v43, %v2902_v42  ;;  %v3660_v51 = vld [vmem:[#allocation5 + $0x110] sm:$0xf0]  ;;  %v2794_v52 = vld [vmem:[#allocation5 + $0x1c8] sm:$0xf]  ;;  %v2590_v59 = vld [vmem:[#allocation5 + $0x30] sm:$0xf] }
  0x36   :  { %1223 = vmatpush.bf16.msra.mxu2 %v2819_v34  ;;  %v3684_v53 = vld [vmem:[#allocation5 + $0x1d0] sm:$0xf0]  ;;  %v2890_v54 = vld [vmem:[#allocation5 + $0x288] sm:$0xf]  ;;  %v2699_v57 = vor.u32 %v3660_v51, %v2698_v49  ;;  %v3633_v60 = vld [vmem:[#allocation5 + $0x38] sm:$0xf0] }
  0x37   :  { %1237 = vmatpush.bf16.msra.mxu3 %v2915_v38  ;;  %v3708_v55 = vld [vmem:[#allocation5 + $0x290] sm:$0xf0]  ;;  %v2795_v58 = vor.u32 %v3684_v53, %v2794_v52  ;;  %v2686_v61 = vld [vmem:[#allocation5 + $0xf0] sm:$0xf]  ;;  %v3657_v63 = vld [vmem:[#allocation5 + $0xf8] sm:$0xf0]  ;;  %v2591_v4 = vor.u32 %v3633_v60, %v2590_v59 }
  0x38   :  { %1196 = vmatpush.bf16.msra.mxu0 %v2615_v44  ;;  %v2891_v62 = vor.u32 %v3708_v55, %v2890_v54  ;;  %v2782_v0 = vld [vmem:[#allocation5 + $0x1b0] sm:$0xf]  ;;  %v3681_v1 = vld [vmem:[#allocation5 + $0x1b8] sm:$0xf0]  ;;  %v2687_v5 = vor.u32 %v3657_v63, %v2686_v61  ;;  %v2578_v7 = vld [vmem:[#allocation5 + $0x18] sm:$0xf] }
  0x39   :  { %1210 = vmatpush.bf16.msra.mxu1 %v2711_v45  ;;  %v2878_v2 = vld [vmem:[#allocation5 + $0x270] sm:$0xf]  ;;  %v3705_v3 = vld [vmem:[#allocation5 + $0x278] sm:$0xf0]  ;;  %v2783_v6 = vor.u32 %v3681_v1, %v2782_v0  ;;  %v3630_v8 = vld [vmem:[#allocation5 + $0x20] sm:$0xf0] }
  0x3a   :  { %1224 = vmatpush.bf16.msra.mxu2 %v2807_v46  ;;  %v2674_v9 = vld [vmem:[#allocation5 + $0xd8] sm:$0xf]  ;;  %v2879_v10 = vor.u32 %v3705_v3, %v2878_v2  ;;  %v3654_v11 = vld [vmem:[#allocation5 + $0xe0] sm:$0xf0]  ;;  %v2579_v16 = vor.u32 %v3630_v8, %v2578_v7  ;;  %v2566_v17 = vld [vmem:[#allocation5] sm:$0xf] }
  0x3b   :  { %1238 = vmatpush.bf16.msra.mxu3 %v2903_v50  ;;  %v2770_v12 = vld [vmem:[#allocation5 + $0x198] sm:$0xf]  ;;  %v3678_v13 = vld [vmem:[#allocation5 + $0x1a0] sm:$0xf0]  ;;  %v3627_v18 = vld [vmem:[#allocation5 + $0x8] sm:$0xf0]  ;;  %v2675_v19 = vor.u32 %v3654_v11, %v2674_v9 }
  0x3c   :  { %1197 = vmatpush.bf16.msra.mxu0 %v2603_v56  ;;  %v2866_v14 = vld [vmem:[#allocation5 + $0x258] sm:$0xf]  ;;  %v3702_v15 = vld [vmem:[#allocation5 + $0x260] sm:$0xf0]  ;;  %v2771_v20 = vor.u32 %v3678_v13, %v2770_v12  ;;  %v2662_v21 = vld [vmem:[#allocation5 + $0xc0] sm:$0xf]  ;;  %v2567_v31 = vor.u32 %v3627_v18, %v2566_v17 }
  0x3d   :  { %1211 = vmatpush.bf16.msra.mxu1 %v2699_v57  ;;  %v3651_v22 = vld [vmem:[#allocation5 + $0xc8] sm:$0xf0]  ;;  %v2758_v23 = vld [vmem:[#allocation5 + $0x180] sm:$0xf]  ;;  %v2867_v24 = vor.u32 %v3702_v15, %v2866_v14  ;;  %v3034_v26 = vld [vmem:[#allocation5 + $0x3a8] sm:$0xf] }
  0x3e   :  { %1225 = vmatpush.bf16.msra.mxu2 %v2795_v58  ;;  %v3675_v25 = vld [vmem:[#allocation5 + $0x188] sm:$0xf0]  ;;  %v3744_v27 = vld [vmem:[#allocation5 + $0x3b0] sm:$0xf0]  ;;  %v3130_v28 = vld [vmem:[#allocation5 + $0x468] sm:$0xf]  ;;  %v2663_v35 = vor.u32 %v3651_v22, %v2662_v21 }
  0x3f   :  { %1239 = vmatpush.bf16.msra.mxu3 %v2891_v62  ;;  %v3768_v29 = vld [vmem:[#allocation5 + $0x470] sm:$0xf0]  ;;  %v3647_v30 = vld [vmem:[#allocation5 + $0xac] sm:$0xf]  ;;  %v2652_v32 = vld [vmem:[#allocation5 + $0xb4] sm:$0xf0]  ;;  %v2759_v36 = vor.u32 %v3675_v25, %v2758_v23  ;;  %v3035_v39 = vor.u32 %v3744_v27, %v3034_v26 }
  0x40   :  { %1198 = vmatpush.bf16.msra.mxu0 %v2591_v4  ;;  %v2854_v33 = vld [vmem:[#allocation5 + $0x240] sm:$0xf]  ;;  %v3699_v34 = vld [vmem:[#allocation5 + $0x248] sm:$0xf0]  ;;  %v2748_v38 = vld [vmem:[#allocation5 + $0x174] sm:$0xf0]  ;;  %v3131_v40 = vor.u32 %v3768_v29, %v3130_v28  ;;  %v2655_v42 = vor.u32 %v3647_v30, %v2652_v32 }
  0x41   :  { %1212 = vmatpush.bf16.msra.mxu1 %v2687_v5  ;;  %v3671_v37 = vld [vmem:[#allocation5 + $0x16c] sm:$0xf]  ;;  %v3022_v41 = vld [vmem:[#allocation5 + $0x390] sm:$0xf]  ;;  %v2855_v43 = vor.u32 %v3699_v34, %v2854_v33  ;;  %v3741_v44 = vld [vmem:[#allocation5 + $0x398] sm:$0xf0] }
  0x42   :  { %1226 = vmatpush.bf16.msra.mxu2 %v2783_v6  ;;  %v3118_v45 = vld [vmem:[#allocation5 + $0x450] sm:$0xf]  ;;  %v3765_v46 = vld [vmem:[#allocation5 + $0x458] sm:$0xf0]  ;;  %v2751_v47 = vor.u32 %v3671_v37, %v2748_v38  ;;  %v3644_v48 = vld [vmem:[#allocation5 + $0x94] sm:$0xf]  ;;  %v3023_v54 = vor.u32 %v3741_v44, %v3022_v41 }
  0x43   :  { %1240 = vmatpush.bf16.msra.mxu3 %v2879_v10  ;;  %v2640_v49 = vld [vmem:[#allocation5 + $0x9c] sm:$0xf0]  ;;  %v3668_v50 = vld [vmem:[#allocation5 + $0x154] sm:$0xf]  ;;  %v2542_v52 = vld [vmem:[#allocation2] sm:$0xf]  ;;  %v3119_v55 = vor.u32 %v3765_v46, %v3118_v45 }
  0x44   :  { %1199 = vmatpush.bf16.msra.mxu0 %v2579_v16  ;;  %v2736_v51 = vld [vmem:[#allocation5 + $0x15c] sm:$0xf0]  ;;  %v3623_v53 = vld [vmem:[#allocation2 + $0x14] sm:$0xf0]  ;;  %v3010_v56 = vld [vmem:[#allocation5 + $0x378] sm:$0xf]  ;;  %v2643_v60 = vor.u32 %v3644_v48, %v2640_v49 }
  0x45   :  { %1213 = vmatpush.bf16.msra.mxu1 %v2675_v19  ;;  %v3738_v57 = vld [vmem:[#allocation5 + $0x380] sm:$0xf0]  ;;  %v3106_v58 = vld [vmem:[#allocation5 + $0x438] sm:$0xf]  ;;  %v4312_v59 = vor.u32 %v3623_v53, %v2542_v52  ;;  %v3641_v62 = vld [vmem:[#allocation5 + $0x7c] sm:$0xf]  ;;  %v2739_v0 = vor.u32 %v3668_v50, %v2736_v51 }
  0x46   :  { %1227 = vmatpush.bf16.msra.mxu2 %v2771_v20  ;;  %v3762_v61 = vld [vmem:[#allocation5 + $0x440] sm:$0xf0]  ;;  %v3620_v63 = vld [vmem:[#allocation2 + $0x4] sm:$0xf]  ;;  %v2628_v1 = vld [vmem:[#allocation5 + $0x84] sm:$0xf0]  ;;  %v3011_v8 = vor.u32 %v3738_v57, %v3010_v56 }
  0x47   :  { %1241 = vmatpush.bf16.msra.mxu3 %v2867_v24  ;;  %v3665_v2 = vld [vmem:[#allocation5 + $0x13c] sm:$0xf]  ;;  %v2544_v3 = vld [vmem:[#allocation2 + $0x18] sm:$0xf0]  ;;  %v2724_v4 = vld [vmem:[#allocation5 + $0x144] sm:$0xf0]  ;;  %v3107_v9 = vor.u32 %v3762_v61, %v3106_v58  ;;  %v2631_v13 = vor.u32 %v3641_v62, %v2628_v1 }
  0x48   :  { %1200 = vmatpush.bf16.msra.mxu0 %v2567_v31  ;;  %v4315_v5 = vor.u32 %v3620_v63, %v2544_v3  ;;  %v2550_v6 = vld [vmem:[#allocation2 + $0x8] sm:$0xf]  ;;  %v3624_v7 = vld [vmem:[#allocation2 + $0x1c] sm:$0xf0]  ;;  %v2998_v10 = vld [vmem:[#allocation5 + $0x360] sm:$0xf]  ;;  %v2727_v17 = vor.u32 %v3665_v2, %v2724_v4 }
  0x49   :  { %1214 = vmatpush.bf16.msra.mxu1 %v2663_v35  ;;  %v3735_v11 = vld [vmem:[#allocation5 + $0x368] sm:$0xf0]  ;;  %v4317_v12 = vor.u32 %v3624_v7, %v2550_v6  ;;  %v3094_v14 = vld [vmem:[#allocation5 + $0x420] sm:$0xf]  ;;  %v3621_v16 = vld [vmem:[#allocation2 + $0xc] sm:$0xf] }
  0x4a   :  { %1228 = vmatpush.bf16.msra.mxu2 %v2759_v36  ;;  %v3759_v15 = vld [vmem:[#allocation5 + $0x428] sm:$0xf0]  ;;  %v3638_v18 = vld [vmem:[#allocation5 + $0x64] sm:$0xf]  ;;  %v2616_v19 = vld [vmem:[#allocation5 + $0x6c] sm:$0xf0]  ;;  %v2999_v24 = vor.u32 %v3735_v11, %v2998_v10 }
  0x4b   :  { %1242 = vmatpush.bf16.msra.mxu3 %v2855_v43  ;;  %1201 = vmatmul.bf16.vlgmr.msra.gmra.mxu0 %v4312_v59  ;;  %v2552_v20 = vld [vmem:[#allocation2 + $0x20] sm:$0xf0]  ;;  %v3662_v21 = vld [vmem:[#allocation5 + $0x124] sm:$0xf]  ;;  %v2712_v22 = vld [vmem:[#allocation5 + $0x12c] sm:$0xf0]  ;;  %v3095_v25 = vor.u32 %v3759_v15, %v3094_v14  ;;  %v2619_v27 = vor.u32 %v3638_v18, %v2616_v19 }
  0x4c   :  { %1249 = vmatpush.bf16.msrb.mxu0 %v3035_v39  ;;  %1215 = vmatmul.bf16.vlgmr.msra.gmra.mxu1 %v4315_v5  ;;  %v4321_v23 = vor.u32 %v3621_v16, %v2552_v20  ;;  %v2986_v26 = vld [vmem:[#allocation5 + $0x348] sm:$0xf]  ;;  %v3732_v28 = vld [vmem:[#allocation5 + $0x350] sm:$0xf0]  ;;  %v2715_v31 = vor.u32 %v3662_v21, %v2712_v22  ;;  %v3635_v32 = vld [vmem:[#allocation5 + $0x4c] sm:$0xf] }
  0x4d   :  { %1263 = vmatpush.bf16.msrb.mxu1 %v3131_v40  ;;  %1229 = vmatmul.bf16.vlgmr.msra.gmra.mxu2 %v4317_v12  ;;  %v3082_v29 = vld [vmem:[#allocation5 + $0x408] sm:$0xf]  ;;  %v3756_v30 = vld [vmem:[#allocation5 + $0x410] sm:$0xf0]  ;;  %v2604_v33 = vld [vmem:[#allocation5 + $0x54] sm:$0xf0]  ;;  %v2987_v36 = vor.u32 %v3732_v28, %v2986_v26 }
  0x4e   :  { %1277 = vmatpush.bf16.msrb.mxu2 %v2655_v42  ;;  %1243 = vmatmul.bf16.vlgmr.msra.gmra.mxu3 %v4321_v23  ;;  %v3659_v34 = vld [vmem:[#allocation5 + $0x10c] sm:$0xf]  ;;  %v2700_v35 = vld [vmem:[#allocation5 + $0x114] sm:$0xf0]  ;;  %v3083_v37 = vor.u32 %v3756_v30, %v3082_v29  ;;  %v2974_v38 = vld [vmem:[#allocation5 + $0x330] sm:$0xf]  ;;  %v2607_v39 = vor.u32 %v3635_v32, %v2604_v33 }
  0x4f   :  { %1291 = vmatpush.bf16.msrb.mxu3 %v2751_v47  ;;  %v3729_v40 = vld [vmem:[#allocation5 + $0x338] sm:$0xf0]  ;;  %v3070_v41 = vld [vmem:[#allocation5 + $0x3f0] sm:$0xf]  ;;  %v2703_v43 = vor.u32 %v3659_v34, %v2700_v35  ;;  %v3632_v44 = vld [vmem:[#allocation5 + $0x34] sm:$0xf] }
  0x50   :  { %1250 = vmatpush.bf16.msrb.mxu0 %v3023_v54  ;;  %v3753_v42 = vld [vmem:[#allocation5 + $0x3f8] sm:$0xf0]  ;;  %v2592_v45 = vld [vmem:[#allocation5 + $0x3c] sm:$0xf0]  ;;  %v3656_v46 = vld [vmem:[#allocation5 + $0xf4] sm:$0xf]  ;;  %v2975_v48 = vor.u32 %v3729_v40, %v2974_v38 }
  0x51   :  { %1264 = vmatpush.bf16.msrb.mxu1 %v3119_v55  ;;  %v2688_v47 = vld [vmem:[#allocation5 + $0xfc] sm:$0xf0]  ;;  %v3071_v49 = vor.u32 %v3753_v42, %v3070_v41  ;;  %v2962_v50 = vld [vmem:[#allocation5 + $0x318] sm:$0xf]  ;;  %v2595_v51 = vor.u32 %v3632_v44, %v2592_v45  ;;  %v3726_v52 = vld [vmem:[#allocation5 + $0x320] sm:$0xf0] }
  0x52   :  { %1278 = vmatpush.bf16.msrb.mxu2 %v2643_v60  ;;  %v3058_v53 = vld [vmem:[#allocation5 + $0x3d8] sm:$0xf]  ;;  %v3750_v54 = vld [vmem:[#allocation5 + $0x3e0] sm:$0xf0]  ;;  %v2691_v55 = vor.u32 %v3656_v46, %v2688_v47  ;;  %v3629_v56 = vld [vmem:[#allocation5 + $0x1c] sm:$0xf]  ;;  %v2963_v63 = vor.u32 %v3726_v52, %v2962_v50 }
  0x53   :  { %1292 = vmatpush.bf16.msrb.mxu3 %v2739_v0  ;;  %v2580_v57 = vld [vmem:[#allocation5 + $0x24] sm:$0xf0]  ;;  %v3653_v58 = vld [vmem:[#allocation5 + $0xdc] sm:$0xf]  ;;  %v2950_v61 = vld [vmem:[#allocation5 + $0x300] sm:$0xf]  ;;  %v3059_v0 = vor.u32 %v3750_v54, %v3058_v53 }
  0x54   :  { %1251 = vmatpush.bf16.msrb.mxu0 %v3011_v8  ;;  %v2676_v60 = vld [vmem:[#allocation5 + $0xe4] sm:$0xf0]  ;;  %v3723_v62 = vld [vmem:[#allocation5 + $0x308] sm:$0xf0]  ;;  %v3046_v1 = vld [vmem:[#allocation5 + $0x3c0] sm:$0xf]  ;;  %v2583_v4 = vor.u32 %v3629_v56, %v2580_v57 }
  0x55   :  { %1265 = vmatpush.bf16.msrb.mxu1 %v3107_v9  ;;  %v3747_v2 = vld [vmem:[#allocation5 + $0x3c8] sm:$0xf0]  ;;  %v3626_v3 = vld [vmem:[#allocation5 + $0x4] sm:$0xf]  ;;  %v2568_v6 = vld [vmem:[#allocation5 + $0xc] sm:$0xf0]  ;;  %v2679_v9 = vor.u32 %v3653_v58, %v2676_v60 }
  0x56   :  { %1279 = vmatpush.bf16.msrb.mxu2 %v2631_v13  ;;  %v3695_v7 = vld [vmem:[#allocation5 + $0x22c] sm:$0xf]  ;;  %v2844_v8 = vld [vmem:[#allocation5 + $0x234] sm:$0xf0]  ;;  %v3650_v15 = vld [vmem:[#allocation5 + $0xc4] sm:$0xf]  ;;  %v3047_v18 = vor.u32 %v3747_v2, %v3046_v1  ;;  %v2571_v22 = vor.u32 %v3626_v3, %v2568_v6 }
  0x57   :  { %1293 = vmatpush.bf16.msrb.mxu3 %v2727_v17  ;;  %v3719_v10 = vld [vmem:[#allocation5 + $0x2ec] sm:$0xf]  ;;  %v2940_v11 = vld [vmem:[#allocation5 + $0x2f4] sm:$0xf0]  ;;  %v2664_v16 = vld [vmem:[#allocation5 + $0xcc] sm:$0xf0]  ;;  %v2951_v17 = vor.u32 %v3723_v62, %v2950_v61 }
  0x58   :  { %1252 = vmatpush.bf16.msrb.mxu0 %v2999_v24  ;;  %v3743_v13 = vld [vmem:[#allocation5 + $0x3ac] sm:$0xf]  ;;  %v3036_v14 = vld [vmem:[#allocation5 + $0x3b4] sm:$0xf0]  ;;  %v2558_v19 = vld [vmem:[#allocation2 + $0x10] sm:$0xf]  ;;  %v2847_v24 = vor.u32 %v3695_v7, %v2844_v8  ;;  %v2943_v28 = vor.u32 %v3719_v10, %v2940_v11  ;;  %v2667_v33 = vor.u32 %v3650_v15, %v2664_v16 }
  0x59   :  { %1266 = vmatpush.bf16.msrb.mxu1 %v3095_v25  ;;  %v3625_v20 = vld [vmem:[#allocation2 + $0x24] sm:$0xf0]  ;;  %v3767_v21 = vld [vmem:[#allocation5 + $0x46c] sm:$0xf]  ;;  %v3622_v26 = vld [vmem:[#allocation2 + $0x14] sm:$0xf]  ;;  %v3039_v29 = vor.u32 %v3743_v13, %v3036_v14 }
  0x5a   :  { %1280 = vmatpush.bf16.msrb.mxu2 %v2619_v27  ;;  %v3132_v25 = vld [vmem:[#allocation5 + $0x474] sm:$0xf0]  ;;  %v2560_v27 = vld [vmem:[#allocation2 + $0x28] sm:$0xf0]  ;;  %v3692_v30 = vld [vmem:[#allocation5 + $0x214] sm:$0xf]  ;;  %v4324_v34 = vor.u32 %v3625_v20, %v2558_v19 }
  0x5b   :  { %1294 = vmatpush.bf16.msrb.mxu3 %v2715_v31  ;;  %v2832_v31 = vld [vmem:[#allocation5 + $0x21c] sm:$0xf0]  ;;  %v3716_v32 = vld [vmem:[#allocation5 + $0x2d4] sm:$0xf]  ;;  %v3135_v38 = vor.u32 %v3767_v21, %v3132_v25  ;;  %v3689_v45 = vld [vmem:[#allocation5 + $0x1fc] sm:$0xf] }
  0x5c   :  { %1253 = vmatpush.bf16.msrb.mxu0 %v2987_v36  ;;  %v2928_v35 = vld [vmem:[#allocation5 + $0x2dc] sm:$0xf0]  ;;  %v3740_v36 = vld [vmem:[#allocation5 + $0x394] sm:$0xf]  ;;  %v2835_v40 = vor.u32 %v3692_v30, %v2832_v31  ;;  %v2820_v46 = vld [vmem:[#allocation5 + $0x204] sm:$0xf0] }
  0x5d   :  { %1267 = vmatpush.bf16.msrb.mxu1 %v3083_v37  ;;  %v3024_v37 = vld [vmem:[#allocation5 + $0x39c] sm:$0xf0]  ;;  %v3764_v41 = vld [vmem:[#allocation5 + $0x454] sm:$0xf]  ;;  %v3713_v47 = vld [vmem:[#allocation5 + $0x2bc] sm:$0xf]  ;;  %v2823_v52 = vor.u32 %v3689_v45, %v2820_v46 }
  0x5e   :  { %1281 = vmatpush.bf16.msrb.mxu2 %v2607_v39  ;;  %v4326_v39 = vor.u32 %v3622_v26, %v2560_v27  ;;  %v3120_v42 = vld [vmem:[#allocation5 + $0x45c] sm:$0xf0]  ;;  %v3027_v44 = vor.u32 %v3740_v36, %v3024_v37  ;;  %v3012_v50 = vld [vmem:[#allocation5 + $0x384] sm:$0xf0]  ;;  %v3761_v53 = vld [vmem:[#allocation5 + $0x43c] sm:$0xf] }
  0x5f   :  { %1295 = vmatpush.bf16.msrb.mxu3 %v2703_v43  ;;  %v2931_v43 = vor.u32 %v3716_v32, %v2928_v35  ;;  %v3108_v54 = vld [vmem:[#allocation5 + $0x444] sm:$0xf0]  ;;  %v3686_v57 = vld [vmem:[#allocation5 + $0x1e4] sm:$0xf]  ;;  %v2808_v58 = vld [vmem:[#allocation5 + $0x1ec] sm:$0xf0] }
  0x60   :  { %1254 = vmatpush.bf16.msrb.mxu0 %v2975_v48  ;;  %v2916_v48 = vld [vmem:[#allocation5 + $0x2c4] sm:$0xf0]  ;;  %v3710_v60 = vld [vmem:[#allocation5 + $0x2a4] sm:$0xf]  ;;  %v2904_v61 = vld [vmem:[#allocation5 + $0x2ac] sm:$0xf0]  ;;  %v2811_v1 = vor.u32 %v3686_v57, %v2808_v58 }
  0x61   :  { %1268 = vmatpush.bf16.msrb.mxu1 %v3071_v49  ;;  %v3737_v49 = vld [vmem:[#allocation5 + $0x37c] sm:$0xf]  ;;  %v3734_v62 = vld [vmem:[#allocation5 + $0x364] sm:$0xf]  ;;  %v3096_v3 = vld [vmem:[#allocation5 + $0x42c] sm:$0xf0] }
  0x62   :  { %1282 = vmatpush.bf16.msrb.mxu2 %v2595_v51  ;;  %v3123_v51 = vor.u32 %v3764_v41, %v3120_v42  ;;  %v3015_v56 = vor.u32 %v3737_v49, %v3012_v50  ;;  %v3758_v2 = vld [vmem:[#allocation5 + $0x424] sm:$0xf]  ;;  %v3683_v7 = vld [vmem:[#allocation5 + $0x1cc] sm:$0xf]  ;;  %v2796_v8 = vld [vmem:[#allocation5 + $0x1d4] sm:$0xf0] }
  0x63   :  { %1296 = vmatpush.bf16.msrb.mxu3 %v2691_v55  ;;  %v2919_v55 = vor.u32 %v3713_v47, %v2916_v48  ;;  %v2892_v10 = vld [vmem:[#allocation5 + $0x294] sm:$0xf0]  ;;  %v3731_v11 = vld [vmem:[#allocation5 + $0x34c] sm:$0xf]  ;;  %v3099_v14 = vor.u32 %v3758_v2, %v3096_v3  ;;  %v2799_v15 = vor.u32 %v3683_v7, %v2796_v8  ;;  %v3680_v20 = vld [vmem:[#allocation5 + $0x1b4] sm:$0xf] }
  0x64   :  { %1255 = vmatpush.bf16.msrb.mxu0 %v2963_v63  ;;  %v3000_v63 = vld [vmem:[#allocation5 + $0x36c] sm:$0xf0]  ;;  %v2988_v13 = vld [vmem:[#allocation5 + $0x354] sm:$0xf0]  ;;  %v3755_v16 = vld [vmem:[#allocation5 + $0x40c] sm:$0xf] }
  0x65   :  { %1269 = vmatpush.bf16.msrb.mxu1 %v3059_v0  ;;  %v3111_v0 = vor.u32 %v3761_v53, %v3108_v54  ;;  %v3003_v6 = vor.u32 %v3734_v62, %v3000_v63  ;;  %v2991_v19 = vor.u32 %v3731_v11, %v2988_v13  ;;  %v2784_v21 = vld [vmem:[#allocation5 + $0x1bc] sm:$0xf0]  ;;  %v3728_v25 = vld [vmem:[#allocation5 + $0x334] sm:$0xf]  ;;  %v2772_v35 = vld [vmem:[#allocation5 + $0x1a4] sm:$0xf0] }
  0x66   :  { %1283 = vmatpush.bf16.msrb.mxu2 %v2583_v4  ;;  %v2907_v4 = vor.u32 %v3710_v60, %v2904_v61  ;;  %v2976_v26 = vld [vmem:[#allocation5 + $0x33c] sm:$0xf0]  ;;  %v3701_v36 = vld [vmem:[#allocation5 + $0x25c] sm:$0xf]  ;;  %v2868_v37 = vld [vmem:[#allocation5 + $0x264] sm:$0xf0] }
  0x67   :  { %1297 = vmatpush.bf16.msrb.mxu3 %v2679_v9  ;;  %v3707_v9 = vld [vmem:[#allocation5 + $0x28c] sm:$0xf]  ;;  %v3072_v30 = vld [vmem:[#allocation5 + $0x3fc] sm:$0xf0]  ;;  %v2979_v32 = vor.u32 %v3728_v25, %v2976_v26  ;;  %v3749_v42 = vld [vmem:[#allocation5 + $0x3dc] sm:$0xf]  ;;  %v2871_v47 = vor.u32 %v3701_v36, %v2868_v37 }
  0x68   :  { %1256 = vmatpush.bf16.msrb.mxu0 %v2951_v17  ;;  %v3084_v17 = vld [vmem:[#allocation5 + $0x414] sm:$0xf0]  ;;  %v3674_v45 = vld [vmem:[#allocation5 + $0x184] sm:$0xf]  ;;  %v2760_v46 = vld [vmem:[#allocation5 + $0x18c] sm:$0xf0] }
  0x69   :  { %1270 = vmatpush.bf16.msrb.mxu1 %v3047_v18  ;;  %v2895_v18 = vor.u32 %v3707_v9, %v2892_v10  ;;  %v3087_v27 = vor.u32 %v3755_v16, %v3084_v17  ;;  %v3698_v49 = vld [vmem:[#allocation5 + $0x244] sm:$0xf]  ;;  %v2856_v50 = vld [vmem:[#allocation5 + $0x24c] sm:$0xf0]  ;;  %v3649_v54 = vld [vmem:[#allocation5 + $0xb8] sm:$0xf0]  ;;  %v2763_v60 = vor.u32 %v3674_v45, %v2760_v46 }
  0x6a   :  { %1284 = vmatpush.bf16.msrb.mxu2 %v2571_v22  ;;  %v3704_v22 = vld [vmem:[#allocation5 + $0x274] sm:$0xf]  ;;  %v2658_v53 = vld [vmem:[#allocation5 + $0xb0] sm:$0xf]  ;;  %v3673_v57 = vld [vmem:[#allocation5 + $0x178] sm:$0xf0] }
  0x6b   :  { %1298 = vmatpush.bf16.msrb.mxu3 %v2667_v33  ;;  %1257 = vmatmul.bf16.vlgmr.msrb.gmra.mxu0 %v4324_v34  ;;  %v3677_v33 = vld [vmem:[#allocation5 + $0x19c] sm:$0xf]  ;;  %v3746_v58 = vld [vmem:[#allocation5 + $0x3c4] sm:$0xf]  ;;  %v3048_v61 = vld [vmem:[#allocation5 + $0x3cc] sm:$0xf0]  ;;  %v2659_v2 = vor.u32 %v3649_v54, %v2658_v53 }
  0x6c   :  { %1305 = vmatpush.bf16.msra.mxu0 %v2847_v24  ;;  %1271 = vmatmul.bf16.vlgmr.msrb.gmra.mxu1 %v4326_v39  ;;  %v2880_v24 = vld [vmem:[#allocation5 + $0x27c] sm:$0xf0]  ;;  %v2850_v62 = vld [vmem:[#allocation5 + $0x230] sm:$0xf]  ;;  %v3697_v63 = vld [vmem:[#allocation5 + $0x238] sm:$0xf0]  ;;  %v3051_v8 = vor.u32 %v3746_v58, %v3048_v61 }
  0x6d   :  { %1319 = vmatpush.bf16.msra.mxu1 %v2943_v28  ;;  %1285 = vmatmul.bf16.vlgmr.msrb.gmra.mxu2 %v4312_v59  ;;  %v2787_v28 = vor.u32 %v3680_v20, %v2784_v21  ;;  %v2883_v31 = vor.u32 %v3704_v22, %v2880_v24  ;;  %v3721_v7 = vld [vmem:[#allocation5 + $0x2f8] sm:$0xf0]  ;;  %v2851_v9 = vor.u32 %v3697_v63, %v2850_v62  ;;  %v3646_v10 = vld [vmem:[#allocation5 + $0xa0] sm:$0xf0]  ;;  %v2742_v11 = vld [vmem:[#allocation5 + $0x158] sm:$0xf] }
  0x6e   :  { %1333 = vmatpush.bf16.msra.mxu2 %v3039_v29  ;;  %1299 = vmatmul.bf16.vlgmr.msrb.gmra.mxu3 %v4315_v5  ;;  %v3752_v29 = vld [vmem:[#allocation5 + $0x3f4] sm:$0xf]  ;;  %v3670_v13 = vld [vmem:[#allocation5 + $0x160] sm:$0xf0]  ;;  %v2634_v17 = vld [vmem:[#allocation5 + $0x80] sm:$0xf] }
  0x6f   :  { %1347 = vmatpush.bf16.msra.mxu3 %v3135_v38  ;;  %v3725_v38 = vld [vmem:[#allocation5 + $0x31c] sm:$0xf]  ;;  %v3075_v41 = vor.u32 %v3752_v29, %v3072_v30  ;;  %v3718_v20 = vld [vmem:[#allocation5 + $0x2e0] sm:$0xf0]  ;;  %v2743_v21 = vor.u32 %v3670_v13, %v2742_v11  ;;  %v3643_v24 = vld [vmem:[#allocation5 + $0x88] sm:$0xf0] }
  0x70   :  { %1306 = vmatpush.bf16.msra.mxu0 %v2835_v40  ;;  %v2964_v40 = vld [vmem:[#allocation5 + $0x324] sm:$0xf0]  ;;  %v2730_v25 = vld [vmem:[#allocation5 + $0x140] sm:$0xf]  ;;  %v3667_v26 = vld [vmem:[#allocation5 + $0x148] sm:$0xf0]  ;;  %v2635_v30 = vor.u32 %v3643_v24, %v2634_v17 }
  0x71   :  { %1320 = vmatpush.bf16.msra.mxu1 %v2931_v43  ;;  %v2775_v43 = vor.u32 %v3677_v33, %v2772_v35  ;;  %v2967_v48 = vor.u32 %v3725_v38, %v2964_v40  ;;  %v2731_v33 = vor.u32 %v3667_v26, %v2730_v25  ;;  %v2622_v36 = vld [vmem:[#allocation5 + $0x68] sm:$0xf]  ;;  %v3640_v37 = vld [vmem:[#allocation5 + $0x70] sm:$0xf0]  ;;  %v2802_v53 = vld [vmem:[#allocation5 + $0x1d0] sm:$0xf] }
  0x72   :  { %1334 = vmatpush.bf16.msra.mxu2 %v3027_v44  ;;  %v3060_v44 = vld [vmem:[#allocation5 + $0x3e4] sm:$0xf0]  ;;  %v3664_v40 = vld [vmem:[#allocation5 + $0x130] sm:$0xf0]  ;;  %v3685_v54 = vld [vmem:[#allocation5 + $0x1d8] sm:$0xf0] }
  0x73   :  { %1348 = vmatpush.bf16.msra.mxu3 %v3123_v51  ;;  %v3722_v51 = vld [vmem:[#allocation5 + $0x304] sm:$0xf]  ;;  %v2718_v38 = vld [vmem:[#allocation5 + $0x128] sm:$0xf]  ;;  %v3712_v46 = vld [vmem:[#allocation5 + $0x2b0] sm:$0xf0]  ;;  %v2803_v61 = vor.u32 %v3685_v54, %v2802_v53 }
  0x74   :  { %1307 = vmatpush.bf16.msra.mxu0 %v2823_v52  ;;  %v2952_v52 = vld [vmem:[#allocation5 + $0x30c] sm:$0xf0]  ;;  %v2910_v45 = vld [vmem:[#allocation5 + $0x2a8] sm:$0xf]  ;;  %v3709_v58 = vld [vmem:[#allocation5 + $0x298] sm:$0xf0] }
  0x75   :  { %1321 = vmatpush.bf16.msra.mxu1 %v2919_v55  ;;  %v3063_v55 = vor.u32 %v3749_v42, %v3060_v44  ;;  %v3688_v42 = vld [vmem:[#allocation5 + $0x1f0] sm:$0xf0]  ;;  %v2623_v44 = vor.u32 %v3640_v37, %v2622_v36  ;;  %v2598_v62 = vld [vmem:[#allocation5 + $0x38] sm:$0xf]  ;;  %v3634_v63 = vld [vmem:[#allocation5 + $0x40] sm:$0xf0] }
  0x76   :  { %1335 = vmatpush.bf16.msra.mxu2 %v3015_v56  ;;  %v2754_v56 = vld [vmem:[#allocation5 + $0x170] sm:$0xf]  ;;  %v2586_v11 = vld [vmem:[#allocation5 + $0x20] sm:$0xf]  ;;  %v3631_v13 = vld [vmem:[#allocation5 + $0x28] sm:$0xf0] }
  0x77   :  { %1349 = vmatpush.bf16.msra.mxu3 %v3111_v0  ;;  %v2859_v0 = vor.u32 %v3698_v49, %v2856_v50  ;;  %v2755_v3 = vor.u32 %v3673_v57, %v2754_v56  ;;  %v2610_v49 = vld [vmem:[#allocation5 + $0x50] sm:$0xf]  ;;  %v3637_v50 = vld [vmem:[#allocation5 + $0x58] sm:$0xf0]  ;;  %v3679_v17 = vld [vmem:[#allocation5 + $0x1a8] sm:$0xf0] }
  0x78   :  { %1308 = vmatpush.bf16.msra.mxu0 %v2811_v1  ;;  %v2955_v1 = vor.u32 %v3722_v51, %v2952_v52  ;;  %v2706_v51 = vld [vmem:[#allocation5 + $0x110] sm:$0xf]  ;;  %v3661_v52 = vld [vmem:[#allocation5 + $0x118] sm:$0xf0]  ;;  %v2611_v56 = vor.u32 %v3637_v50, %v2610_v49  ;;  %v3628_v26 = vld [vmem:[#allocation5 + $0x10] sm:$0xf0] }
  0x79   :  { %1322 = vmatpush.bf16.msra.mxu1 %v2907_v4  ;;  %v2646_v4 = vld [vmem:[#allocation5 + $0x98] sm:$0xf]  ;;  %v2898_v57 = vld [vmem:[#allocation5 + $0x290] sm:$0xf]  ;;  %v3676_v36 = vld [vmem:[#allocation5 + $0x190] sm:$0xf0] }
  0x7a   :  { %1336 = vmatpush.bf16.msra.mxu2 %v3003_v6  ;;  %v2946_v6 = vld [vmem:[#allocation5 + $0x2f0] sm:$0xf]  ;;  %v3766_v49 = vld [vmem:[#allocation5 + $0x460] sm:$0xf0]  ;;  %v3739_v53 = vld [vmem:[#allocation5 + $0x388] sm:$0xf0] }
  0x7b   :  { %1350 = vmatpush.bf16.msra.mxu3 %v3099_v14  ;;  %v2838_v14 = vld [vmem:[#allocation5 + $0x218] sm:$0xf]  ;;  %v2947_v16 = vor.u32 %v3721_v7, %v2946_v6  ;;  %v2599_v6 = vor.u32 %v3634_v63, %v2598_v62  ;;  %v3114_v54 = vld [vmem:[#allocation5 + $0x440] sm:$0xf]  ;;  %v3760_v62 = vld [vmem:[#allocation5 + $0x430] sm:$0xf0] }
  0x7c   :  { %1309 = vmatpush.bf16.msra.mxu0 %v2799_v15  ;;  %v3694_v15 = vld [vmem:[#allocation5 + $0x220] sm:$0xf0]  ;;  %v2886_v7 = vld [vmem:[#allocation5 + $0x278] sm:$0xf]  ;;  %s4186_s25 = smov [#allocation17]   ;;  %s2523_s28 = sshll.u32 %s4386_s15, 4  ;;  %s2524_s28 = int_to_ptr.hbm [resolvable:$true] %s2523_s28 }
  0x7d   :  { %1323 = vmatpush.bf16.msra.mxu1 %v2895_v18  ;;  %v2934_v18 = vld [vmem:[#allocation5 + $0x2d8] sm:$0xf]  ;;  %v2839_v22 = vor.u32 %v3694_v15, %v2838_v14  ;;  %v2682_v14 = vld [vmem:[#allocation5 + $0xe0] sm:$0xf]  ;;  %v3655_v15 = vld [vmem:[#allocation5 + $0xe8] sm:$0xf0] }
  0x7e   :  { %1337 = vmatpush.bf16.msra.mxu2 %v2991_v19  ;;  %v2647_v19 = vor.u32 %v3646_v10, %v2646_v4  ;;  %v2935_v29 = vor.u32 %v3718_v20, %v2934_v18  ;;  %v2899_v4 = vor.u32 %v3709_v58, %v2898_v57  ;;  %v2574_v20 = vld [vmem:[#allocation5 + $0x8] sm:$0xf]  ;;  %v2683_v24 = vor.u32 %v3655_v15, %v2682_v14  ;;  %s2521_s27 = sshll.u32 %s4186_s25, 4  ;;  %s2522_s27 = int_to_ptr.vmem [resolvable:$true] %s2521_s27 }
  0x7f   :  { %1351 = vmatpush.bf16.msra.mxu3 %v3087_v27  ;;  %v2826_v27 = vld [vmem:[#allocation5 + $0x200] sm:$0xf]  ;;  %v2575_v37 = vor.u32 %v3628_v26, %v2574_v20  ;;  %v3006_v58 = vld [vmem:[#allocation5 + $0x368] sm:$0xf]  ;;  %v3751_v20 = vld [vmem:[#allocation5 + $0x3e8] sm:$0xf0] }
  0x80   :  { %1310 = vmatpush.bf16.msra.mxu0 %v2787_v28  ;;  %v3691_v28 = vld [vmem:[#allocation5 + $0x208] sm:$0xf0] }
  0x81   :  { %1324 = vmatpush.bf16.msra.mxu1 %v2883_v31  ;;  %v2922_v31 = vld [vmem:[#allocation5 + $0x2c0] sm:$0xf]  ;;  %v2827_v35 = vor.u32 %v3691_v28, %v2826_v27  ;;  %v2670_v27 = vld [vmem:[#allocation5 + $0xc8] sm:$0xf]  ;;  %v3652_v28 = vld [vmem:[#allocation5 + $0xd0] sm:$0xf0] }
  0x82   :  { %1338 = vmatpush.bf16.msra.mxu2 %v2979_v32  ;;  %v3715_v32 = vld [vmem:[#allocation5 + $0x2c8] sm:$0xf0] }
  0x83   :  { %1352 = vmatpush.bf16.msra.mxu3 %v3075_v41  ;;  %v2814_v41 = vld [vmem:[#allocation5 + $0x1e8] sm:$0xf] }
  0x84   :  { %1311 = vmatpush.bf16.msra.mxu0 %v2775_v43  ;;  %v2923_v43 = vor.u32 %v3715_v32, %v2922_v31  ;;  %v3138_v31 = vld [vmem:[#allocation5 + $0x470] sm:$0xf] }
  0x85   :  { %1325 = vmatpush.bf16.msra.mxu1 %v2871_v47  ;;  %v2719_v47 = vor.u32 %v3664_v40, %v2718_v38  ;;  %v2862_v38 = vld [vmem:[#allocation5 + $0x248] sm:$0xf]  ;;  %v3700_v40 = vld [vmem:[#allocation5 + $0x250] sm:$0xf0] }
  0x86   :  { %1339 = vmatpush.bf16.msra.mxu2 %v2967_v48  ;;  %v2815_v48 = vor.u32 %v3688_v42, %v2814_v41  ;;  %v2671_v41 = vor.u32 %v3652_v28, %v2670_v27  ;;  %v3724_v28 = vld [vmem:[#allocation5 + $0x310] sm:$0xf0] }
  0x87   :  { %1353 = vmatpush.bf16.msra.mxu3 %v3063_v55  ;;  %v2911_v55 = vor.u32 %v3712_v46, %v2910_v45  ;;  %v3030_v45 = vld [vmem:[#allocation5 + $0x398] sm:$0xf]  ;;  %v3742_v46 = vld [vmem:[#allocation5 + $0x3a0] sm:$0xf0] }
  0x88   :  { %1312 = vmatpush.bf16.msra.mxu0 %v2763_v60  ;;  %v2707_v60 = vor.u32 %v3661_v52, %v2706_v51  ;;  %v3031_v50 = vor.u32 %v3742_v46, %v3030_v45  ;;  %v3018_v52 = vld [vmem:[#allocation5 + $0x380] sm:$0xf] }
  0x89   :  { %1326 = vmatpush.bf16.msra.mxu1 %v2859_v0  ;;  %v2694_v0 = vld [vmem:[#allocation5 + $0xf8] sm:$0xf]  ;;  %v3184_v45 = vld [vmem:[#allocation8 + $0x58] sm:$0xf0] }
  0x8a   :  { %1340 = vmatpush.bf16.msra.mxu2 %v2955_v1  ;;  %v3658_v1 = vld [vmem:[#allocation5 + $0x100] sm:$0xf0] }
  0x8b   :  { %1354 = vmatpush.bf16.msra.mxu3 %v3051_v8  ;;  %1313 = vmatmul.bf16.vlgmr.msra.gmra.mxu0 %v4317_v12  ;;  %v3706_v8 = vld [vmem:[#allocation5 + $0x280] sm:$0xf0] }
  0x8c   :  { %1361 = vmatpush.bf16.msrb.mxu0 %v2659_v2  ;;  %1327 = vmatmul.bf16.vlgmr.msra.gmra.mxu1 %v4321_v23  ;;  %v2790_v2 = vld [vmem:[#allocation5 + $0x1b8] sm:$0xf]  ;;  %v2887_v18 = vor.u32 %v3706_v8, %v2886_v7  ;;  %v3190_v7 = vld [vmem:[#allocation8 + $0x60] sm:$0xf] }
  0x8d   :  { %1375 = vmatpush.bf16.msrb.mxu1 %v2755_v3  ;;  %1341 = vmatmul.bf16.vlgmr.msra.gmra.mxu2 %v4324_v34  ;;  %v3682_v3 = vld [vmem:[#allocation5 + $0x1c0] sm:$0xf0] }
  0x8e   :  { %1389 = vmatpush.bf16.msrb.mxu2 %v2851_v9  ;;  %1355 = vmatmul.bf16.vlgmr.msra.gmra.mxu3 %v4326_v39  ;;  %v2695_v9 = vor.u32 %v3658_v1, %v2694_v0  ;;  %v2791_v10 = vor.u32 %v3682_v3, %v2790_v2  ;;  %v2994_v0 = vld [vmem:[#allocation5 + $0x350] sm:$0xf]  ;;  %v3733_v1 = vld [vmem:[#allocation5 + $0x358] sm:$0xf0]  ;;  %v3198_v3 = vld [vmem:[#allocation8 + $0x70] sm:$0xf] }
  0x8f   :  { %1403 = vmatpush.bf16.msrb.mxu3 %v2947_v16  ;;  %v2778_v16 = vld [vmem:[#allocation5 + $0x1a0] sm:$0xf]  ;;  %v3090_v2 = vld [vmem:[#allocation5 + $0x410] sm:$0xf] }
  0x90   :  { %1362 = vmatpush.bf16.msrb.mxu0 %v2647_v19  ;;  %v2587_v19 = vor.u32 %v3631_v13, %v2586_v11  ;;  %v2779_v25 = vor.u32 %v3679_v17, %v2778_v16  ;;  %v3078_v11 = vld [vmem:[#allocation5 + $0x3f8] sm:$0xf]  ;;  %v3754_v13 = vld [vmem:[#allocation5 + $0x400] sm:$0xf0]  ;;  %v2970_v17 = vld [vmem:[#allocation5 + $0x320] sm:$0xf] }
  0x91   :  { %1376 = vmatpush.bf16.msrb.mxu1 %v2743_v21  ;;  %v2874_v21 = vld [vmem:[#allocation5 + $0x260] sm:$0xf]  ;;  %v3079_v16 = vor.u32 %v3754_v13, %v3078_v11 }
  0x92   :  { %1390 = vmatpush.bf16.msrb.mxu2 %v2839_v22  ;;  %v3703_v22 = vld [vmem:[#allocation5 + $0x268] sm:$0xf0] }
  0x93   :  { %1404 = vmatpush.bf16.msrb.mxu3 %v2935_v29  ;;  %v3042_v29 = vld [vmem:[#allocation5 + $0x3b0] sm:$0xf]  ;;  %v2875_v32 = vor.u32 %v3703_v22, %v2874_v21  ;;  %v3182_v21 = vld [vmem:[#allocation8 + $0x50] sm:$0xf]  ;;  %v3781_v22 = vld [vmem:[#allocation8 + $0x54] sm:$0xf0] }
  0x94   :  { %1363 = vmatpush.bf16.msrb.mxu0 %v2635_v30  ;;  %v3745_v30 = vld [vmem:[#allocation5 + $0x3b8] sm:$0xf0]  ;;  %v3183_v26 = vor.u32 %v3781_v22, %v3182_v21 }
  0x95   :  { %1377 = vmatpush.bf16.msrb.mxu1 %v2731_v33  ;;  %v3769_v33 = vld [vmem:[#allocation5 + $0x478] sm:$0xf0]  ;;  %v3043_v42 = vor.u32 %v3745_v30, %v3042_v29  ;;  %v3174_v29 = vld [vmem:[#allocation8 + $0x40] sm:$0xf]  ;;  %v3779_v30 = vld [vmem:[#allocation8 + $0x44] sm:$0xf0] }
  0x96   :  { %1391 = vmatpush.bf16.msrb.mxu2 %v2827_v35  ;;  %v2766_v35 = vld [vmem:[#allocation5 + $0x188] sm:$0xf] }
  0x97   :  { %1405 = vmatpush.bf16.msrb.mxu3 %v2923_v43  ;;  %v3139_v43 = vor.u32 %v3769_v33, %v3138_v31  ;;  %v3054_v31 = vld [vmem:[#allocation5 + $0x3c8] sm:$0xf]  ;;  %v3175_v33 = vor.u32 %v3779_v30, %v3174_v29  ;;  %v3796_v29 = vld [vmem:[#allocation8 + $0xd4] sm:$0xf]  ;;  %v3248_v30 = vld [vmem:[#allocation8 + $0xd8] sm:$0xf0] }
  0x98   :  { %1364 = vmatpush.bf16.msrb.mxu0 %v2623_v44  ;;  %v2767_v44 = vor.u32 %v3676_v36, %v2766_v35  ;;  %v3784_v35 = vld [vmem:[#allocation8 + $0x74] sm:$0xf]  ;;  %v3200_v36 = vld [vmem:[#allocation8 + $0x78] sm:$0xf0] }
  0x99   :  { %1378 = vmatpush.bf16.msrb.mxu1 %v2719_v47  ;;  %v2863_v47 = vor.u32 %v3700_v40, %v2862_v38  ;;  %v3203_v40 = vor.u32 %v3784_v35, %v3200_v36  ;;  %v3251_v35 = vor.u32 %v3796_v29, %v3248_v30 }
  0x9a   :  { %1392 = vmatpush.bf16.msrb.mxu2 %v2815_v48  ;;  %v3126_v48 = vld [vmem:[#allocation5 + $0x458] sm:$0xf] }
  0x9b   :  { %1406 = vmatpush.bf16.msrb.mxu3 %v2911_v55  ;;  %v3127_v51 = vor.u32 %v3766_v49, %v3126_v48  ;;  %v3763_v55 = vld [vmem:[#allocation5 + $0x448] sm:$0xf0]  ;;  %v3176_v48 = vld [vmem:[#allocation8 + $0x48] sm:$0xf0]  ;;  %v3166_v49 = vld [vmem:[#allocation8 + $0x30] sm:$0xf] }
  0x9c   :  { %1365 = vmatpush.bf16.msrb.mxu0 %v2611_v56  ;;  %v3019_v56 = vor.u32 %v3739_v53, %v3018_v52  ;;  %v3115_v57 = vor.u32 %v3763_v55, %v3114_v54  ;;  %v3776_v53 = vld [vmem:[#allocation8 + $0x34] sm:$0xf]  ;;  %v3168_v54 = vld [vmem:[#allocation8 + $0x38] sm:$0xf0]  ;;  %v3158_v55 = vld [vmem:[#allocation8 + $0x20] sm:$0xf] }
  0x9d   :  { %1379 = vmatpush.bf16.msrb.mxu1 %v2707_v60  ;;  %v3736_v60 = vld [vmem:[#allocation5 + $0x370] sm:$0xf0] }
  0x9e   :  { %1393 = vmatpush.bf16.msrb.mxu2 %v2803_v61  ;;  %v3102_v61 = vld [vmem:[#allocation5 + $0x428] sm:$0xf]  ;;  %v3007_v63 = vor.u32 %v3736_v60, %v3006_v58  ;;  %v3160_v60 = vld [vmem:[#allocation8 + $0x28] sm:$0xf0] }
  0x9f   :  { %1407 = vmatpush.bf16.msrb.mxu3 %v2899_v4  ;;  %v3785_v4 = vld [vmem:[#allocation8 + $0x74] sm:$0xf0]  ;;  %v3774_v58 = vld [vmem:[#allocation8 + $0x24] sm:$0xf] }
  0xa0   :  { %1366 = vmatpush.bf16.msrb.mxu0 %v2599_v6  ;;  %v3199_v6 = vor.u32 %v3785_v4, %v3198_v3  ;;  %v3771_v3 = vld [vmem:[#allocation8 + $0x4] sm:$0xf0]  ;;  %v4342_v4 = vld [vmem:[#allocation7] sm:$0x7] }
  0xa1   :  { %1380 = vmatpush.bf16.msrb.mxu1 %v2695_v9  ;;  %v2982_v9 = vld [vmem:[#allocation5 + $0x338] sm:$0xf] }
  0xa2   :  { %1394 = vmatpush.bf16.msrb.mxu2 %v2791_v10  ;;  %v3730_v10 = vld [vmem:[#allocation5 + $0x340] sm:$0xf0] }
  0xa3   :  { %1408 = vmatpush.bf16.msrb.mxu3 %v2887_v18  ;;  %v2983_v15 = vor.u32 %v3730_v10, %v2982_v9  ;;  %v3727_v18 = vld [vmem:[#allocation5 + $0x328] sm:$0xf0]  ;;  %v3262_v9 = vld [vmem:[#allocation8 + $0xf0] sm:$0xf]  ;;  %v3801_v10 = vld [vmem:[#allocation8 + $0xf4] sm:$0xf0] }
  0xa4   :  { %1367 = vmatpush.bf16.msrb.mxu0 %v2587_v19  ;;  %v3066_v19 = vld [vmem:[#allocation5 + $0x3e0] sm:$0xf]  ;;  %v3263_v13 = vor.u32 %v3801_v10, %v3262_v9 }
  0xa5   :  { %1381 = vmatpush.bf16.msrb.mxu1 %v2683_v24  ;;  %v2971_v24 = vor.u32 %v3727_v18, %v2970_v17  ;;  %v3067_v27 = vor.u32 %v3751_v20, %v3066_v19  ;;  %v3799_v18 = vld [vmem:[#allocation8 + $0xe4] sm:$0xf0]  ;;  %v3798_v19 = vld [vmem:[#allocation8 + $0xe4] sm:$0xf]  ;;  %v3256_v20 = vld [vmem:[#allocation8 + $0xe8] sm:$0xf0] }
  0xa6   :  { %1395 = vmatpush.bf16.msrb.mxu2 %v2779_v25  ;;  %v2958_v25 = vld [vmem:[#allocation5 + $0x308] sm:$0xf] }
  0xa7   :  { %1409 = vmatpush.bf16.msrb.mxu3 %v2875_v32  ;;  %v3748_v32 = vld [vmem:[#allocation5 + $0x3d0] sm:$0xf0] }
  0xa8   :  { %1368 = vmatpush.bf16.msrb.mxu0 %v2575_v37  ;;  %v2959_v37 = vor.u32 %v3724_v28, %v2958_v25  ;;  %v3055_v38 = vor.u32 %v3748_v32, %v3054_v31  ;;  %v3246_v25 = vld [vmem:[#allocation8 + $0xd0] sm:$0xf] }
  0xa9   :  { %1382 = vmatpush.bf16.msrb.mxu1 %v2671_v41  ;;  %v3782_v41 = vld [vmem:[#allocation8 + $0x64] sm:$0xf] }
  0xaa   :  { %1396 = vmatpush.bf16.msrb.mxu2 %v2767_v44  ;;  %v3780_v44 = vld [vmem:[#allocation8 + $0x54] sm:$0xf] }
  0xab   :  { %1410 = vmatpush.bf16.msrb.mxu3 %v2863_v47  ;;  %1369 = vmatmul.bf16.vlgmr.msrb.gmra.mxu0 %v4312_v59  ;;  %v3103_v59 = vor.u32 %v3760_v62, %v3102_v61  ;;  %v3187_v46 = vor.u32 %v3780_v44, %v3184_v45  ;;  %v3778_v47 = vld [vmem:[#allocation8 + $0x44] sm:$0xf]  ;;  %v3773_v61 = vld [vmem:[#allocation8 + $0x14] sm:$0xf0]  ;;  %v3163_v62 = vor.u32 %v3774_v58, %v3160_v60  ;;  %v3795_v44 = vld [vmem:[#allocation8 + $0xc4] sm:$0xf0] }
  0xac   :  { %1417 = vmatpush.bf16.msra.mxu0 %v3043_v42  ;;  %1383 = vmatmul.bf16.vlgmr.msrb.gmra.mxu1 %v4315_v5  ;;  %v3757_v5 = vld [vmem:[#allocation5 + $0x418] sm:$0xf0]  ;;  %v3192_v42 = vld [vmem:[#allocation8 + $0x68] sm:$0xf0]  ;;  %v3794_v45 = vld [vmem:[#allocation8 + $0xc4] sm:$0xf] }
  0xad   :  { %1431 = vmatpush.bf16.msra.mxu1 %v3139_v43  ;;  %1397 = vmatmul.bf16.vlgmr.msrb.gmra.mxu2 %v4317_v12  ;;  %v2995_v12 = vor.u32 %v3733_v1, %v2994_v0  ;;  %v3091_v8 = vor.u32 %v3757_v5, %v3090_v2  ;;  %v3195_v43 = vor.u32 %v3782_v41, %v3192_v42  ;;  %v3152_v0 = vld [vmem:[#allocation8 + $0x18] sm:$0xf0]  ;;  %v3142_v5 = vld [vmem:[#allocation8] sm:$0xf] }
  0xae   :  { %1411 = vmatmul.bf16.vlgmr.msrb.gmra.mxu3 %v4321_v23  ;;  %v3783_v23 = vld [vmem:[#allocation8 + $0x64] sm:$0xf0]  ;;  %1748 = vmatpush.bf16.msra.mxu2 %v3199_v6  ;;  %v3143_v6 = vor.u32 %v3771_v3, %v3142_v5  ;;  %v3224_v5 = vld [vmem:[#allocation8 + $0xa8] sm:$0xf0] }
  0xaf   :  { %v3191_v14 = vor.u32 %v3783_v23, %v3190_v7  ;;  %v3770_v7 = vld [vmem:[#allocation8 + $0x4] sm:$0xf]  ;;  %v3144_v23 = vld [vmem:[#allocation8 + $0x8] sm:$0xf0]  ;;  %1762 = vmatpush.bf16.msra.mxu3 %v3263_v13 }
  0xb0   :  { %1418 = vmatpush.bf16.msra.mxu0 %v3031_v50  ;;  %v3777_v50 = vld [vmem:[#allocation8 + $0x34] sm:$0xf0]  ;;  %v3147_v11 = vor.u32 %v3770_v7, %v3144_v23  ;;  %v3788_v23 = vld [vmem:[#allocation8 + $0x94] sm:$0xf] }
  0xb1   :  { %1432 = vmatpush.bf16.msra.mxu1 %v3127_v51  ;;  %v3179_v51 = vor.u32 %v3778_v47, %v3176_v48  ;;  %v3167_v52 = vor.u32 %v3777_v50, %v3166_v49  ;;  %v3240_v49 = vld [vmem:[#allocation8 + $0xc8] sm:$0xf0]  ;;  %v3789_v7 = vld [vmem:[#allocation8 + $0x94] sm:$0xf0] }
  0xb2   :  { %1749 = vmatpush.bf16.msra.mxu2 %v3191_v14  ;;  %v3800_v14 = vld [vmem:[#allocation8 + $0xf4] sm:$0xf]  ;;  %v3243_v50 = vor.u32 %v3794_v45, %v3240_v49 }
  0xb4   :  { %1419 = vmatpush.bf16.msra.mxu0 %v3019_v56  ;;  %v3775_v56 = vld [vmem:[#allocation8 + $0x24] sm:$0xf0] }
  0xb5   :  { %1433 = vmatpush.bf16.msra.mxu1 %v3115_v57  ;;  %v3159_v57 = vor.u32 %v3775_v56, %v3158_v55  ;;  %v3792_v55 = vld [vmem:[#allocation8 + $0xb4] sm:$0xf] }
  0xb6   :  { %1750 = vmatpush.bf16.msra.mxu2 %v3183_v26  ;;  %v3797_v26 = vld [vmem:[#allocation8 + $0xd4] sm:$0xf0] }
  0xb7   :  { %v3247_v32 = vor.u32 %v3797_v26, %v3246_v25 }
  0xb8   :  { %1420 = vmatpush.bf16.msra.mxu0 %v3007_v63 }
  0xb9   :  { %1434 = vmatpush.bf16.msra.mxu1 %v3103_v59  ;;  %v3772_v59 = vld [vmem:[#allocation8 + $0x14] sm:$0xf] }
  0xba   :  { %1751 = vmatpush.bf16.msra.mxu2 %v3175_v33 }
  0xbc   :  { %1421 = vmatpush.bf16.msra.mxu0 %v2995_v12  ;;  %v3155_v12 = vor.u32 %v3772_v59, %v3152_v0 }
  0xbd   :  { %1435 = vmatpush.bf16.msra.mxu1 %v3091_v8  ;;  %v389_v8 = vperm.slane %v4342_v4, 0 }
  0xbe   :  { %1752 = vmatpush.bf16.msra.mxu2 %v3167_v52 }
  0xc0   :  { %1422 = vmatpush.bf16.msra.mxu0 %v2983_v15  ;;  %v3264_v15 = vld [vmem:[#allocation8 + $0xf8] sm:$0xf0] }
  0xc1   :  { %1436 = vmatpush.bf16.msra.mxu1 %v3079_v16  ;;  %v3254_v16 = vld [vmem:[#allocation8 + $0xe0] sm:$0xf]  ;;  %v3267_v17 = vor.u32 %v3800_v14, %v3264_v15 }
  0xc2   :  { %1753 = vmatpush.bf16.msra.mxu2 %v3159_v57  ;;  %v3255_v21 = vor.u32 %v3799_v18, %v3254_v16  ;;  %v3232_v57 = vld [vmem:[#allocation8 + $0xb8] sm:$0xf0]  ;;  %v3206_v16 = vld [vmem:[#allocation8 + $0x80] sm:$0xf]  ;;  %v3786_v18 = vld [vmem:[#allocation8 + $0x84] sm:$0xf] }
  0xc3   :  { %v3235_v58 = vor.u32 %v3792_v55, %v3232_v57 }
  0xc4   :  { %1423 = vmatpush.bf16.msra.mxu0 %v2971_v24  ;;  %v3259_v24 = vor.u32 %v3798_v19, %v3256_v20  ;;  %1763 = vmatpush.bf16.msra.mxu3 %v3255_v21  ;;  %v3208_v20 = vld [vmem:[#allocation8 + $0x88] sm:$0xf0] }
  0xc5   :  { %1437 = vmatpush.bf16.msra.mxu1 %v3067_v27 }
  0xc8   :  { %1424 = vmatpush.bf16.msra.mxu0 %v2959_v37  ;;  %v1202_v1 = vpop.f32.mrf.mxu0  ;;  %1764 = vmatpush.bf16.msra.mxu3 %v3247_v32 }
  0xc9   :  { %1438 = vmatpush.bf16.msra.mxu1 %v3055_v38  ;;  %v1216_v2 = vpop.f32.mrf.mxu1  ;;  %v1203_v22 = vadd.f32 %v1202_v1, %v389_v8 }
  0xcb   :  { %1425 = vmatmul.bf16.vlgmr.msra.gmra.mxu0 %v4324_v34  ;;  %v3171_v34 = vor.u32 %v3776_v53, %v3168_v54  ;;  %v1217_v33 = vadd.f32 %v1216_v2, %v1203_v22  ;;  %v3230_v53 = vld [vmem:[#allocation8 + $0xb0] sm:$0xf]  ;;  %v3793_v54 = vld [vmem:[#allocation8 + $0xb4] sm:$0xf0]  ;;  %v3211_v22 = vor.u32 %v3786_v18, %v3208_v20  ;;  %v3806_v18 = vld [vmem:[#allocation8 + $0x124] sm:$0xf] }
  0xcc   :  { %1439 = vmatmul.bf16.vlgmr.msra.gmra.mxu1 %v4326_v39  ;;  %v3150_v39 = vld [vmem:[#allocation8 + $0x10] sm:$0xf]  ;;  %v3288_v20 = vld [vmem:[#allocation8 + $0x128] sm:$0xf0] }
  0xcd   :  { %1790 = vmatpush.bf16.msrb.mxu1 %v3203_v40  ;;  %v3151_v63 = vor.u32 %v3773_v61, %v3150_v39  ;;  %v3222_v61 = vld [vmem:[#allocation8 + $0xa0] sm:$0xf] }
  0xcf   :  { %1754 = vmatpush.bf16.msra.mxu2 %v3151_v63  ;;  %v3790_v63 = vld [vmem:[#allocation8 + $0xa4] sm:$0xf] }
  0xd0   :  { %v1204_v27 = vpop.f32.mrf.mxu0  ;;  %v1230_v28 = vpop.f32.mrf.mxu2  ;;  %v3227_v3 = vor.u32 %v3790_v63, %v3224_v5  ;;  %v3811_v5 = vld [vmem:[#allocation8 + $0x144] sm:$0xf0] }
  0xd1   :  { %1791 = vmatpush.bf16.msrb.mxu1 %v3195_v43  ;;  %v1218_v31 = vpop.f32.mrf.mxu1  ;;  %v1244_v36 = vpop.f32.mrf.mxu3  ;;  %v1205_v37 = vadd.f32 %v1204_v27, %v389_v8  ;;  %v1231_v38 = vadd.f32 %v1230_v28, %v1217_v33  ;;  %v3238_v43 = vld [vmem:[#allocation8 + $0xc0] sm:$0xf] }
  0xd2   :  { %v3239_v48 = vor.u32 %v3795_v44, %v3238_v43 }
  0xd3   :  { %1755 = vmatpush.bf16.msra.mxu2 %v3143_v6  ;;  %v1219_v40 = vadd.f32 %v1218_v31, %v1205_v37  ;;  %v3214_v6 = vld [vmem:[#allocation8 + $0x90] sm:$0xf] }
  0xd4   :  { %1765 = vmatpush.bf16.msra.mxu3 %v3239_v48  ;;  %v3215_v10 = vor.u32 %v3789_v7, %v3214_v6  ;;  %v3304_v6 = vld [vmem:[#allocation8 + $0x148] sm:$0xf0] }
  0xd5   :  { %1792 = vmatpush.bf16.msrb.mxu1 %v3187_v46  ;;  %v1245_v46 = vadd.f32 %v1244_v36, %v1231_v38 }
  0xd7   :  { %1804 = vmatpush.bf16.msrb.mxu2 %v3267_v17  ;;  %v3787_v17 = vld [vmem:[#allocation8 + $0x84] sm:$0xf0] }
  0xd8   :  { %v1232_v42 = vpop.f32.mrf.mxu2  ;;  %v3207_v19 = vor.u32 %v3787_v17, %v3206_v16  ;;  %v3286_v16 = vld [vmem:[#allocation8 + $0x120] sm:$0xf]  ;;  %v3807_v17 = vld [vmem:[#allocation8 + $0x124] sm:$0xf0] }
  0xd9   :  { %1793 = vmatpush.bf16.msrb.mxu1 %v3179_v51  ;;  %v1233_v51 = vadd.f32 %v1232_v42, %v1219_v40  ;;  %v1246_v52 = vpop.f32.mrf.mxu3  ;;  %v3326_v40 = vld [vmem:[#allocation8 + $0x170] sm:$0xf]  ;;  %v3816_v42 = vld [vmem:[#allocation8 + $0x174] sm:$0xf] }
  0xdb   :  { %1805 = vmatpush.bf16.msrb.mxu2 %v3259_v24  ;;  %v1247_v60 = vadd.f32 %v1246_v52, %v1233_v51  ;;  %v390_v24 = vperm.slane %v4342_v4, 1  ;;  %v3318_v52 = vld [vmem:[#allocation8 + $0x160] sm:$0xf] }
  0xdd   :  { %1794 = vmatpush.bf16.msrb.mxu1 %v3171_v34  ;;  %v3231_v34 = vor.u32 %v3793_v54, %v3230_v53  ;;  %v3815_v53 = vld [vmem:[#allocation8 + $0x164] sm:$0xf0]  ;;  %v3814_v54 = vld [vmem:[#allocation8 + $0x164] sm:$0xf] }
  0xdf   :  { %1806 = vmatpush.bf16.msrb.mxu2 %v3251_v35  ;;  %1766 = vmatpush.bf16.msra.mxu3 %v3231_v34  ;;  %v3320_v34 = vld [vmem:[#allocation8 + $0x168] sm:$0xf0] }
  0xe1   :  { %1795 = vmatpush.bf16.msrb.mxu1 %v3163_v62  ;;  %v3791_v62 = vld [vmem:[#allocation8 + $0xa4] sm:$0xf0] }
  0xe2   :  { %v3223_v2 = vor.u32 %v3791_v62, %v3222_v61  ;;  %v3812_v61 = vld [vmem:[#allocation8 + $0x154] sm:$0xf] }
  0xe3   :  { %1807 = vmatpush.bf16.msrb.mxu2 %v3243_v50 }
  0xe4   :  { %1767 = vmatpush.bf16.msra.mxu3 %v3223_v2  ;;  %v3302_v2 = vld [vmem:[#allocation8 + $0x140] sm:$0xf] }
  0xe5   :  { %1796 = vmatpush.bf16.msrb.mxu1 %v3155_v12 }
  0xe7   :  { %1808 = vmatpush.bf16.msrb.mxu2 %v3235_v58  ;;  %v3323_v58 = vor.u32 %v3814_v54, %v3320_v34 }
  0xe8   :  { %v1258_v41 = vpop.f32.mrf.mxu0  ;;  %1768 = vmatpush.bf16.msra.mxu3 %v3215_v10  ;;  %v3809_v10 = vld [vmem:[#allocation8 + $0x134] sm:$0xf0] }
  0xe9   :  { %1797 = vmatpush.bf16.msrb.mxu1 %v3147_v11  ;;  %v1272_v47 = vpop.f32.mrf.mxu1  ;;  %v1259_v56 = vadd.f32 %v1258_v41, %v1245_v46  ;;  %v3216_v11 = vld [vmem:[#allocation8 + $0x98] sm:$0xf0]  ;;  %v3817_v41 = vld [vmem:[#allocation8 + $0x174] sm:$0xf0] }
  0xea   :  { %v3219_v13 = vor.u32 %v3788_v23, %v3216_v11  ;;  %v3327_v46 = vor.u32 %v3817_v41, %v3326_v40  ;;  %v3303_v23 = vor.u32 %v3811_v5, %v3302_v2  ;;  %v3808_v11 = vld [vmem:[#allocation8 + $0x134] sm:$0xf]  ;;  %v3392_v2 = vld [vmem:[#allocation10 + $0x78] sm:$0xf0]  ;;  %v3382_v5 = vld [vmem:[#allocation10 + $0x60] sm:$0xf] }
  0xeb   :  { %v1273_v59 = vadd.f32 %v1272_v47, %v1259_v56  ;;  %1809 = vmatpush.bf16.msrb.mxu2 %v3227_v3  ;;  %v3328_v47 = vld [vmem:[#allocation8 + $0x178] sm:$0xf0]  ;;  %v3319_v56 = vor.u32 %v3815_v53, %v3318_v52 }
  0xec   :  { %1769 = vmatpush.bf16.msra.mxu3 %v3207_v19  ;;  %v3331_v48 = vor.u32 %v3816_v42, %v3328_v47  ;;  %1776 = vmatpush.bf16.msrb.mxu0 %v3327_v46  ;;  %v3287_v19 = vor.u32 %v3807_v17, %v3286_v16  ;;  %v3374_v16 = vld [vmem:[#allocation10 + $0x50] sm:$0xf]  ;;  %v3829_v17 = vld [vmem:[#allocation10 + $0x54] sm:$0xf0] }
  0xed   :  { %v1445_v8 = vmax.f32 %v1273_v59, 0.0 }
  0xef   :  { %1810 = vmatpush.bf16.msrb.mxu2 %v3219_v13 }
  0xf0   :  { %v1260_v39 = vpop.f32.mrf.mxu0  ;;  %v1286_v15 = vpop.f32.mrf.mxu2  ;;  %1818 = vmatpush.bf16.msrb.mxu3 %v3331_v48  ;;  %1777 = vmatpush.bf16.msrb.mxu0 %v3319_v56 }
  0xf1   :  { %v1261_v0 = vadd.f32 %v1260_v39, %v1247_v60  ;;  %v1274_v1 = vpop.f32.mrf.mxu1  ;;  %v1300_v21 = vpop.f32.mrf.mxu3  ;;  %v1287_v25 = vadd.f32 %v1286_v15, %v390_v24  ;;  %v3310_v60 = vld [vmem:[#allocation8 + $0x150] sm:$0xf]  ;;  %v3813_v39 = vld [vmem:[#allocation8 + $0x154] sm:$0xf0] }
  0xf2   :  { %v3311_v59 = vor.u32 %v3813_v39, %v3310_v60 }
  0xf3   :  { %v1275_v12 = vadd.f32 %v1274_v1, %v1261_v0  ;;  %1811 = vmatpush.bf16.msrb.mxu2 %v3211_v22  ;;  %v1301_v27 = vadd.f32 %v1300_v21, %v1287_v25  ;;  %v3312_v0 = vld [vmem:[#allocation8 + $0x158] sm:$0xf0]  ;;  %v3291_v21 = vor.u32 %v3806_v18, %v3288_v20  ;;  %v3278_v22 = vld [vmem:[#allocation8 + $0x110] sm:$0xf]  ;;  %v3804_v25 = vld [vmem:[#allocation8 + $0x114] sm:$0xf] }
  0xf4   :  { %1819 = vmatpush.bf16.msrb.mxu3 %v3323_v58  ;;  %v3315_v1 = vor.u32 %v3812_v61, %v3312_v0  ;;  %1778 = vmatpush.bf16.msrb.mxu0 %v3311_v59  ;;  %v3833_v59 = vld [vmem:[#allocation10 + $0x74] sm:$0xf0]  ;;  %v3832_v0 = vld [vmem:[#allocation10 + $0x74] sm:$0xf]  ;;  %v3446_v20 = vld [vmem:[#allocation10 + $0xe0] sm:$0xf] }
  0xf5   :  { %v1448_v9 = vmax.f32 %v1275_v12, 0.0  ;;  %v3810_v12 = vld [vmem:[#allocation8 + $0x144] sm:$0xf]  ;;  %v3828_v18 = vld [vmem:[#allocation10 + $0x54] sm:$0xf] }
  0xf7   :  { %v1451_v14 = vpack.c.bf16 %v1448_v9, %v1445_v8  ;;  %v3307_v8 = vor.u32 %v3810_v12, %v3304_v6  ;;  %v3294_v9 = vld [vmem:[#allocation8 + $0x130] sm:$0xf]  ;;  %v3395_v12 = vor.u32 %v3832_v0, %v3392_v2  ;;  %v3830_v6 = vld [vmem:[#allocation10 + $0x64] sm:$0xf]  ;;  %v3820_v2 = vld [vmem:[#allocation10 + $0x14] sm:$0xf] }
  0xf8   :  { %v1288_v26 = vpop.f32.mrf.mxu2  ;;  %1820 = vmatpush.bf16.msrb.mxu3 %v3315_v1  ;;  %1779 = vmatpush.bf16.msrb.mxu0 %v3303_v23  ;;  %v3295_v13 = vor.u32 %v3809_v10, %v3294_v9  ;;  %v3454_v23 = vld [vmem:[#allocation10 + $0xf0] sm:$0xf]  ;;  %v3849_v9 = vld [vmem:[#allocation10 + $0xf4] sm:$0xf0]  ;;  %v3848_v10 = vld [vmem:[#allocation10 + $0xf4] sm:$0xf] }
  0xf9   :  { %1756 = vmatmul.bf16.vlgmr.msra.gmra.mxu2 %v1451_v14  ;;  %1798 = vmatmul.bf16.vlgmr.msrb.gmra.mxu1 %v1451_v14  ;;  %v1302_v28 = vpop.f32.mrf.mxu3  ;;  %v1289_v30 = vadd.f32 %v1288_v26, %v390_v24  ;;  %v3296_v14 = vld [vmem:[#allocation8 + $0x138] sm:$0xf0]  ;;  %v3805_v24 = vld [vmem:[#allocation8 + $0x114] sm:$0xf0]  ;;  %v3342_v0 = vld [vmem:[#allocation10 + $0x10] sm:$0xf] }
  0xfa   :  { %v3299_v15 = vor.u32 %v3808_v11, %v3296_v14  ;;  %v3279_v26 = vor.u32 %v3805_v24, %v3278_v22  ;;  %v3456_v11 = vld [vmem:[#allocation10 + $0xf8] sm:$0xf0]  ;;  %2064 = vmatpush.bf16.msra.mxu2 %v3395_v12  ;;  %v3455_v14 = vor.u32 %v3849_v9, %v3454_v23  ;;  %v3846_v24 = vld [vmem:[#allocation10 + $0xe4] sm:$0xf]  ;;  %v3416_v9 = vld [vmem:[#allocation10 + $0xa8] sm:$0xf0] }
  0xfb   :  { %v1303_v33 = vadd.f32 %v1302_v28, %v1289_v30  ;;  %v3803_v30 = vld [vmem:[#allocation8 + $0x104] sm:$0xf0]  ;;  %v3838_v23 = vld [vmem:[#allocation10 + $0xa4] sm:$0xf] }
  0xfc   :  { %1821 = vmatpush.bf16.msrb.mxu3 %v3307_v8  ;;  %1780 = vmatpush.bf16.msrb.mxu0 %v3295_v13 }
  0xfd   :  { %2050 = vmatpush.bf16.msra.mxu1 %v3455_v14  ;;  %v3818_v14 = vld [vmem:[#allocation10 + $0x4] sm:$0xf] }
 0x100   :  { %1822 = vmatpush.bf16.msrb.mxu3 %v3299_v15  ;;  %1781 = vmatpush.bf16.msrb.mxu0 %v3287_v19  ;;  %v3459_v15 = vor.u32 %v3848_v10, %v3456_v11  ;;  %v3376_v19 = vld [vmem:[#allocation10 + $0x58] sm:$0xf0]  ;;  %v3419_v10 = vor.u32 %v3838_v23, %v3416_v9  ;;  %v3334_v11 = vld [vmem:[#allocation10] sm:$0xf]  ;;  %v3852_v23 = vld [vmem:[#allocation11 + $0x10] sm:$0xff] }
 0x101   :  { %v3851_v9 = vld [vmem:[#allocation11 + $0x8] sm:$0xff] }
 0x104   :  { %1823 = vmatpush.bf16.msrb.mxu3 %v3291_v21  ;;  %1782 = vmatpush.bf16.msrb.mxu0 %v3279_v26  ;;  %v3847_v21 = vld [vmem:[#allocation10 + $0xe4] sm:$0xf0]  ;;  %v3375_v26 = vor.u32 %v3829_v17, %v3374_v16  ;;  %v3336_v16 = vld [vmem:[#allocation10 + $0x8] sm:$0xf0] }
 0x105   :  { %v3447_v22 = vor.u32 %v3847_v21, %v3446_v20  ;;  %v3339_v17 = vor.u32 %v3818_v14, %v3336_v16  ;;  %v3836_v20 = vld [vmem:[#allocation10 + $0x94] sm:$0xf]  ;;  %v3858_v14 = vld [vmem:[#allocation11 + $0x40] sm:$0xff] }
 0x106   :  { %v3872_v16 = vld [vmem:[#allocation13 + $0x30] sm:$0xff] }
 0x107   :  { %2051 = vmatpush.bf16.msra.mxu1 %v3447_v22  ;;  %v3408_v22 = vld [vmem:[#allocation10 + $0x98] sm:$0xf0] }
 0x108   :  { %v1314_v29 = vpop.f32.mrf.mxu0 }
 0x109   :  { %v1315_v31 = vadd.f32 %v1314_v29, %v1301_v27  ;;  %v1328_v32 = vpop.f32.mrf.mxu1  ;;  %v3280_v27 = vld [vmem:[#allocation8 + $0x118] sm:$0xf0]  ;;  %v3270_v29 = vld [vmem:[#allocation8 + $0x100] sm:$0xf] }
 0x10a   :  { %v3283_v28 = vor.u32 %v3804_v25, %v3280_v27  ;;  %v3448_v25 = vld [vmem:[#allocation10 + $0xe8] sm:$0xf0] }
 0x10b   :  { %v1329_v35 = vadd.f32 %v1328_v32, %v1315_v31  ;;  %v3802_v31 = vld [vmem:[#allocation8 + $0x104] sm:$0xf]  ;;  %v3271_v32 = vor.u32 %v3803_v30, %v3270_v29  ;;  %v3451_v27 = vor.u32 %v3846_v24, %v3448_v25  ;;  %v3827_v29 = vld [vmem:[#allocation10 + $0x44] sm:$0xf0]  ;;  %v3379_v30 = vor.u32 %v3828_v18, %v3376_v19  ;;  %v3406_v18 = vld [vmem:[#allocation10 + $0x90] sm:$0xf] }
 0x10c   :  { %1824 = vmatpush.bf16.msrb.mxu3 %v3283_v28  ;;  %v3366_v28 = vld [vmem:[#allocation10 + $0x40] sm:$0xf]  ;;  %v3837_v19 = vld [vmem:[#allocation10 + $0x94] sm:$0xf0]  ;;  %v3411_v25 = vor.u32 %v3836_v20, %v3408_v22 }
 0x10d   :  { %1783 = vmatpush.bf16.msrb.mxu0 %v3271_v32  ;;  %v3845_v32 = vld [vmem:[#allocation10 + $0xd4] sm:$0xf0]  ;;  %v3407_v21 = vor.u32 %v3837_v19, %v3406_v18  ;;  %v3871_v18 = vld [vmem:[#allocation13 + $0x28] sm:$0xff] }
 0x10e   :  { %v1870_v19 = vld [vmem:[%s4377_s6] sm:$0x3] }
 0x10f   :  { %v1872_v22 = vperm.slane %v1870_v19, 0 }
 0x110   :  { %v1342_v36 = vpop.f32.mrf.mxu2  ;;  %v1316_v38 = vpop.f32.mrf.mxu0 }
 0x111   :  { %v1356_v37 = vpop.f32.mrf.mxu3  ;;  %v1343_v43 = vadd.f32 %v1342_v36, %v1329_v35  ;;  %v1317_v44 = vadd.f32 %v1316_v38, %v1303_v33  ;;  %v1330_v45 = vpop.f32.mrf.mxu1  ;;  %v3272_v33 = vld [vmem:[#allocation8 + $0x108] sm:$0xf0]  ;;  %v391_v38 = vperm.slane %v4342_v4, 2 }
 0x112   :  { %v3275_v36 = vor.u32 %v3802_v31, %v3272_v33  ;;  %v3438_v31 = vld [vmem:[#allocation10 + $0xd0] sm:$0xf]  ;;  %v3844_v33 = vld [vmem:[#allocation10 + $0xd4] sm:$0xf] }
 0x113   :  { %v1331_v49 = vadd.f32 %v1330_v45, %v1317_v44  ;;  %v1357_v50 = vadd.f32 %v1356_v37, %v1343_v43 }
 0x114   :  { %1825 = vmatpush.bf16.msrb.mxu3 %v3275_v36  ;;  %v3368_v36 = vld [vmem:[#allocation10 + $0x48] sm:$0xf0] }
 0x115   :  { %v1446_v62 = vmax.f32 %v1357_v50, 0.0 }
 0x118   :  { %v1344_v51 = vpop.f32.mrf.mxu2 }
 0x119   :  { %v1345_v55 = vadd.f32 %v1344_v51, %v1331_v49  ;;  %v1358_v57 = vpop.f32.mrf.mxu3 }
 0x11b   :  { %v1359_v63 = vadd.f32 %v1358_v57, %v1345_v55 }
 0x11d   :  { %v1449_v3 = vmax.f32 %v1359_v63, 0.0  ;;  %v3390_v63 = vld [vmem:[#allocation10 + $0x70] sm:$0xf] }
 0x11e   :  { %v3391_v1 = vor.u32 %v3833_v59, %v3390_v63  ;;  %v3424_v63 = vld [vmem:[#allocation10 + $0xb8] sm:$0xf0] }
 0x11f   :  { %v1452_v7 = vpack.c.bf16 %v1449_v3, %v1446_v62  ;;  %v3831_v3 = vld [vmem:[#allocation10 + $0x64] sm:$0xf0] }
 0x120   :  { %2036 = vmatpush.bf16.msra.mxu0 %v3391_v1  ;;  %v3383_v8 = vor.u32 %v3831_v3, %v3382_v5  ;;  %v3821_v1 = vld [vmem:[#allocation10 + $0x14] sm:$0xf0]  ;;  %v3344_v3 = vld [vmem:[#allocation10 + $0x18] sm:$0xf0] }
 0x121   :  { %1770 = vmatmul.bf16.vlgmr.msra.gmra.mxu3 %v1452_v7  ;;  %1812 = vmatmul.bf16.vlgmr.msrb.gmra.mxu2 %v1452_v7  ;;  %v3384_v7 = vld [vmem:[#allocation10 + $0x68] sm:$0xf0]  ;;  %v3343_v5 = vor.u32 %v3821_v1, %v3342_v0  ;;  %v3347_v12 = vor.u32 %v3820_v2, %v3344_v3  ;;  %v3854_v3 = vld [vmem:[#allocation11 + $0x20] sm:$0xff] }
 0x122   :  { %v3387_v13 = vor.u32 %v3830_v6, %v3384_v7  ;;  %2078 = vmatpush.bf16.msra.mxu3 %v3459_v15  ;;  %v3414_v6 = vld [vmem:[#allocation10 + $0xa0] sm:$0xf]  ;;  %v3839_v7 = vld [vmem:[#allocation10 + $0xa4] sm:$0xf0] }
 0x124   :  { %2037 = vmatpush.bf16.msra.mxu0 %v3383_v8  ;;  %2065 = vmatpush.bf16.msra.mxu2 %v3387_v13  ;;  %v3415_v8 = vor.u32 %v3839_v7, %v3414_v6  ;;  %v3819_v13 = vld [vmem:[#allocation10 + $0x4] sm:$0xf0]  ;;  %v3853_v6 = vld [vmem:[#allocation11 + $0x18] sm:$0xff]  ;;  %v3862_v7 = vld [vmem:[#allocation11 + $0x60] sm:$0xff] }
 0x125   :  { %v3335_v15 = vor.u32 %v3819_v13, %v3334_v11  ;;  %v3850_v11 = vld [vmem:[#allocation11] sm:$0xff]  ;;  %v3859_v13 = vld [vmem:[#allocation11 + $0x48] sm:$0xff] }
 0x126   :  { %2079 = vmatpush.bf16.msra.mxu3 %v3451_v27  ;;  %v3835_v27 = vld [vmem:[#allocation10 + $0x84] sm:$0xf0] }
 0x128   :  { %v1370_v35 = vpop.f32.mrf.mxu0  ;;  %2038 = vmatpush.bf16.msra.mxu0 %v3375_v26  ;;  %2066 = vmatpush.bf16.msra.mxu2 %v3379_v30  ;;  %v3398_v26 = vld [vmem:[#allocation10 + $0x80] sm:$0xf]  ;;  %v3400_v30 = vld [vmem:[#allocation10 + $0x88] sm:$0xf0] }
 0x129   :  { %v1384_v37 = vpop.f32.mrf.mxu1  ;;  %v1371_v41 = vadd.f32 %v1370_v35, %v391_v38  ;;  %v3826_v35 = vld [vmem:[#allocation10 + $0x44] sm:$0xf] }
 0x12b   :  { %v1385_v45 = vadd.f32 %v1384_v37, %v1371_v41  ;;  %v3440_v37 = vld [vmem:[#allocation10 + $0xd8] sm:$0xf0]  ;;  %v3367_v41 = vor.u32 %v3827_v29, %v3366_v28  ;;  %v3834_v28 = vld [vmem:[#allocation10 + $0x84] sm:$0xf]  ;;  %v3399_v29 = vor.u32 %v3835_v27, %v3398_v26 }
 0x12d   :  { %2039 = vmatpush.bf16.msra.mxu0 %v3367_v41 }
 0x130   :  { %v1398_v40 = vpop.f32.mrf.mxu2  ;;  %v1372_v42 = vpop.f32.mrf.mxu0 }
 0x131   :  { %v1386_v43 = vpop.f32.mrf.mxu1  ;;  %v1412_v44 = vpop.f32.mrf.mxu3  ;;  %v1373_v46 = vadd.f32 %v1372_v42, %v391_v38  ;;  %v1399_v47 = vadd.f32 %v1398_v40, %v1385_v45  ;;  %v3439_v38 = vor.u32 %v3845_v32, %v3438_v31  ;;  %v3443_v40 = vor.u32 %v3844_v33, %v3440_v37  ;;  %v3824_v45 = vld [vmem:[#allocation10 + $0x34] sm:$0xf]  ;;  %v3857_v33 = vld [vmem:[#allocation11 + $0x38] sm:$0xff] }
 0x132   :  { %v3371_v42 = vor.u32 %v3826_v35, %v3368_v36  ;;  %v3403_v31 = vor.u32 %v3834_v28, %v3400_v30  ;;  %v3865_v35 = vld [vmem:[#allocation11 + $0x78] sm:$0xff]  ;;  %v3856_v36 = vld [vmem:[#allocation11 + $0x30] sm:$0xff]  ;;  %v1873_v28 = vperm.slane %v1870_v19, 1  ;;  %v3882_v19 = vld [vmem:[#allocation16] sm:$0xff] }
 0x133   :  { %v1387_v48 = vadd.f32 %v1386_v43, %v1373_v46  ;;  %v1413_v52 = vadd.f32 %v1412_v44, %v1399_v47  ;;  %2052 = vmatpush.bf16.msra.mxu1 %v3439_v38  ;;  %2080 = vmatpush.bf16.msra.mxu3 %v3443_v40  ;;  %v3358_v43 = vld [vmem:[#allocation10 + $0x30] sm:$0xf]  ;;  %v3825_v44 = vld [vmem:[#allocation10 + $0x34] sm:$0xf0]  ;;  %v3360_v47 = vld [vmem:[#allocation10 + $0x38] sm:$0xf0] }
 0x134   :  { %2067 = vmatpush.bf16.msra.mxu2 %v3371_v42  ;;  %v3359_v46 = vor.u32 %v3825_v44, %v3358_v43  ;;  %v3855_v38 = vld [vmem:[#allocation11 + $0x28] sm:$0xff] }
 0x135   :  { %v1502_v40 = vld [vmem:[%s4375_s4] sm:$0x3] }
 0x136   :  { %2040 = vmatpush.bf16.msra.mxu0 %v3359_v46  ;;  %v1504_v43 = vperm.slane %v1502_v40, 0 }
 0x138   :  { %v1400_v49 = vpop.f32.mrf.mxu2 }
 0x139   :  { %v1401_v53 = vadd.f32 %v1400_v49, %v1387_v48  ;;  %v1414_v54 = vpop.f32.mrf.mxu3  ;;  %v3363_v48 = vor.u32 %v3824_v45, %v3360_v47  ;;  %v3430_v49 = vld [vmem:[#allocation10 + $0xc0] sm:$0xf]  ;;  %v1505_v47 = vperm.slane %v1502_v40, 1 }
 0x13b   :  { %v1415_v56 = vadd.f32 %v1414_v54, %v1401_v53  ;;  %v3432_v53 = vld [vmem:[#allocation10 + $0xc8] sm:$0xf0]  ;;  %2068 = vmatpush.bf16.msra.mxu2 %v3363_v48 }
 0x148   :  { %v1426_v50 = vpop.f32.mrf.mxu0 }
 0x149   :  { %v1440_v51 = vpop.f32.mrf.mxu1  ;;  %v1427_v55 = vadd.f32 %v1426_v50, %v1413_v52  ;;  %v3843_v50 = vld [vmem:[#allocation10 + $0xc4] sm:$0xf0] }
 0x14a   :  { %v3431_v52 = vor.u32 %v3843_v50, %v3430_v49 }
 0x14b   :  { %v1441_v57 = vadd.f32 %v1440_v51, %v1427_v55  ;;  %v3842_v51 = vld [vmem:[#allocation10 + $0xc4] sm:$0xf]  ;;  %v3350_v55 = vld [vmem:[#allocation10 + $0x20] sm:$0xf] }
 0x14c   :  { %v3435_v54 = vor.u32 %v3842_v51, %v3432_v53  ;;  %2053 = vmatpush.bf16.msra.mxu1 %v3431_v52 }
 0x14d   :  { %v1447_v39 = vmax.f32 %v1441_v57, 0.0 }
 0x14e   :  { %2081 = vmatpush.bf16.msra.mxu3 %v3435_v54 }
 0x150   :  { %v1428_v34 = vpop.f32.mrf.mxu0 }
 0x151   :  { %v1429_v4 = vadd.f32 %v1428_v34, %v1415_v56  ;;  %v1442_v58 = vpop.f32.mrf.mxu1  ;;  %v3823_v56 = vld [vmem:[#allocation10 + $0x24] sm:$0xf0]  ;;  %v3822_v34 = vld [vmem:[#allocation10 + $0x24] sm:$0xf] }
 0x152   :  { %v3351_v57 = vor.u32 %v3823_v56, %v3350_v55 }
 0x153   :  { %v1443_v60 = vadd.f32 %v1442_v58, %v1429_v4  ;;  %v3352_v4 = vld [vmem:[#allocation10 + $0x28] sm:$0xf0] }
 0x154   :  { %v3355_v58 = vor.u32 %v3822_v34, %v3352_v4  ;;  %2041 = vmatpush.bf16.msra.mxu0 %v3351_v57 }
 0x155   :  { %v1450_v61 = vmax.f32 %v1443_v60, 0.0  ;;  %v3422_v60 = vld [vmem:[#allocation10 + $0xb0] sm:$0xf] }
 0x156   :  { %2069 = vmatpush.bf16.msra.mxu2 %v3355_v58 }
 0x157   :  { %v1453_v62 = vpack.c.bf16 %v1450_v61, %v1447_v39  ;;  %v3841_v39 = vld [vmem:[#allocation10 + $0xb4] sm:$0xf0]  ;;  %v3840_v61 = vld [vmem:[#allocation10 + $0xb4] sm:$0xf] }
 0x158   :  { %v3427_v59 = vor.u32 %v3840_v61, %v3424_v63  ;;  %2042 = vmatpush.bf16.msra.mxu0 %v3343_v5  ;;  %v3864_v5 = vld [vmem:[#allocation11 + $0x70] sm:$0xff] }
 0x159   :  { %1784 = vmatmul.bf16.vlgmr.msrb.gmra.mxu0 %v1453_v62  ;;  %1826 = vmatmul.bf16.vlgmr.msrb.gmra.mxu3 %v1453_v62  ;;  %v3423_v62 = vor.u32 %v3841_v39, %v3422_v60 }
 0x15a   :  { %2082 = vmatpush.bf16.msra.mxu3 %v3427_v59  ;;  %2070 = vmatpush.bf16.msra.mxu2 %v3347_v12  ;;  %v3863_v12 = vld [vmem:[#allocation11 + $0x68] sm:$0xff] }
 0x15b   :  { %2054 = vmatpush.bf16.msra.mxu1 %v3423_v62 }
 0x15c   :  { %2043 = vmatpush.bf16.msra.mxu0 %v3335_v15  ;;  %v3873_v15 = vld [vmem:[#allocation13 + $0x38] sm:$0xff] }
 0x15e   :  { %2083 = vmatpush.bf16.msra.mxu3 %v3419_v10  ;;  %2071 = vmatpush.bf16.msra.mxu2 %v3339_v17  ;;  %v3860_v10 = vld [vmem:[#allocation11 + $0x50] sm:$0xff] }
 0x15f   :  { %2055 = vmatpush.bf16.msra.mxu1 %v3415_v8  ;;  %v3861_v8 = vld [vmem:[#allocation11 + $0x58] sm:$0xff] }
 0x160   :  { %2230 = vmatpush.bf16.msrb.mxu0 %v3857_v33 }
 0x162   :  { %2084 = vmatpush.bf16.msra.mxu3 %v3411_v25  ;;  %2329 = vmatpush.bf16.msrb.mxu2 %v3873_v15 }
 0x163   :  { %2056 = vmatpush.bf16.msra.mxu1 %v3407_v21 }
 0x164   :  { %2231 = vmatpush.bf16.msrb.mxu0 %v3856_v36 }
 0x166   :  { %2085 = vmatpush.bf16.msra.mxu3 %v3403_v31  ;;  %2330 = vmatpush.bf16.msrb.mxu2 %v3872_v16  ;;  %v3885_v16 = vld [vmem:[#allocation16 + $0x18] sm:$0xff] }
 0x167   :  { %2057 = vmatpush.bf16.msra.mxu1 %v3399_v29 }
 0x168   :  { %2232 = vmatpush.bf16.msrb.mxu0 %v3855_v38 }
 0x16a   :  { %2331 = vmatpush.bf16.msrb.mxu2 %v3871_v18  ;;  %v3883_v18 = vld [vmem:[#allocation16 + $0x8] sm:$0xff] }
 0x16b   :  { %2244 = vmatpush.bf16.msrb.mxu1 %v3865_v35 }
 0x16c   :  { %2233 = vmatpush.bf16.msrb.mxu0 %v3854_v3  ;;  %v3889_v3 = vld [vmem:[#allocation16 + $0x38] sm:$0xff] }
 0x16f   :  { %2245 = vmatpush.bf16.msrb.mxu1 %v3864_v5  ;;  %v3874_v5 = vld [vmem:[#allocation14] sm:$0xff] }
 0x170   :  { %2234 = vmatpush.bf16.msrb.mxu0 %v3853_v6  ;;  %v3887_v6 = vld [vmem:[#allocation16 + $0x28] sm:$0xff] }
 0x173   :  { %2246 = vmatpush.bf16.msrb.mxu1 %v3863_v12  ;;  %v3888_v12 = vld [vmem:[#allocation16 + $0x30] sm:$0xff] }
 0x174   :  { %2235 = vmatpush.bf16.msrb.mxu0 %v3852_v23 }
 0x176   :  { %v1799_v41 = vpop.f32.mrf.mxu1 }
 0x177   :  { %v1800_v55 = vadd.f32 %v1799_v41, %v1505_v47  ;;  %2247 = vmatpush.bf16.msrb.mxu1 %v3862_v7  ;;  %v3886_v7 = vld [vmem:[#allocation16 + $0x20] sm:$0xff] }
 0x178   :  { %2236 = vmatpush.bf16.msrb.mxu0 %v3851_v9 }
 0x17b   :  { %2248 = vmatpush.bf16.msrb.mxu1 %v3861_v8  ;;  %v3914_v8 = vld [vmem:[%s4381_s10] ss:$0 sm:$0xff] }
 0x17c   :  { %v1757_v24 = vpop.f32.mrf.mxu2  ;;  %2237 = vmatpush.bf16.msrb.mxu0 %v3850_v11 }
 0x17d   :  { %v1758_v46 = vadd.f32 %v1757_v24, %v1504_v43 }
 0x17e   :  { %v1801_v53 = vpop.f32.mrf.mxu1 }
 0x17f   :  { %v1802_v57 = vadd.f32 %v1801_v53, %v1505_v47  ;;  %2249 = vmatpush.bf16.msrb.mxu1 %v3860_v10  ;;  %v3869_v47 = vld [vmem:[#allocation13 + $0x18] sm:$0xff]  ;;  %v3879_v53 = vld [vmem:[#allocation14 + $0x28] sm:$0xff] }
 0x183   :  { %2250 = vmatpush.bf16.msrb.mxu1 %v3859_v13 }
 0x184   :  { %v1759_v37 = vpop.f32.mrf.mxu2 }
 0x185   :  { %v1760_v48 = vadd.f32 %v1759_v37, %v1504_v43 }
 0x187   :  { %2251 = vmatpush.bf16.msrb.mxu1 %v3858_v14 }
 0x1a4   :  { %v1771_v32 = vpop.f32.mrf.mxu3  ;;  %v1813_v44 = vpop.f32.mrf.mxu2 }
 0x1a5   :  { %v1772_v49 = vadd.f32 %v1771_v32, %v1758_v46  ;;  %v1814_v4 = vadd.f32 %v1813_v44, %v1800_v55  ;;  %v3870_v46 = vld [vmem:[#allocation13 + $0x20] sm:$0xff] }
 0x1a6   :  { %2332 = vmatpush.bf16.msrb.mxu2 %v3870_v46 }
 0x1aa   :  { %2333 = vmatpush.bf16.msrb.mxu2 %v3869_v47 }
 0x1ac   :  { %v1773_v42 = vpop.f32.mrf.mxu3  ;;  %v1815_v34 = vpop.f32.mrf.mxu2 }
 0x1ad   :  { %v1774_v51 = vadd.f32 %v1773_v42, %v1760_v48  ;;  %v1816_v39 = vadd.f32 %v1815_v34, %v1802_v57  ;;  %v3868_v48 = vld [vmem:[#allocation13 + $0x10] sm:$0xff]  ;;  %v3913_v34 = vld [vmem:[%s4379_s8] ss:$0 sm:$0xff] }
 0x1ae   :  { %2334 = vmatpush.bf16.msrb.mxu2 %v3868_v48 }
 0x1d6   :  { %v1785_v45 = vpop.f32.mrf.mxu0 }
 0x1d7   :  { %v1786_v52 = vadd.f32 %v1785_v45, %v1772_v49  ;;  %v3867_v49 = vld [vmem:[#allocation13 + $0x8] sm:$0xff] }
 0x1d8   :  { %2335 = vmatpush.bf16.msrb.mxu2 %v3867_v49 }
 0x1d9   :  { %v1832_v58 = vmax.f32 %v1786_v52, 0.0  ;;  %v3880_v52 = vld [vmem:[#allocation14 + $0x30] sm:$0xff] }
 0x1dc   :  { %v1827_v50 = vpop.f32.mrf.mxu3 }
 0x1dd   :  { %v1828_v61 = vadd.f32 %v1827_v50, %v1814_v4  ;;  %v3866_v50 = vld [vmem:[#allocation13] sm:$0xff] }
 0x1de   :  { %v1787_v54 = vpop.f32.mrf.mxu0  ;;  %2336 = vmatpush.bf16.msrb.mxu2 %v3866_v50 }
 0x1df   :  { %v1788_v56 = vadd.f32 %v1787_v54, %v1774_v51  ;;  %v1833_v0 = vmax.f32 %v1828_v61, 0.0  ;;  %v3881_v51 = vld [vmem:[#allocation14 + $0x38] sm:$0xff]  ;;  %v3878_v54 = vld [vmem:[#allocation14 + $0x20] sm:$0xff] }
 0x1e0   :  { %2414 = vmatpush.bf16.msrb.mxu3 %v3881_v51 }
 0x1e1   :  { %v1834_v60 = vmax.f32 %v1788_v56, 0.0 }
 0x1e3   :  { %v1836_v62 = vpack.c.bf16 %v1834_v60, %v1832_v58 }
 0x1e4   :  { %v1829_v63 = vpop.f32.mrf.mxu3  ;;  %2415 = vmatpush.bf16.msrb.mxu3 %v3880_v52 }
 0x1e5   :  { %v1830_v59 = vadd.f32 %v1829_v63, %v1816_v39  ;;  %2044 = vmatmul.bf16.vlgmr.msra.gmra.mxu0 %v1836_v62  ;;  %2072 = vmatmul.bf16.vlgmr.msra.gmra.mxu2 %v1836_v62 }
 0x1e6   :  { %2499 = vmatpush.bf16.msra.mxu0 %v3889_v3 }
 0x1e7   :  { %v1835_v1 = vmax.f32 %v1830_v59, 0.0 }
 0x1e8   :  { %2416 = vmatpush.bf16.msrb.mxu3 %v3879_v53 }
 0x1e9   :  { %v1837_v2 = vpack.c.bf16 %v1835_v1, %v1833_v0  ;;  %v3877_v0 = vld [vmem:[#allocation14 + $0x18] sm:$0xff]  ;;  %v3876_v1 = vld [vmem:[#allocation14 + $0x10] sm:$0xff] }
 0x1ea   :  { %2500 = vmatpush.bf16.msra.mxu0 %v3888_v12 }
 0x1eb   :  { %2058 = vmatmul.bf16.vlgmr.msra.gmra.mxu1 %v1837_v2  ;;  %2086 = vmatmul.bf16.vlgmr.msra.gmra.mxu3 %v1837_v2  ;;  %v3875_v2 = vld [vmem:[#allocation14 + $0x8] sm:$0xff] }
 0x1ec   :  { %2417 = vmatpush.bf16.msrb.mxu3 %v3878_v54 }
 0x1ee   :  { %2501 = vmatpush.bf16.msra.mxu0 %v3887_v6 }
 0x1f0   :  { %2418 = vmatpush.bf16.msrb.mxu3 %v3877_v0 }
 0x1f2   :  { %2502 = vmatpush.bf16.msra.mxu0 %v3886_v7 }
 0x1f4   :  { %2419 = vmatpush.bf16.msrb.mxu3 %v3876_v1 }
 0x1f6   :  { %2503 = vmatpush.bf16.msra.mxu0 %v3885_v16 }
 0x1f8   :  { %2420 = vmatpush.bf16.msrb.mxu3 %v3875_v2 }
 0x1fc   :  { %2421 = vmatpush.bf16.msrb.mxu3 %v3874_v5 }
 0x262   :  { %v2045_v17 = vpop.f32.mrf.mxu0 }
 0x263   :  { %v2046_v25 = vadd.f32 %v2045_v17, %v1872_v22  ;;  %v3884_v17 = vld [vmem:[#allocation16 + $0x10] sm:$0xff] }
 0x264   :  { %2504 = vmatpush.bf16.msra.mxu0 %v3884_v17 }
 0x268   :  { %v2059_v20 = vpop.f32.mrf.mxu1  ;;  %v2073_v21 = vpop.f32.mrf.mxu2  ;;  %2505 = vmatpush.bf16.msra.mxu0 %v3883_v18 }
 0x269   :  { %v2060_v27 = vadd.f32 %v2059_v20, %v2046_v25  ;;  %v2074_v35 = vadd.f32 %v2073_v21, %v1873_v28  ;;  %v3915_v21 = vld [vmem:[%s4383_s12] ss:$0 sm:$0xff] }
 0x26a   :  { %v2047_v24 = vpop.f32.mrf.mxu0 }
 0x26b   :  { %v2048_v29 = vadd.f32 %v2047_v24, %v1872_v22  ;;  %v2092_v33 = vmax.f32 %v2060_v27, 0.0 }
 0x26c   :  { %2506 = vmatpush.bf16.msra.mxu0 %v3882_v19 }
 0x26e   :  { %v2087_v26 = vpop.f32.mrf.mxu3 }
 0x26f   :  { %v2088_v37 = vadd.f32 %v2087_v26, %v2074_v35 }
 0x270   :  { %v2061_v30 = vpop.f32.mrf.mxu1  ;;  %v2075_v32 = vpop.f32.mrf.mxu2 }
 0x271   :  { %v2062_v31 = vadd.f32 %v2061_v30, %v2048_v29  ;;  %v2076_v40 = vadd.f32 %v2075_v32, %v1873_v28  ;;  %v2093_v43 = vmax.f32 %v2088_v37, 0.0  ;;  %v3916_v30 = vld [vmem:[%s4385_s14] ss:$0 sm:$0xff] }
 0x273   :  { %v2094_v36 = vmax.f32 %v2062_v31, 0.0 }
 0x275   :  { %v2096_v38 = vpack.c.bf16 %v2094_v36, %v2092_v33 }
 0x276   :  { %v2089_v41 = vpop.f32.mrf.mxu3 }
 0x277   :  { %v2090_v42 = vadd.f32 %v2089_v41, %v2076_v40  ;;  %2238 = vmatmul.bf16.vlgmr.msrb.gmra.mxu0 %v2096_v38 }
 0x279   :  { %v2095_v44 = vmax.f32 %v2090_v42, 0.0 }
 0x27b   :  { %v2097_v45 = vpack.c.bf16 %v2095_v44, %v2093_v43 }
 0x27d   :  { %2252 = vmatmul.bf16.vlgmr.msrb.gmra.mxu1 %v2097_v45 }
 0x2f4   :  { %v2239_v55 = vpop.f32.mrf.mxu0 }
 0x2f5   :  { %v2240_v4 = vadd.f32 %v3913_v34, %v2239_v55 }
 0x2fa   :  { %v2253_v56 = vpop.f32.mrf.mxu1 }
 0x2fb   :  { %v2254_v58 = vadd.f32 %v2253_v56, %v2240_v4 }
 0x2fc   :  { %v2241_v57 = vpop.f32.mrf.mxu0 }
 0x2fd   :  { %v2242_v60 = vadd.f32 %v3913_v34, %v2241_v57  ;;  %v2258_v62 = vmax.f32 %v2254_v58, 0.0 }
 0x302   :  { %v2255_v39 = vpop.f32.mrf.mxu1 }
 0x303   :  { %v2256_v61 = vadd.f32 %v2255_v39, %v2242_v60 }
 0x305   :  { %v2259_v63 = vmax.f32 %v2256_v61, 0.0 }
 0x307   :  { %v2260_v59 = vpack.c.bf16 %v2259_v63, %v2258_v62 }
 0x309   :  { %2337 = vmatmul.bf16.vlgmr.msrb.gmra.mxu2 %v2260_v59 }
 0x38c   :  { %v2338_v23 = vpop.f32.mrf.mxu2 }
 0x38d   :  { %v2339_v9 = vadd.f32 %v3914_v8, %v2338_v23 }
 0x38f   :  { %v2343_v13 = vmax.f32 %v2339_v9, 0.0 }
 0x394   :  { %v2340_v10 = vpop.f32.mrf.mxu2 }
 0x395   :  { %v2341_v11 = vadd.f32 %v3914_v8, %v2340_v10 }
 0x397   :  { %v2344_v14 = vmax.f32 %v2341_v11, 0.0 }
 0x399   :  { %v2345_v15 = vpack.c.bf16 %v2344_v14, %v2343_v13 }
 0x39b   :  { %2422 = vmatmul.bf16.vlgmr.msrb.gmra.mxu3 %v2345_v15 }
 0x41e   :  { %v2423_v20 = vpop.f32.mrf.mxu3 }
 0x41f   :  { %v2424_v22 = vadd.f32 %v3915_v21, %v2423_v20 }
 0x421   :  { %v2428_v26 = vmax.f32 %v2424_v22, 0.0 }
 0x426   :  { %v2425_v24 = vpop.f32.mrf.mxu3 }
 0x427   :  { %v2426_v25 = vadd.f32 %v3915_v21, %v2425_v24 }
 0x429   :  { %v2429_v27 = vmax.f32 %v2426_v25, 0.0 }
 0x42b   :  { %v2430_v28 = vpack.c.bf16 %v2429_v27, %v2428_v26 }
 0x42d   :  { %2507 = vmatmul.bf16.vlgmr.msra.gmra.mxu0 %v2430_v28 }
 0x4aa   :  { %v2508_v29 = vpop.f32.mrf.mxu0 }
 0x4ab   :  { %v2509_v32 = vadd.f32 %v3916_v30, %v2508_v29 }
 0x4b2   :  { %v2510_v31 = vpop.f32.mrf.mxu0 }
 0x4b3   :  { %v2511_v33 = vadd.f32 %v3916_v30, %v2510_v31 }
 0x4b5   :  { %v3893_v35 = vpack.c.bf16 %v2511_v33, %v2509_v32 }
 0x4b7   :  { %3894 = vst [vmem:[#allocation17] sm:$0xff] %v3893_v35  }
 0x4b8   :  { %2529 = dma.vmem_to_hbm [thread:$0]  %s2522_s27, 128, %s2524_s28, [#allocation4], %s4176_s23, %s4176_s23, %s4177_s24  }
 0x4b9   :  { %4167 = dma.done.wait [#allocation4], 128  }
 0x4ba   :  { %4168 = vsyncadd [#allocation4], 4294967168 }
 0x4bb   :  { %2534 = vsyncpa [#allocation3], 1 }
 0x4bc   :  { %2535 = vsyncpa [#allocation6], 1 }
 0x4bd   :  { %2536 = vsyncpa [#allocation9], 1 }
 0x4be   :  { %2537 = vsyncpa [#allocation12], 1 }
 0x4bf   :  { %2538 = vsyncpa [#allocation15], 1 }
 0x4c0   :  { %2539 = vsyncpa [#allocation4], 1 }

</bundles_post_ra>
